<compile_context>
chip_gen: v7x
topology: tpu7x:2x2x1
jax: 0.10.0
libtpu: 0.0.40
codegen_flags: <defaults>
</compile_context>

<pallas_src>
import jax
import jax.numpy as jnp
from jax.experimental import pallas as pl
from jax.experimental.pallas import tpu as pltpu

MODEL_DIM = 32
FF_DIM = 64
TIME = 1.0
STEP_SIZE = 0.25
NFE = int(TIME / STEP_SIZE)       # number of ODE function evals (Euler steps)
M = NFE + 1                       # number of concatenated states
LN_EPS = 1e-5                     # nn.LayerNorm default eps

PACK = 128 // MODEL_DIM           # logical rows packed per 128-lane row (= 4)
DP = PACK * MODEL_DIM             # 128  packed feature width
FP = PACK * FF_DIM                # 256  packed feed-forward width


def spatial_ode_kernel(x_ref, wode_ref, bode_ref, w1_ref, b1_ref,
                       w2_ref, b2_ref, g_ref, beta_ref, seg_ref, o_ref):
    x = x_ref[...].astype(jnp.float32)                      # (T, 128)
    residual = x
    tile = x.shape[0]

    # Hoist weight/bias loads and the bias broadcast out of the Euler loop.
    w_ode = wode_ref[...]                                   # (128, 128)
    b_ode = jnp.broadcast_to(bode_ref[...], (tile, DP))     # (T, 128)

    # Fused Euler integration + first projection:
    #   acc = sum_j state_j @ W1[j*D:(j+1)*D, :]  (block-diag packed, no concat)
    acc = jnp.zeros((tile, FP), jnp.float32)
    cur = x
    for j in range(NFE):
        acc = acc + jnp.dot(cur, w1_ref[j], preferred_element_type=jnp.float32)
        dx = jnp.tanh(
            jnp.dot(cur, w_ode, preferred_element_type=jnp.float32) + b_ode)
        cur = cur + STEP_SIZE * dx
    acc = acc + jnp.dot(cur, w1_ref[NFE], preferred_element_type=jnp.float32)

    # proj tail: ReLU -> Linear(ff -> model_dim); dropout is identity in eval.
    h = jnp.maximum(acc + b1_ref[...], 0.0)
    h = jnp.dot(h, w2_ref[...], preferred_element_type=jnp.float32) + b2_ref[...]
    y = h + residual

    # LayerNorm over each 32-lane segment via a constant segment-averaging
    # matmul (keeps the cross-lane reduction on the MXU).
    seg = seg_ref[...]                                      # (128, 128)
    mean = jnp.dot(y, seg, preferred_element_type=jnp.float32)
    diff = y - mean
    var = jnp.dot(diff * diff, seg, preferred_element_type=jnp.float32)
    y_hat = diff * jax.lax.rsqrt(var + LN_EPS)
    o_ref[...] = (y_hat * g_ref[...] + beta_ref[...]).astype(o_ref.dtype)


def pack_params(params):
    """Expand per-32-feature weights into PACK-way block-diagonal form (once)."""
    w_ode, b_ode, w1, b1, w2, b2, gamma, beta = params
    eye = jnp.eye(PACK, dtype=jnp.float32)
    w_ode_bd = jnp.kron(eye, w_ode)                                  # (128, 128)
    b_ode_t = jnp.tile(b_ode, (1, PACK))                             # (1, 128)
    w1_bd = jnp.stack(
        [jnp.kron(eye, w1[j * MODEL_DIM:(j + 1) * MODEL_DIM, :])
         for j in range(M)], axis=0)                                 # (M, 128, 256)
    b1_t = jnp.tile(b1, (1, PACK))                                   # (1, 256)
    w2_bd = jnp.kron(eye, w2)                                        # (256, 128)
    b2_t = jnp.tile(b2, (1, PACK))                                   # (1, 128)
    gamma_t = jnp.tile(gamma, (1, PACK))                             # (1, 128)
    beta_t = jnp.tile(beta, (1, PACK))                               # (1, 128)
    seg = jnp.kron(eye, jnp.full((MODEL_DIM, MODEL_DIM),
                                 1.0 / MODEL_DIM, jnp.float32))      # (128, 128)
    return (w_ode_bd, b_ode_t, w1_bd, b1_t, w2_bd, b2_t,
            gamma_t, beta_t, seg)


def spatial_ode(x, params, *, row_tile=256):
    B, N, D = x.shape
    assert D == MODEL_DIM
    R = B * N
    assert R % PACK == 0, "rows must pack 4-per-128-lane-row"
    Rp = R // PACK

    # Choose a large row tile, but keep >= 2 grid steps (v7x: 2 TCs/chip).
    row_tile = min(row_tile, Rp)
    if Rp // row_tile < 2 and Rp >= 16:
        row_tile = Rp // 2
    while Rp % row_tile != 0:
        row_tile //= 2
    assert row_tile >= 1 and (row_tile == Rp or row_tile % 8 == 0)

    x2 = x.reshape(R, D).reshape(Rp, DP)                    # lane-dense packing
    packed = pack_params(params)
    (w_ode_bd, b_ode_t, w1_bd, b1_t, w2_bd, b2_t,
     gamma_t, beta_t, seg) = packed

    grid = (Rp // row_tile,)

    def const2d(arr):
        return pl.BlockSpec(arr.shape, lambda i: (0, 0))

    flops = Rp * (NFE * 2 * DP * DP          # ODE matmuls
                  + M * 2 * DP * FP          # fused first projection
                  + 2 * FP * DP              # second projection
                  + 2 * 2 * DP * DP)         # LayerNorm mean/var matmuls
    bytes_accessed = 2 * Rp * DP * 4 + sum(int(p.size) * 4 for p in packed)
    cost = pl.CostEstimate(flops=int(flops),
                           transcendentals=int(Rp * NFE * DP),
                           bytes_accessed=int(bytes_accessed))

    out = pl.pallas_call(
        spatial_ode_kernel,
        out_shape=jax.ShapeDtypeStruct((Rp, DP), x.dtype),
        grid=grid,
        in_specs=[
            pl.BlockSpec((row_tile, DP), lambda i: (i, 0)),          # packed x
            const2d(w_ode_bd), const2d(b_ode_t),
            pl.BlockSpec(w1_bd.shape, lambda i: (0, 0, 0)),          # (M,128,256)
            const2d(b1_t), const2d(w2_bd), const2d(b2_t),
            const2d(gamma_t), const2d(beta_t), const2d(seg),
        ],
        out_specs=pl.BlockSpec((row_tile, DP), lambda i: (i, 0)),
        compiler_params=pltpu.CompilerParams(
            dimension_semantics=("parallel",)),
        cost_estimate=cost,
    )(x2, w_ode_bd, b_ode_t, w1_bd, b1_t, w2_bd, b2_t, gamma_t, beta_t, seg)

    return out.reshape(R, D).reshape(B, N, D)


def spatial_ode_reference(x, params):
    """Pure-JAX reference with identical semantics (for sanity checking)."""
    w_ode, b_ode, w1, b1, w2, b2, gamma, beta = params
    residual = x
    states = []
    cur = x
    for _ in range(NFE):
        states.append(cur)
        cur = cur + STEP_SIZE * jnp.tanh(cur @ w_ode + b_ode)
    states.append(cur)
    h = jnp.concatenate(states, axis=-1)
    h = jnp.maximum(h @ w1 + b1, 0.0)
    h = h @ w2 + b2
    y = h + residual
    mean = jnp.mean(y, axis=-1, keepdims=True)
    var = jnp.mean(jnp.square(y - mean), axis=-1, keepdims=True)
    return (y - mean) * jax.lax.rsqrt(var + LN_EPS) * gamma + beta


def init_params(key):
    k = jax.random.split(key, 6)
    D, F = MODEL_DIM, FF_DIM
    w_ode = jax.random.normal(k[0], (D, D), jnp.float32) * 0.05
    b_ode = jax.random.normal(k[1], (1, D), jnp.float32) * 0.05
    w1 = jax.random.normal(k[2], (D * M, F), jnp.float32) * (1.0 / (D * M) ** 0.5)
    b1 = jnp.zeros((1, F), jnp.float32)
    w2 = jax.random.normal(k[3], (F, D), jnp.float32) * (1.0 / F ** 0.5)
    b2 = jnp.zeros((1, D), jnp.float32)
    gamma = jnp.ones((1, D), jnp.float32)
    beta = jnp.zeros((1, D), jnp.float32)
    return (w_ode, b_ode, w1, b1, w2, b2, gamma, beta)


if __name__ == "__main__":
    key = jax.random.PRNGKey(0)
    kx, kp = jax.random.split(key)

    # (B, N, D) = [batch, spatial nodes, model_dim]; R = B*N = 1024 logical rows
    # -> 256 packed rows -> row_tile 128 -> grid of 2 "parallel" steps.
    B, N = 2, 512
    x = jax.random.normal(kx, (B, N, MODEL_DIM), jnp.float32)
    params = init_params(kp)

    out = spatial_ode(x, params)
    out = jax.block_until_ready(out)

    ref = spatial_ode_reference(x, params)
    assert out.shape == ref.shape == (B, N, MODEL_DIM)
    max_err = float(jnp.max(jnp.abs(out - ref)))
    assert max_err < 1e-3, f"max abs error {max_err}"

    print("KERNEL_OK")
</pallas_src>

<mosaic_0001>
module attributes {stable_mosaic.version = 11 : i64} {
  func.func @spatial_ode_kernel(%arg0: i32, %arg1: memref<128x128xf32, #tpu.memory_space<vmem>>, %arg2: memref<128x128xf32, #tpu.memory_space<vmem>>, %arg3: memref<1x128xf32, #tpu.memory_space<vmem>>, %arg4: memref<5x128x256xf32, #tpu.memory_space<vmem>>, %arg5: memref<1x256xf32, #tpu.memory_space<vmem>>, %arg6: memref<256x128xf32, #tpu.memory_space<vmem>>, %arg7: memref<1x128xf32, #tpu.memory_space<vmem>>, %arg8: memref<1x128xf32, #tpu.memory_space<vmem>>, %arg9: memref<1x128xf32, #tpu.memory_space<vmem>>, %arg10: memref<128x128xf32, #tpu.memory_space<vmem>>, %arg11: memref<128x128xf32, #tpu.memory_space<vmem>>) attributes {dimension_semantics = [#tpu.dimension_semantics<parallel>], iteration_bounds = array<i64: 2>, scalar_prefetch = 0 : i64, scratch_operands = 0 : i64, tpu.core_type = #tpu.core_type<tc>, window_params = [{transform_indices = @transform_0, window_bounds = array<i64: 128, 128>}, {pipeline_mode = #tpu.pipeline_mode<synchronous>, transform_indices = @transform_1, window_bounds = array<i64: 128, 128>}, {pipeline_mode = #tpu.pipeline_mode<synchronous>, transform_indices = @transform_2, window_bounds = array<i64: 1, 128>}, {pipeline_mode = #tpu.pipeline_mode<synchronous>, transform_indices = @transform_3, window_bounds = array<i64: 5, 128, 256>}, {pipeline_mode = #tpu.pipeline_mode<synchronous>, transform_indices = @transform_4, window_bounds = array<i64: 1, 256>}, {pipeline_mode = #tpu.pipeline_mode<synchronous>, transform_indices = @transform_5, window_bounds = array<i64: 256, 128>}, {pipeline_mode = #tpu.pipeline_mode<synchronous>, transform_indices = @transform_6, window_bounds = array<i64: 1, 128>}, {pipeline_mode = #tpu.pipeline_mode<synchronous>, transform_indices = @transform_7, window_bounds = array<i64: 1, 128>}, {pipeline_mode = #tpu.pipeline_mode<synchronous>, transform_indices = @transform_8, window_bounds = array<i64: 1, 128>}, {pipeline_mode = #tpu.pipeline_mode<synchronous>, transform_indices = @transform_9, window_bounds = array<i64: 128, 128>}, {transform_indices = @transform_10, window_bounds = array<i64: 128, 128>}]} {
    %c0 = arith.constant 0 : index
    %c0_0 = arith.constant 0 : index
    %0 = vector.load %arg1[%c0, %c0_0] : memref<128x128xf32, #tpu.memory_space<vmem>>, vector<128x128xf32>
    %c0_1 = arith.constant 0 : index
    %c0_2 = arith.constant 0 : index
    %1 = vector.load %arg2[%c0_1, %c0_2] : memref<128x128xf32, #tpu.memory_space<vmem>>, vector<128x128xf32>
    %c0_3 = arith.constant 0 : index
    %c0_4 = arith.constant 0 : index
    %2 = vector.load %arg3[%c0_3, %c0_4] : memref<1x128xf32, #tpu.memory_space<vmem>>, vector<1x128xf32>
    %3 = vector.shape_cast %2 : vector<1x128xf32> to vector<1x128xf32>
    %4 = vector.broadcast %3 : vector<1x128xf32> to vector<128x128xf32>
    %cst = arith.constant 0.000000e+00 : f32
    %5 = vector.broadcast %cst : f32 to vector<128x256xf32>
    %c0_5 = arith.constant 0 : index
    %c0_6 = arith.constant 0 : index
    %c0_7 = arith.constant 0 : index
    %6 = vector.load %arg4[%c0_5, %c0_6, %c0_7] : memref<5x128x256xf32, #tpu.memory_space<vmem>>, vector<1x128x256xf32>
    %7 = vector.shape_cast %6 : vector<1x128x256xf32> to vector<128x256xf32>
    %cst_8 = arith.constant dense<0.000000e+00> : vector<128x256xf32>
    %8 = tpu.matmul %0, %7, %cst_8 {dimension_numbers = #tpu.dot_dimension_numbers<[1], [0], [0], [1], [0, 0, 1, 1], [], []>} : vector<128x128xf32>, vector<128x256xf32>, vector<128x256xf32> -> vector<128x256xf32>
    %9 = arith.addf %5, %8 : vector<128x256xf32>
    %cst_9 = arith.constant dense<0.000000e+00> : vector<128x128xf32>
    %10 = tpu.matmul %0, %1, %cst_9 {dimension_numbers = #tpu.dot_dimension_numbers<[1], [0], [0], [1], [0, 0, 1, 1], [], []>} : vector<128x128xf32>, vector<128x128xf32>, vector<128x128xf32> -> vector<128x128xf32>
    %11 = arith.addf %10, %4 : vector<128x128xf32>
    %12 = math.tanh %11 : vector<128x128xf32>
    %cst_10 = arith.constant 2.500000e-01 : f32
    %13 = vector.broadcast %cst_10 : f32 to vector<128x128xf32>
    %14 = arith.mulf %13, %12 : vector<128x128xf32>
    %15 = arith.addf %0, %14 : vector<128x128xf32>
    %c1 = arith.constant 1 : index
    %c0_11 = arith.constant 0 : index
    %c0_12 = arith.constant 0 : index
    %16 = vector.load %arg4[%c1, %c0_11, %c0_12] : memref<5x128x256xf32, #tpu.memory_space<vmem>>, vector<1x128x256xf32>
    %17 = vector.shape_cast %16 : vector<1x128x256xf32> to vector<128x256xf32>
    %cst_13 = arith.constant dense<0.000000e+00> : vector<128x256xf32>
    %18 = tpu.matmul %15, %17, %cst_13 {dimension_numbers = #tpu.dot_dimension_numbers<[1], [0], [0], [1], [0, 0, 1, 1], [], []>} : vector<128x128xf32>, vector<128x256xf32>, vector<128x256xf32> -> vector<128x256xf32>
    %19 = arith.addf %9, %18 : vector<128x256xf32>
    %cst_14 = arith.constant dense<0.000000e+00> : vector<128x128xf32>
    %20 = tpu.matmul %15, %1, %cst_14 {dimension_numbers = #tpu.dot_dimension_numbers<[1], [0], [0], [1], [0, 0, 1, 1], [], []>} : vector<128x128xf32>, vector<128x128xf32>, vector<128x128xf32> -> vector<128x128xf32>
    %21 = arith.addf %20, %4 : vector<128x128xf32>
    %22 = math.tanh %21 : vector<128x128xf32>
    %cst_15 = arith.constant 2.500000e-01 : f32
    %23 = vector.broadcast %cst_15 : f32 to vector<128x128xf32>
    %24 = arith.mulf %23, %22 : vector<128x128xf32>
    %25 = arith.addf %15, %24 : vector<128x128xf32>
    %c2 = arith.constant 2 : index
    %c0_16 = arith.constant 0 : index
    %c0_17 = arith.constant 0 : index
    %26 = vector.load %arg4[%c2, %c0_16, %c0_17] : memref<5x128x256xf32, #tpu.memory_space<vmem>>, vector<1x128x256xf32>
    %27 = vector.shape_cast %26 : vector<1x128x256xf32> to vector<128x256xf32>
    %cst_18 = arith.constant dense<0.000000e+00> : vector<128x256xf32>
    %28 = tpu.matmul %25, %27, %cst_18 {dimension_numbers = #tpu.dot_dimension_numbers<[1], [0], [0], [1], [0, 0, 1, 1], [], []>} : vector<128x128xf32>, vector<128x256xf32>, vector<128x256xf32> -> vector<128x256xf32>
    %29 = arith.addf %19, %28 : vector<128x256xf32>
    %cst_19 = arith.constant dense<0.000000e+00> : vector<128x128xf32>
    %30 = tpu.matmul %25, %1, %cst_19 {dimension_numbers = #tpu.dot_dimension_numbers<[1], [0], [0], [1], [0, 0, 1, 1], [], []>} : vector<128x128xf32>, vector<128x128xf32>, vector<128x128xf32> -> vector<128x128xf32>
    %31 = arith.addf %30, %4 : vector<128x128xf32>
    %32 = math.tanh %31 : vector<128x128xf32>
    %cst_20 = arith.constant 2.500000e-01 : f32
    %33 = vector.broadcast %cst_20 : f32 to vector<128x128xf32>
    %34 = arith.mulf %33, %32 : vector<128x128xf32>
    %35 = arith.addf %25, %34 : vector<128x128xf32>
    %c3 = arith.constant 3 : index
    %c0_21 = arith.constant 0 : index
    %c0_22 = arith.constant 0 : index
    %36 = vector.load %arg4[%c3, %c0_21, %c0_22] : memref<5x128x256xf32, #tpu.memory_space<vmem>>, vector<1x128x256xf32>
    %37 = vector.shape_cast %36 : vector<1x128x256xf32> to vector<128x256xf32>
    %cst_23 = arith.constant dense<0.000000e+00> : vector<128x256xf32>
    %38 = tpu.matmul %35, %37, %cst_23 {dimension_numbers = #tpu.dot_dimension_numbers<[1], [0], [0], [1], [0, 0, 1, 1], [], []>} : vector<128x128xf32>, vector<128x256xf32>, vector<128x256xf32> -> vector<128x256xf32>
    %39 = arith.addf %29, %38 : vector<128x256xf32>
    %cst_24 = arith.constant dense<0.000000e+00> : vector<128x128xf32>
    %40 = tpu.matmul %35, %1, %cst_24 {dimension_numbers = #tpu.dot_dimension_numbers<[1], [0], [0], [1], [0, 0, 1, 1], [], []>} : vector<128x128xf32>, vector<128x128xf32>, vector<128x128xf32> -> vector<128x128xf32>
    %41 = arith.addf %40, %4 : vector<128x128xf32>
    %42 = math.tanh %41 : vector<128x128xf32>
    %cst_25 = arith.constant 2.500000e-01 : f32
    %43 = vector.broadcast %cst_25 : f32 to vector<128x128xf32>
    %44 = arith.mulf %43, %42 : vector<128x128xf32>
    %45 = arith.addf %35, %44 : vector<128x128xf32>
    %c4 = arith.constant 4 : index
    %c0_26 = arith.constant 0 : index
    %c0_27 = arith.constant 0 : index
    %46 = vector.load %arg4[%c4, %c0_26, %c0_27] : memref<5x128x256xf32, #tpu.memory_space<vmem>>, vector<1x128x256xf32>
    %47 = vector.shape_cast %46 : vector<1x128x256xf32> to vector<128x256xf32>
    %cst_28 = arith.constant dense<0.000000e+00> : vector<128x256xf32>
    %48 = tpu.matmul %45, %47, %cst_28 {dimension_numbers = #tpu.dot_dimension_numbers<[1], [0], [0], [1], [0, 0, 1, 1], [], []>} : vector<128x128xf32>, vector<128x256xf32>, vector<128x256xf32> -> vector<128x256xf32>
    %49 = arith.addf %39, %48 : vector<128x256xf32>
    %c0_29 = arith.constant 0 : index
    %c0_30 = arith.constant 0 : index
    %50 = vector.load %arg5[%c0_29, %c0_30] : memref<1x256xf32, #tpu.memory_space<vmem>>, vector<1x256xf32>
    %51 = vector.broadcast %50 : vector<1x256xf32> to vector<128x256xf32>
    %52 = arith.addf %49, %51 : vector<128x256xf32>
    %cst_31 = arith.constant 0.000000e+00 : f32
    %53 = vector.broadcast %cst_31 : f32 to vector<128x256xf32>
    %54 = arith.maximumf %52, %53 : vector<128x256xf32>
    %c0_32 = arith.constant 0 : index
    %c0_33 = arith.constant 0 : index
    %55 = vector.load %arg6[%c0_32, %c0_33] : memref<256x128xf32, #tpu.memory_space<vmem>>, vector<256x128xf32>
    %cst_34 = arith.constant dense<0.000000e+00> : vector<128x128xf32>
    %56 = tpu.matmul %54, %55, %cst_34 {dimension_numbers = #tpu.dot_dimension_numbers<[1], [0], [0], [1], [0, 0, 1, 1], [], []>} : vector<128x256xf32>, vector<256x128xf32>, vector<128x128xf32> -> vector<128x128xf32>
    %c0_35 = arith.constant 0 : index
    %c0_36 = arith.constant 0 : index
    %57 = vector.load %arg7[%c0_35, %c0_36] : memref<1x128xf32, #tpu.memory_space<vmem>>, vector<1x128xf32>
    %58 = vector.broadcast %57 : vector<1x128xf32> to vector<128x128xf32>
    %59 = arith.addf %56, %58 : vector<128x128xf32>
    %60 = arith.addf %59, %0 : vector<128x128xf32>
    %c0_37 = arith.constant 0 : index
    %c0_38 = arith.constant 0 : index
    %61 = vector.load %arg10[%c0_37, %c0_38] : memref<128x128xf32, #tpu.memory_space<vmem>>, vector<128x128xf32>
    %cst_39 = arith.constant dense<0.000000e+00> : vector<128x128xf32>
    %62 = tpu.matmul %60, %61, %cst_39 {dimension_numbers = #tpu.dot_dimension_numbers<[1], [0], [0], [1], [0, 0, 1, 1], [], []>} : vector<128x128xf32>, vector<128x128xf32>, vector<128x128xf32> -> vector<128x128xf32>
    %63 = arith.subf %60, %62 : vector<128x128xf32>
    %64 = arith.mulf %63, %63 : vector<128x128xf32>
    %cst_40 = arith.constant dense<0.000000e+00> : vector<128x128xf32>
    %65 = tpu.matmul %64, %61, %cst_40 {dimension_numbers = #tpu.dot_dimension_numbers<[1], [0], [0], [1], [0, 0, 1, 1], [], []>} : vector<128x128xf32>, vector<128x128xf32>, vector<128x128xf32> -> vector<128x128xf32>
    %cst_41 = arith.constant 9.99999974E-6 : f32
    %66 = vector.broadcast %cst_41 : f32 to vector<128x128xf32>
    %67 = arith.addf %65, %66 : vector<128x128xf32>
    %68 = math.rsqrt %67 : vector<128x128xf32>
    %69 = arith.mulf %63, %68 : vector<128x128xf32>
    %c0_42 = arith.constant 0 : index
    %c0_43 = arith.constant 0 : index
    %70 = vector.load %arg8[%c0_42, %c0_43] : memref<1x128xf32, #tpu.memory_space<vmem>>, vector<1x128xf32>
    %71 = vector.broadcast %70 : vector<1x128xf32> to vector<128x128xf32>
    %72 = arith.mulf %69, %71 : vector<128x128xf32>
    %c0_44 = arith.constant 0 : index
    %c0_45 = arith.constant 0 : index
    %73 = vector.load %arg9[%c0_44, %c0_45] : memref<1x128xf32, #tpu.memory_space<vmem>>, vector<1x128xf32>
    %74 = vector.broadcast %73 : vector<1x128xf32> to vector<128x128xf32>
    %75 = arith.addf %72, %74 : vector<128x128xf32>
    %c0_46 = arith.constant 0 : index
    %c0_47 = arith.constant 0 : index
    %76 = vector.load %arg11[%c0_46, %c0_47] : memref<128x128xf32, #tpu.memory_space<vmem>>, vector<128x128xf32>
    tpu.vector_store %arg11[%c0_46, %c0_47], %75 {strides = array<i32>} : memref<128x128xf32, #tpu.memory_space<vmem>>, vector<128x128xf32>,
    return
  }
  func.func @transform_0(%arg0: i32) -> (i32, i32) {
    %c0_i32 = arith.constant 0 : i32
    %c0_i32_0 = arith.constant 0 : i32
    return %arg0, %c0_i32 : i32, i32
  }
  func.func @transform_1(%arg0: i32) -> (i32, i32) {
    %c0_i32 = arith.constant 0 : i32
    %c0_i32_0 = arith.constant 0 : i32
    %c0_i32_1 = arith.constant 0 : i32
    return %c0_i32, %c0_i32_0 : i32, i32
  }
  func.func @transform_2(%arg0: i32) -> (i32, i32) {
    %c0_i32 = arith.constant 0 : i32
    %c0_i32_0 = arith.constant 0 : i32
    %c0_i32_1 = arith.constant 0 : i32
    return %c0_i32, %c0_i32_0 : i32, i32
  }
  func.func @transform_3(%arg0: i32) -> (i32, i32, i32) {
    %c0_i32 = arith.constant 0 : i32
    %c0_i32_0 = arith.constant 0 : i32
    %c0_i32_1 = arith.constant 0 : i32
    %c0_i32_2 = arith.constant 0 : i32
    return %c0_i32, %c0_i32_0, %c0_i32_1 : i32, i32, i32
  }
  func.func @transform_4(%arg0: i32) -> (i32, i32) {
    %c0_i32 = arith.constant 0 : i32
    %c0_i32_0 = arith.constant 0 : i32
    %c0_i32_1 = arith.constant 0 : i32
    return %c0_i32, %c0_i32_0 : i32, i32
  }
  func.func @transform_5(%arg0: i32) -> (i32, i32) {
    %c0_i32 = arith.constant 0 : i32
    %c0_i32_0 = arith.constant 0 : i32
    %c0_i32_1 = arith.constant 0 : i32
    return %c0_i32, %c0_i32_0 : i32, i32
  }
  func.func @transform_6(%arg0: i32) -> (i32, i32) {
    %c0_i32 = arith.constant 0 : i32
    %c0_i32_0 = arith.constant 0 : i32
    %c0_i32_1 = arith.constant 0 : i32
    return %c0_i32, %c0_i32_0 : i32, i32
  }
  func.func @transform_7(%arg0: i32) -> (i32, i32) {
    %c0_i32 = arith.constant 0 : i32
    %c0_i32_0 = arith.constant 0 : i32
    %c0_i32_1 = arith.constant 0 : i32
    return %c0_i32, %c0_i32_0 : i32, i32
  }
  func.func @transform_8(%arg0: i32) -> (i32, i32) {
    %c0_i32 = arith.constant 0 : i32
    %c0_i32_0 = arith.constant 0 : i32
    %c0_i32_1 = arith.constant 0 : i32
    return %c0_i32, %c0_i32_0 : i32, i32
  }
  func.func @transform_9(%arg0: i32) -> (i32, i32) {
    %c0_i32 = arith.constant 0 : i32
    %c0_i32_0 = arith.constant 0 : i32
    %c0_i32_1 = arith.constant 0 : i32
    return %c0_i32, %c0_i32_0 : i32, i32
  }
  func.func @transform_10(%arg0: i32) -> (i32, i32) {
    %c0_i32 = arith.constant 0 : i32
    %c0_i32_0 = arith.constant 0 : i32
    return %arg0, %c0_i32 : i32, i32
  }
}

</mosaic_0001>

<bundles_post_ra>
// kernel: tpu_custom_call.1
= control target key start
LH: loop header
LB: loop body
LE: loop exit
PB: predicated region body
PF: predicated region fallthrough
CT: control target
= control target key end

     0   :  { %s6102_s0 = inlined_call_operand.hbm [shape: f32[256,128], index: 0, kind: input, shape index: {}]   ;;  %s6103_s1 = inlined_call_operand.hbm [shape: f32[128,128], index: 1, kind: input, shape index: {}]   ;;  %s6104_s2 = inlined_call_operand.vmem [shape: f32[1,128], index: 2, kind: input, shape index: {}]   ;;  %s6105_s3 = inlined_call_operand.hbm [shape: f32[5,128,256], index: 3, kind: input, shape index: {}]   ;;  %s6106_s4 = inlined_call_operand.vmem [shape: f32[1,256], index: 4, kind: input, shape index: {}]   ;;  %s6107_s5 = inlined_call_operand.hbm [shape: f32[256,128], index: 5, kind: input, shape index: {}]   ;;  %s6108_s6 = inlined_call_operand.vmem [shape: f32[1,128], index: 6, kind: input, shape index: {}]   ;;  %s6109_s7 = inlined_call_operand.vmem [shape: f32[1,128], index: 7, kind: input, shape index: {}]   ;;  %s6110_s8 = inlined_call_operand.vmem [shape: f32[1,128], index: 8, kind: input, shape index: {}]   ;;  %s6111_s9 = inlined_call_operand.hbm [shape: f32[128,128], index: 9, kind: input, shape index: {}]   ;;  %s6112_s10 = inlined_call_operand.hbm [shape: f32[256,128], index: 10, kind: output, shape index: {}]  }
   0x1   :  { %6123 = sst [smem:[#allocation18_spill]] %s6110_s8 }
   0x2   :  { %6124 = sst [smem:[#allocation19_spill]] %s6112_s10 }
   0x3   :  { %15 = vsyncpa [#allocation3], 0 }
   0x4   :  { %17 = vsyncpa [#allocation3 + $0x1], 0 }
   0x5   :  { %18 = vsyncpa [#allocation6], 0 }
   0x6   :  { %19 = vsyncpa [#allocation9], 0 }
   0x7   :  { %20 = vsyncpa [#allocation4], 0 }
   0x8   :  { %22 = vsyncpa [#allocation4 + $0x1], 0  ;;  %s4868_s13 = smov 0   ;;  %s4870_s14 = smov 0  }
   0x9   :  { %s4872_s15 = smov 0   ;;  %s4874_s16 = smov 0  }
   0xa LB: > { %6125 = sst [smem:[#allocation16_spill]] %s4786_s13  ;;  %s4889_s17 = sadd.s32 4294967295, %s4798_s16   ;;  %s4798_s16 = sphi %s4874_s16, %s6152_s16   ;;  %s4794_s15 = sphi %s4872_s15, %s6151_s15   ;;  %s4790_s14 = sphi %s4870_s14, %s6150_s14   ;;  %s4786_s13 = sphi %s4868_s13, %s6149_s13  }
   0xb   : > { %s3147_s18 = sadd.s32 4294967294, %s4798_s16   ;;  %p48_p0 = scmp.ne.s32.totalorder %s4790_s14, %s4786_s13 }
   0xc   : > { %p6113_p1 = scmp.eq.s32.totalorder %s4889_s17, 0  ;;  %p267_p3 = scmp.eq.s32.totalorder %s3147_s18, 1 }
   0xd   : > { %p3148_p5 = scmp.ge.s32.totalorder %s4798_s16, 1  ;;  %p274_p7 = scmp.lt.s32.totalorder %s4798_s16, 3 }
   0xe   : > { %p4898_p4 = por %p6113_p1, %p48_p0  ;;  %p4903_p6 = por %p267_p3, %p48_p0 }
   0xf   : > { %p4908_p8 = pnand %p3148_p5, %p274_p7  ;;  %s4800_s22 = smov [#allocation5]  }
  0x10   : > { %s6126_s19 = scalar_select %p4898_p4, 1, 0 }
  0x11   : > { %s6127_s20 = scalar_select %p4903_p6, 1, 0 }
  0x12   : > { %s6129_s21 = scalar_select %p4908_p8, 1, 0 }
  0x13   : > { %6128 = sst [smem:[#allocation17_spill]] %s6127_s20  ;;  %s286_s23 = sshll.u32 %s4800_s22, 4  ;;  %s4912_s23 = int_to_ptr.vmem [resolvable:$true] %s286_s23 }
  0x14   : > { %p4331_p9 = pneg %p4908_p8  ;;  %s4801_s25 = smov [#allocation8]  }
  0x15   : > { %s318_s26 = sshll.u32 %s4801_s25, 4  ;;  %s4802_s27 = smov [#allocation7]   ;;  %s4923_s26 = int_to_ptr.vmem [resolvable:$true] %s318_s26 }
  0x16   : > { %p4919_p11 = pnand %p4331_p9, %p6113_p1  ;;  %s4925_s28 = sshll.u32 %s4802_s27, 4  ;;  %s303_s28 = int_to_ptr.vmem [resolvable:$true] %s4925_s28 }
  0x17   : > { %s4582_s11 = scalar_lea.hbm %s6103_s1, 2048 }
  0x18   : > { %p4583_p12 = scmp.ne.s32.totalorder %s6103_s1, %s4582_s11  ;;  %p4935_p13 = pneg %p4919_p11 }
  0x19   : > { %p4589_p5 = scmp.lt.u32.totalorder %s4582_s11, %s6103_s1 }
  0x1a   : > { %p4585_p0 = pnand %p4935_p13, %p4583_p12 }
  0x1c   : > { %p4586_p3 = pneg %p4585_p0 }
  0x1e   : > { %p4591_p7 = pnand %p4589_p5, %p4586_p3 }
  0x20   : > { %4594 = shalt.err (!%p4591_p7)
}
  0x21   : > { %s4595_s29 = scalar_lea.vmem %s4912_s23, 2048  ;;  %p4603_p2 = scmp.lt.s32.totalorder %s4912_s23, %s4912_s23 }
  0x22   : > { %p4596_p9 = scmp.ne.s32.totalorder %s4912_s23, %s4595_s29  ;;  %p4604_p6 = scmp.lt.s32.totalorder %s4595_s29, %s4595_s29 }
  0x24   : > { %p4598_p10 = pnand %p4596_p9, %p4935_p13  ;;  %p4605_p12 = por %p4604_p6, %p4603_p2 }
  0x26   : > { %p4599_p1 = pneg %p4598_p10 }
  0x28   : > { %p4606_p0 = pnand %p4605_p12, %p4599_p1 }
  0x2a   : > { %4609 = shalt.err (!%p4606_p0)
}
  0x2b   : > { %s6119_s30 = smov 128   ;;  %s6121_s11 = smov 8  }
  0x2c   : > { %4334 = dma.hbm_to_vmem [thread:$0]  (!%p4919_p11), %s6103_s1, 2048, %s4912_s23, [#allocation6], %s6119_s30, %s6119_s30, %s6121_s11  }
  0x2d   : > { %s4610_s29 = scalar_lea.hbm %s6107_s5, 4096 }
  0x2e   : > { %p4611_p1 = scmp.ne.s32.totalorder %s6107_s5, %s4610_s29  ;;  %p4617_p10 = scmp.lt.u32.totalorder %s4610_s29, %s6107_s5 }
  0x30   : > { %p4613_p2 = pnand %p4611_p1, %p4935_p13 }
  0x32   : > { %p4614_p6 = pneg %p4613_p2 }
  0x34   : > { %p4619_p3 = pnand %p4617_p10, %p4614_p6 }
  0x36   : > { %4622 = shalt.err (!%p4619_p3)
}
  0x37   : > { %s4623_s23 = scalar_lea.vmem %s4923_s26, 4096  ;;  %p4631_p12 = scmp.lt.s32.totalorder %s4923_s26, %s4923_s26 }
  0x38   : > { %p4624_p5 = scmp.ne.s32.totalorder %s4923_s26, %s4623_s23  ;;  %p4632_p0 = scmp.lt.s32.totalorder %s4623_s23, %s4623_s23 }
  0x3a   : > { %p4626_p7 = pnand %p4624_p5, %p4935_p13  ;;  %p4633_p1 = por %p4632_p0, %p4631_p12 }
  0x3c   : > { %p4627_p9 = pneg %p4626_p7 }
  0x3e   : > { %p4634_p2 = pnand %p4633_p1, %p4627_p9 }
  0x40   : > { %4637 = shalt.err (!%p4634_p2)
}
  0x41   : > { %4340 = dma.hbm_to_vmem [thread:$0]  (!%p4919_p11), %s6107_s5, 4096, %s4923_s26, [#allocation9], %s6119_s30, %s6119_s30, %s6121_s11  }
  0x42   : > { %s4638_s12 = scalar_lea.hbm %s6105_s3, 20480 }
  0x43   : > { %p4639_p6 = scmp.ne.s32.totalorder %s6105_s3, %s4638_s12  ;;  %p4645_p5 = scmp.lt.u32.totalorder %s4638_s12, %s6105_s3 }
  0x45   : > { %p4641_p10 = pnand %p4639_p6, %p4935_p13 }
  0x47   : > { %p4642_p3 = pneg %p4641_p10 }
  0x49   : > { %p4647_p7 = pnand %p4645_p5, %p4642_p3 }
  0x4b   : > { %4650 = shalt.err (!%p4647_p7)
}
  0x4c   : > { %s4651_s23 = scalar_lea.vmem %s303_s28, 20480  ;;  %p4659_p1 = scmp.lt.s32.totalorder %s303_s28, %s303_s28 }
  0x4d   : > { %p4652_p9 = scmp.ne.s32.totalorder %s303_s28, %s4651_s23  ;;  %p4660_p2 = scmp.lt.s32.totalorder %s4651_s23, %s4651_s23 }
  0x4f   : > { %p4654_p12 = pnand %p4652_p9, %p4935_p13  ;;  %p4661_p4 = por %p4660_p2, %p4659_p1 }
  0x51   : > { %p4655_p0 = pneg %p4654_p12 }
  0x53   : > { %p4662_p8 = pnand %p4661_p4, %p4655_p0 }
  0x55   : > { %4665 = shalt.err (!%p4662_p8)
}
  0x56   : > { %s4805_s26 = smov 256   ;;  %s4806_s8 = smov 16  }
  0x57   : > { %4337 = dma.hbm_to_vmem [thread:$0]  (!%p4919_p11), %s6105_s3, 20480, %s303_s28, [#allocation6], %s4805_s26, %s4805_s26, %s4806_s8  }
  0x58   : > { %s4807_s20 = smov [#allocation10]   ;;  %s4666_s27 = scalar_lea.hbm %s6111_s9, 2048 }
  0x59   : > { %s340_s12 = sshll.u32 %s4807_s20, 4  ;;  %p4667_p4 = scmp.ne.s32.totalorder %s6111_s9, %s4666_s27  ;;  %s341_s12 = int_to_ptr.vmem [resolvable:$true] %s340_s12 }
  0x5a   : > { %p4673_p10 = scmp.lt.u32.totalorder %s4666_s27, %s6111_s9 }
  0x5b   : > { %p4669_p8 = pnand %p4667_p4, %p4935_p13 }
  0x5d   : > { %p4670_p6 = pneg %p4669_p8 }
  0x5f   : > { %p4675_p3 = pnand %p4673_p10, %p4670_p6 }
  0x61   : > { %4678 = shalt.err (!%p4675_p3)
}
  0x62   : > { %s4679_s28 = scalar_lea.vmem %s341_s12, 2048  ;;  %p4687_p12 = scmp.lt.s32.totalorder %s341_s12, %s341_s12 }
  0x63   : > { %p4680_p5 = scmp.ne.s32.totalorder %s341_s12, %s4679_s28  ;;  %p4688_p0 = scmp.lt.s32.totalorder %s4679_s28, %s4679_s28 }
  0x65   : > { %p4682_p7 = pnand %p4680_p5, %p4935_p13  ;;  %p4689_p1 = por %p4688_p0, %p4687_p12 }
  0x67   : > { %p4683_p9 = pneg %p4682_p7 }
  0x69   : > { %p4690_p2 = pnand %p4689_p1, %p4683_p9 }
  0x6b   : > { %4693 = shalt.err (!%p4690_p2)
}
  0x6c   : > { %s6132_s26 = smov 8   ;;  %s6133_s8 = smov 128  }
  0x6d   : > { %4343 = dma.hbm_to_vmem [thread:$0]  (!%p4919_p11), %s6111_s9, 2048, %s341_s12, [#allocation9], %s6133_s8, %s6133_s8, %s6132_s26  }
  0x6e   : > { %s5026_s22 = sadd.s32 1, %s4798_s16   ;;  %s35_s24 = sadd.s32 1, %s4794_s15 }
  0x6f   : > { %s32_s10 = ssub.s32 %s4798_s16, %s5026_s22  ;;  %p42_p13 = scmp.ne.s32.totalorder %s4794_s15, %s4790_s14 }
  0x70   : > { %p33_p4 = scmp.eq.s32.totalorder %s32_s10, 0  ;;  %p43_p8 = scmp.eq.s32.totalorder %s4798_s16, 0 }
  0x71   : > { %p6134_p6 = scmp.eq.s32.totalorder %s4889_s17, 1  ;;  %p4356_p3 = scmp.lt.s32.totalorder %s4798_s16, 2 }
  0x72   : > { %s5042_s20 = scalar_select %p33_p4, %s4794_s15, %s35_s24  }
  0x73   : > { %p5036_p10 = por %p6134_p6, %p42_p13  ;;  %p44_p5 = por %p43_p8, %p42_p13 }
  0x74   : > { %s354_s18 = sand.u32 1, %s4794_s15   ;;  %s3173_s12 = sshll.u32 %s4798_s16, 11 }
  0x75   : > { %s3154_s25 = sshll.u32 %s354_s18, 7  ;;  %s5049_s23 = scalar_lea.hbm %s6102_s0, %s3173_s12 }
  0x76   : > { %s358_s28 = scalar_lea.vmem [#allocation2], %s3154_s25  ;;  %p5053_p11 = pnand %p4356_p3, %p44_p5 }
  0x77   : > { %s365_s30 = sshll.u32 %s358_s28, 4  ;;  %s5057_s24 = scalar_lea.sflag [#allocation3], %s354_s18  ;;  %s5051_s30 = int_to_ptr.vmem [resolvable:$true] %s365_s30 }
  0x78   : > { %s4694_s10 = scalar_lea.hbm %s5049_s23, 2048  ;;  %p4696_p9 = pneg %p5053_p11 }
  0x79   : > { %p4695_p7 = scmp.ne.s32.totalorder %s5049_s23, %s4694_s10  ;;  %s4699_s27 = scalar_lea.hbm %s6102_s0, 4096 }
  0x7a   : > { %p4700_p1 = scmp.lt.u32.totalorder %s5049_s23, %s6102_s0  ;;  %p4701_p2 = scmp.lt.u32.totalorder %s4699_s27, %s4694_s10 }
  0x7b   : > { %p4697_p12 = pnand %p4696_p9, %p4695_p7  ;;  %p4703_p4 = scmp.lt.u32.totalorder %s4694_s10, %s5049_s23 }
  0x7c   : > { %p4702_p13 = por %p4701_p2, %p4700_p1 }
  0x7d   : > { %p4698_p0 = pneg %p4697_p12 }
  0x7e   : > { %p4704_p8 = por %p4703_p4, %p4702_p13 }
  0x80   : > { %p4705_p6 = pnand %p4704_p8, %p4698_p0 }
  0x82   : > { %4708 = shalt.err (!%p4705_p6)
}
  0x83   : > { %s4709_s18 = scalar_lea.vmem %s5051_s30, 2048  ;;  %s4808_s25 = smov [#allocation2]  }
  0x84   : > { %p4710_p3 = scmp.ne.s32.totalorder %s5051_s30, %s4709_s18  ;;  %s4714_s12 = sshll.u32 %s4808_s25, 4  ;;  %s4715_s12 = int_to_ptr.vmem [resolvable:$false] %s4714_s12 }
  0x85   : > { %s4716_s29 = scalar_lea.vmem %s4715_s12, 4096  ;;  %p4717_p12 = scmp.lt.s32.totalorder %s5051_s30, %s4715_s12 }
  0x86   : > { %p4712_p5 = pnand %p4710_p3, %p4696_p9  ;;  %p4718_p1 = scmp.lt.s32.totalorder %s4716_s29, %s4709_s18 }
  0x88   : > { %p4713_p7 = pneg %p4712_p5  ;;  %p4719_p2 = por %p4718_p1, %p4717_p12 }
  0x8a   : > { %p4720_p13 = pnand %p4719_p2, %p4713_p7 }
  0x8c   : > { %4723 = shalt.err (!%p4720_p13)
}
  0x8d   : > { %4347 = dma.hbm_to_vmem [thread:$0]  (!%p5053_p11), %s5049_s23, 2048, %s5051_s30, %s5057_s24, %s6133_s8, %s6133_s8, %s6132_s26  }
  0x8e   : > { %p6137_p9 = scmp.ne.s32.totalorder %s6129_s21, 0 }
  0x8f   : > { %s5091_s10 = sand.u32 (!%p6137_p9), 1, %s4790_s14   ;;  %p6138_p0 = scmp.ne.s32.totalorder (!%p6137_p9), %s6126_s19, 0 }
  0x90   : > { %377 = sbr.rel (%p6137_p9) target bundleno = 2112 (0x840), region = 60  ;;  %s3158_s27 = sshll.u32 (!%p6137_p9), %s5091_s10, 7 }
  0x91   : > { %s380_s28 = scalar_lea.sflag (!%p6137_p9), [#allocation3], %s5091_s10  ;;  %s5097_s11 = scalar_lea.vmem (!%p6137_p9), [#allocation2], %s3158_s27 }
  0x97   : > { %4769 = dma.done.wait (%p6138_p0), %s380_s28, 2048  }
  0x98   : > { %4771 = vsyncadd (%p6138_p0), %s380_s28, 4294965248  ;;  %p6139_p11 = scmp.eq.s32.totalorder %s4889_s17, 0 }
  0x9a   : > { %4773 = dma.done.wait (%p6139_p11), [#allocation6], 22528   ;;  %p6140_p4 = pmov %p6139_p11 }
  0x9c   : > { %4775 = vsyncadd (%p6140_p4), [#allocation6], 4294944768  ;;  %p6141_p8 = pmov %p6140_p4 }
  0x9d   : > { %p6142_p6 = pmov %p6140_p4 }
  0x9e   : > { %4777 = dma.done.wait (%p6141_p8), [#allocation9], 6144  }
  0x9f   : > { %4779 = vsyncadd (%p6142_p6), [#allocation9], 4294961152  ;;  %v454_v0 = vld [vmem:[#allocation5] sm:$0xff]  ;;  %v455_v1 = vld [vmem:[#allocation5 + $0x8] sm:$0xff]  ;;  %s5991_s19 = scalar_lea.vmem [#allocation11], %s3158_s27  ;;  %s3174_s27 = sshll.u32 %s4889_s17, 11 }
  0xa0   : > { %v456_v2 = vld [vmem:[#allocation5 + $0x10] sm:$0xff]  ;;  %v5111_v3 = vpack.c.bf16 %v455_v1, %v454_v0  ;;  %v457_v4 = vld [vmem:[#allocation5 + $0x18] sm:$0xff]  ;;  %v458_v6 = vld [vmem:[#allocation5 + $0x20] sm:$0xff]  ;;  %s3036_s21 = sshll.u32 %s5991_s19, 4  ;;  %s6144_s23 = sld [smem:[#allocation19_spill]]  ;;  %s6055_s21 = int_to_ptr.vmem [resolvable:$true] %s3036_s21 }
  0xa1   : > { %v5113_v5 = vpack.c.bf16 %v457_v4, %v456_v2  ;;  %v459_v7 = vld [vmem:[#allocation5 + $0x28] sm:$0xff]  ;;  %v5121_v9 = vld [vmem:[%s5097_s11] sm:$0xff]  ;;  %v460_v10 = vld [vmem:[#allocation5 + $0x30] sm:$0xff]  ;;  %s3023_s17 = scalar_lea.sflag [#allocation4], %s5091_s10  ;;  %s4724_s24 = scalar_lea.vmem %s6055_s21, 2048 }
  0xa2   : > { %3784 = vmatprep.subr.bf16.mxu0 %v5111_v3  ;;  %v5118_v8 = vpack.c.bf16 %v459_v7, %v458_v6  ;;  %v461_v11 = vld [vmem:[#allocation5 + $0x38] sm:$0xff]  ;;  %3479 = vmatprep.mubr.f32.mxu0 %v5121_v9  ;;  %v462_v13 = vld [vmem:[#allocation5 + $0x40] sm:$0xff]  ;;  %v463_v14 = vld [vmem:[#allocation5 + $0x48] sm:$0xff]  ;;  %p4725_p3 = scmp.ne.s32.totalorder %s6055_s21, %s4724_s24  ;;  %s4810_s18 = smov [#allocation11]  }
  0xa3   : > { %3786 = vmatpush3.bf16.msra.mxu0 %v5111_v3  ;;  %v5126_v12 = vpack.c.bf16 %v461_v11, %v460_v10  ;;  %v704_v15 = vld [vmem:[#allocation7 + $0x108] sm:$0xff]  ;;  %v706_v16 = vld [vmem:[#allocation7 + $0x118] sm:$0xff]  ;;  %v703_v17 = vld [vmem:[#allocation7 + $0x100] sm:$0xff]  ;;  %v5130_v22 = vpack.c.bf16 %v463_v14, %v462_v13  ;;  %s4728_s25 = sshll.u32 %s4810_s18, 4  ;;  %s4729_s25 = int_to_ptr.vmem [resolvable:$false] %s4728_s25 }
  0xa4   : > { %3788 = vmatprep.subr.bf16.mxu0 %v5113_v5  ;;  %v705_v18 = vld [vmem:[#allocation7 + $0x110] sm:$0xff]  ;;  %v3815_v19 = vpack.c.bf16 %v706_v16, %v704_v15  ;;  %v708_v20 = vld [vmem:[#allocation7 + $0x128] sm:$0xff]  ;;  %v710_v21 = vld [vmem:[#allocation7 + $0x138] sm:$0xff]  ;;  %p4726_p5 = pnand %p4725_p3, %p5036_p10  ;;  %s4730_s12 = scalar_lea.vmem %s4729_s25, 4096 }
  0xa5   : > { %v464_v23 = vld [vmem:[#allocation5 + $0x50] sm:$0xff]  ;;  %v3817_v24 = vpack.c.bf16 %v705_v18, %v703_v17  ;;  %v465_v25 = vld [vmem:[#allocation5 + $0x58] sm:$0xff]  ;;  %v3819_v26 = vpack.c.bf16 %v710_v21, %v708_v20  ;;  %v707_v27 = vld [vmem:[#allocation7 + $0x120] sm:$0xff]  ;;  %p4731_p12 = scmp.lt.s32.totalorder %s6055_s21, %s4729_s25  ;;  %p4732_p1 = scmp.lt.s32.totalorder %s4730_s12, %s4724_s24 }
  0xa6   : > { %v709_v28 = vld [vmem:[#allocation7 + $0x130] sm:$0xff]  ;;  %4167 = vmatprep.subr.bf16.mxu1 %v3815_v19  ;;  %v712_v29 = vld [vmem:[#allocation7 + $0x148] sm:$0xff]  ;;  %v714_v30 = vld [vmem:[#allocation7 + $0x158] sm:$0xff]  ;;  %v5134_v31 = vpack.c.bf16 %v465_v25, %v464_v23  ;;  %s6053_s30 = scalar_lea.hbm %s6144_s23, %s3174_s27  ;;  %p4727_p7 = pneg %p4726_p5 }
  0xa7   : > { %3790 = vmatpush3.bf16.msra.mxu0 %v5113_v5  ;;  %4175 = vmatpush1.bf16.msra.mxu1 %v3817_v24  ;;  %v466_v32 = vld [vmem:[#allocation5 + $0x60] sm:$0xff]  ;;  %v3821_v33 = vpack.c.bf16 %v709_v28, %v707_v27  ;;  %v467_v34 = vld [vmem:[#allocation5 + $0x68] sm:$0xff]  ;;  %v3823_v35 = vpack.c.bf16 %v714_v30, %v712_v29  ;;  %v713_v37 = vld [vmem:[#allocation7 + $0x150] sm:$0xff]  ;;  %v4809_v30 = vmov 0.0   ;;  %p4733_p2 = por %p4732_p1, %p4731_p12 }
  0xa8   : > { %3792 = vmatprep.subr.bf16.mxu0 %v5118_v8  ;;  %4168 = vmatprep.subr.bf16.mxu1 %v3819_v26  ;;  %v711_v36 = vld [vmem:[#allocation7 + $0x140] sm:$0xff]  ;;  %v716_v38 = vld [vmem:[#allocation7 + $0x168] sm:$0xff]  ;;  %v718_v39 = vld [vmem:[#allocation7 + $0x178] sm:$0xff]  ;;  %v5138_v40 = vpack.c.bf16 %v467_v34, %v466_v32 }
  0xa9   : > { %v468_v41 = vld [vmem:[#allocation5 + $0x70] sm:$0xff]  ;;  %v3825_v42 = vpack.c.bf16 %v713_v37, %v711_v36  ;;  %v469_v43 = vld [vmem:[#allocation5 + $0x78] sm:$0xff]  ;;  %v3827_v44 = vpack.c.bf16 %v718_v39, %v716_v38  ;;  %v715_v45 = vld [vmem:[#allocation7 + $0x160] sm:$0xff]  ;;  %847 = vmatprep.mubr.f32.mxu1 %v4809_v30  ;;  %p4734_p13 = pnand %p4733_p2, %p4727_p7 }
  0xaa   : > { %v717_v46 = vld [vmem:[#allocation7 + $0x170] sm:$0xff]  ;;  %v5142_v47 = vpack.c.bf16 %v469_v43, %v468_v41  ;;  %v5148_v49 = vld [vmem:[%s5097_s11 + $0x8] sm:$0xff]  ;;  %v5156_v51 = vld [vmem:[%s5097_s11 + $0x18] sm:$0xff] }
  0xab   : > { %3794 = vmatpush3.bf16.msra.mxu0 %v5118_v8  ;;  %4176 = vmatpush1.bf16.msra.mxu1 %v3821_v33  ;;  %v3829_v48 = vpack.c.bf16 %v717_v46, %v715_v45  ;;  %v5151_v50 = vld [vmem:[%s5097_s11 + $0x10] sm:$0xff]  ;;  %v5159_v52 = vld [vmem:[%s5097_s11 + $0x20] sm:$0xff]  ;;  %v5164_v53 = vld [vmem:[%s5097_s11 + $0x28] sm:$0xff] }
  0xac   : > { %3796 = vmatprep.subr.bf16.mxu0 %v5126_v12  ;;  %4169 = vmatprep.subr.bf16.mxu1 %v3823_v35  ;;  %v5167_v54 = vld [vmem:[%s5097_s11 + $0x30] sm:$0xff]  ;;  %v5172_v55 = vld [vmem:[%s5097_s11 + $0x38] sm:$0xff]  ;;  %v5175_v56 = vld [vmem:[%s5097_s11 + $0x40] sm:$0xff] }
  0xad   : > { %v5180_v57 = vld [vmem:[%s5097_s11 + $0x48] sm:$0xff]  ;;  %v5183_v58 = vld [vmem:[%s5097_s11 + $0x50] sm:$0xff]  ;;  %v5188_v59 = vld [vmem:[%s5097_s11 + $0x58] sm:$0xff] }
  0xae   : > { %v5191_v60 = vld [vmem:[%s5097_s11 + $0x60] sm:$0xff]  ;;  %v5196_v61 = vld [vmem:[%s5097_s11 + $0x68] sm:$0xff]  ;;  %v5199_v62 = vld [vmem:[%s5097_s11 + $0x70] sm:$0xff] }
  0xaf   : > { %3798 = vmatpush3.bf16.msra.mxu0 %v5126_v12  ;;  %4177 = vmatpush1.bf16.msra.mxu1 %v3825_v42  ;;  %v5204_v63 = vld [vmem:[%s5097_s11 + $0x78] sm:$0xff]  ;;  %v720_v0 = vld [vmem:[#allocation7 + $0x188] sm:$0xff]  ;;  %v719_v4 = vld [vmem:[#allocation7 + $0x180] sm:$0xff] }
  0xb0   : > { %3800 = vmatprep.subr.bf16.mxu0 %v5130_v22  ;;  %4170 = vmatprep.subr.bf16.mxu1 %v3827_v44  ;;  %v722_v1 = vld [vmem:[#allocation7 + $0x198] sm:$0xff]  ;;  %v721_v6 = vld [vmem:[#allocation7 + $0x190] sm:$0xff]  ;;  %v724_v10 = vld [vmem:[#allocation7 + $0x1a8] sm:$0xff] }
  0xb1   : > { %v3831_v2 = vpack.c.bf16 %v722_v1, %v720_v0  ;;  %v3833_v7 = vpack.c.bf16 %v721_v6, %v719_v4  ;;  %v726_v11 = vld [vmem:[#allocation7 + $0x1b8] sm:$0xff]  ;;  %v723_v14 = vld [vmem:[#allocation7 + $0x1a0] sm:$0xff]  ;;  %v725_v15 = vld [vmem:[#allocation7 + $0x1b0] sm:$0xff] }
  0xb2   : > { %v3835_v13 = vpack.c.bf16 %v726_v11, %v724_v10  ;;  %v3837_v16 = vpack.c.bf16 %v725_v15, %v723_v14  ;;  %v728_v17 = vld [vmem:[#allocation7 + $0x1c8] sm:$0xff]  ;;  %v730_v18 = vld [vmem:[#allocation7 + $0x1d8] sm:$0xff]  ;;  %v727_v20 = vld [vmem:[#allocation7 + $0x1c0] sm:$0xff] }
  0xb3   : > { %3802 = vmatpush3.bf16.msra.mxu0 %v5130_v22  ;;  %4178 = vmatpush1.bf16.msra.mxu1 %v3829_v48  ;;  %v729_v21 = vld [vmem:[#allocation7 + $0x1d0] sm:$0xff]  ;;  %v734_v25 = vld [vmem:[#allocation7 + $0x1f8] sm:$0xff]  ;;  %v731_v27 = vld [vmem:[#allocation7 + $0x1e0] sm:$0xff] }
  0xb4   : > { %3804 = vmatprep.subr.bf16.mxu0 %v5134_v31  ;;  %4171 = vmatprep.subr.bf16.mxu1 %v3831_v2  ;;  %v3841_v23 = vpack.c.bf16 %v729_v21, %v727_v20  ;;  %v733_v28 = vld [vmem:[#allocation7 + $0x1f0] sm:$0xff]  ;;  %v478_v32 = vld [vmem:[#allocation7 + $0x8] sm:$0xff] }
  0xb5   : > { %v3845_v29 = vpack.c.bf16 %v733_v28, %v731_v27 }
  0xb7   : > { %3806 = vmatpush3.bf16.msra.mxu0 %v5134_v31  ;;  %4179 = vmatpush1.bf16.msra.mxu1 %v3833_v7 }
  0xb8   : > { %3808 = vmatprep.subr.bf16.mxu0 %v5138_v40  ;;  %4172 = vmatprep.subr.bf16.mxu1 %v3835_v13 }
  0xbb   : > { %3810 = vmatpush3.bf16.msra.mxu0 %v5138_v40  ;;  %4180 = vmatpush1.bf16.msra.mxu1 %v3837_v16 }
  0xbc   : > { %3812 = vmatprep.subr.bf16.mxu0 %v5142_v47 }
  0xbf   : > { %3814 = vmatpush3.bf16.msra.mxu0 %v5142_v47 }
  0xc0   : > { %3816 = vmatprep.subr.bf16.mxu0 %v3815_v19  ;;  %v3839_v19 = vpack.c.bf16 %v730_v18, %v728_v17 }
  0xc2   : > { %3480 = vmatmul.mubr.f32.vlgmr.msra.gmra.mrb[0].mxu0 %v5148_v49  ;;  %4173 = vmatprep.subr.bf16.mxu1 %v3839_v19 }
  0xc3   : > { %3482 = vmatprep.mubr.f32.mxu0 %v5151_v50  ;;  %3818 = vmatpush1.bf16.msra.mxu0 %v3817_v24  ;;  %v732_v24 = vld [vmem:[#allocation7 + $0x1e8] sm:$0xff] }
  0xc4   : > { %3820 = vmatprep.subr.bf16.mxu0 %v3819_v26  ;;  %4181 = vmatpush1.bf16.msra.mxu1 %v3841_v23  ;;  %v3843_v26 = vpack.c.bf16 %v734_v25, %v732_v24 }
  0xc6   : > { %3483 = vmatmul.mubr.f32.gmra.mrb[2].mxu0 %v5156_v51  ;;  %4174 = vmatprep.subr.bf16.mxu1 %v3843_v26 }
  0xc7   : > { %3485 = vmatprep.mubr.f32.mxu0 %v5159_v52  ;;  %3822 = vmatpush1.bf16.msra.mxu0 %v3821_v33  ;;  %v480_v33 = vld [vmem:[#allocation7 + $0x18] sm:$0xff] }
  0xc8   : > { %3824 = vmatprep.subr.bf16.mxu0 %v3823_v35  ;;  %4182 = vmatpush1.bf16.msra.mxu1 %v3845_v29  ;;  %v3847_v34 = vpack.c.bf16 %v480_v33, %v478_v32  ;;  %v5213_v35 = vld [vmem:[%s6104_s2] ss:$0 sm:$0xff] }
  0xca   : > { %3486 = vmatmul.mubr.f32.gmra.mrb[4].mxu0 %v5164_v53  ;;  %3848 = vmatprep.subr.bf16.mxu1 %v3847_v34 }
  0xcb   : > { %3488 = vmatprep.mubr.f32.mxu0 %v5167_v54  ;;  %3826 = vmatpush1.bf16.msra.mxu0 %v3825_v42 }
  0xcc   : > { %3828 = vmatprep.subr.bf16.mxu0 %v3827_v44 }
  0xce   : > { %3489 = vmatmul.mubr.f32.gmra.mrb[6].mxu0 %v5172_v55 }
  0xcf   : > { %3491 = vmatprep.mubr.f32.mxu0 %v5175_v56  ;;  %3830 = vmatpush1.bf16.msra.mxu0 %v3829_v48 }
  0xd0   : > { %3832 = vmatprep.subr.bf16.mxu0 %v3831_v2 }
  0xd2   : > { %3492 = vmatmul.mubr.f32.gmra.mrb[8].mxu0 %v5180_v57 }
  0xd3   : > { %3494 = vmatprep.mubr.f32.mxu0 %v5183_v58  ;;  %3834 = vmatpush1.bf16.msra.mxu0 %v3833_v7 }
  0xd4   : > { %3836 = vmatprep.subr.bf16.mxu0 %v3835_v13 }
  0xd6   : > { %3495 = vmatmul.mubr.f32.gmra.mrb[10].mxu0 %v5188_v59 }
  0xd7   : > { %3497 = vmatprep.mubr.f32.mxu0 %v5191_v60  ;;  %3838 = vmatpush1.bf16.msra.mxu0 %v3837_v16 }
  0xd8   : > { %3840 = vmatprep.subr.bf16.mxu0 %v3839_v19 }
  0xda   : > { %3498 = vmatmul.mubr.f32.gmra.mrb[12].mxu0 %v5196_v61 }
  0xdb   : > { %3500 = vmatprep.mubr.f32.mxu0 %v5199_v62  ;;  %3842 = vmatpush1.bf16.msra.mxu0 %v3841_v23 }
  0xdc   : > { %3844 = vmatprep.subr.bf16.mxu0 %v3843_v26 }
  0xde   : > { %3501 = vmatmul.mubr.f32.gmra.mrb[14].mxu0 %v5204_v63 }
  0xdf   : > { %3846 = vmatpush1.bf16.msra.mxu0 %v3845_v29  ;;  %799 = vmatprep.mubr.f32.mxu0 %v4809_v30 }
  0xe0   : > { %3880 = vmatprep.subr.bf16.mxu0 %v5111_v3 }
 0x195   : > { %v3481_v36 = vpop.f32.mrb[0].mxu0 }
 0x196   : > { %v581_v37 = vadd.f32 %v3481_v36, %v5213_v35  ;;  %v575_v38 = vpop.f32.mrb[1].mxu0 }
 0x197   : > { %v576_v39 = vadd.f32 %v5213_v35, %v575_v38 }
 0x198   : > { %4405 = vtanh.f32 %v581_v37 }
 0x199   : > { %4407 = vtanh.f32 %v576_v39  ;;  %v3484_v41 = vpop.f32.mrb[2].mxu0 }
 0x19a   : > { %v585_v42 = vpop.f32.mrb[3].mxu0  ;;  %v591_v44 = vadd.f32 %v3484_v41, %v5213_v35 }
 0x19b   : > { %v586_v43 = vadd.f32 %v5213_v35, %v585_v42 }
 0x19d   : > { %4409 = vtanh.f32 %v586_v43  ;;  %v3487_v45 = vpop.f32.mrb[4].mxu0 }
 0x19e   : > { %v595_v46 = vpop.f32.mrb[5].mxu0  ;;  %4411 = vtanh.f32 %v591_v44  ;;  %v601_v6 = vadd.f32 %v3487_v45, %v5213_v35 }
 0x19f   : > { %v596_v48 = vadd.f32 %v5213_v35, %v595_v46 }
 0x1a1   : > { %v3490_v0 = vpop.f32.mrb[6].mxu0  ;;  %4413 = vtanh.f32 %v596_v48  ;;  %v477_v48 = vld [vmem:[#allocation7] sm:$0xff] }
 0x1a2   : > { %v4406_v1 = vpop.eup %4405  ;;  %v605_v2 = vpop.f32.mrb[7].mxu0  ;;  %4415 = vtanh.f32 %v601_v6  ;;  %v611_v26 = vadd.f32 %v3490_v0, %v5213_v35  ;;  %v479_v0 = vld [vmem:[#allocation7 + $0x10] sm:$0xff] }
 0x1a3   : > { %v4408_v4 = vpop.eup %4407  ;;  %v671_v11 = vmul.f32 0.25, %v4406_v1  ;;  %v606_v17 = vadd.f32 %v5213_v35, %v605_v2 }
 0x1a4   : > { %v670_v7 = vmul.f32 0.25, %v4408_v4 }
 0x1a5   : > { %v3493_v10 = vpop.f32.mrb[8].mxu0  ;;  %v5232_v21 = vadd.f32 %v671_v11, %v5148_v49  ;;  %v3849_v11 = vpack.c.bf16 %v479_v0, %v477_v48 }
 0x1a6   : > { %v5222_v13 = vadd.f32 %v670_v7, %v5121_v9  ;;  %v621_v14 = vadd.f32 %v3493_v10, %v5213_v35  ;;  %v615_v15 = vpop.f32.mrb[9].mxu0 }
 0x1a7   : > { %v4410_v16 = vpop.eup %4409  ;;  %v616_v18 = vadd.f32 %v5213_v35, %v615_v15  ;;  %v482_v15 = vld [vmem:[#allocation7 + $0x28] sm:$0xff] }
 0x1a8   : > { %v672_v19 = vmul.f32 0.25, %v4410_v16  ;;  %800 = vmatmul.mubr.f32.vlgmr.msra.gmra.mrb[16].mxu0 %v5222_v13  ;;  %4417 = vtanh.f32 %v621_v14  ;;  %v4412_v24 = vpop.eup %4411  ;;  %v484_v16 = vld [vmem:[#allocation7 + $0x38] sm:$0xff] }
 0x1a9   : > { %3882 = vmatpush3.bf16.msra.mxu0 %v5111_v3  ;;  %805 = vmatprep.mubr.f32.mxu0 %v4809_v30  ;;  %4419 = vtanh.f32 %v616_v18  ;;  %v3496_v20 = vpop.f32.mrb[10].mxu0  ;;  %v673_v33 = vmul.f32 0.25, %v4412_v24 }
 0x1aa   : > { %3884 = vmatprep.subr.bf16.mxu0 %v5113_v5  ;;  %v625_v23 = vpop.f32.mrb[11].mxu0  ;;  %4421 = vtanh.f32 %v606_v17  ;;  %v5238_v27 = vadd.f32 %v672_v19, %v5151_v50  ;;  %v631_v29 = vadd.f32 %v3496_v20, %v5213_v35 }
 0x1ab   : > { %v626_v25 = vadd.f32 %v5213_v35, %v625_v23  ;;  %v4414_v28 = vpop.eup %4413  ;;  %v5250_v42 = vadd.f32 %v673_v33, %v5156_v51 }
 0x1ac   : > { %806 = vmatmul.mubr.f32.gmra.mrb[18].mxu0 %v5232_v21  ;;  %v674_v36 = vmul.f32 0.25, %v4414_v28  ;;  %v4416_v37 = vpop.eup %4415  ;;  %v481_v28 = vld [vmem:[#allocation7 + $0x20] sm:$0xff] }
 0x1ad   : > { %3886 = vmatpush3.bf16.msra.mxu0 %v5113_v5  ;;  %811 = vmatprep.mubr.f32.mxu0 %v4809_v30  ;;  %4423 = vtanh.f32 %v626_v25  ;;  %v3499_v32 = vpop.f32.mrb[12].mxu0  ;;  %v675_v4 = vmul.f32 0.25, %v4416_v37  ;;  %v3851_v25 = vpack.c.bf16 %v484_v16, %v482_v15 }
 0x1ae   : > { %3888 = vmatprep.subr.bf16.mxu0 %v5118_v8  ;;  %v635_v34 = vpop.f32.mrb[13].mxu0  ;;  %4425 = vtanh.f32 %v611_v26  ;;  %v5254_v45 = vadd.f32 %v674_v36, %v5159_v52  ;;  %v641_v2 = vadd.f32 %v3499_v32, %v5213_v35 }
 0x1af   : > { %4427 = vtanh.f32 %v631_v29  ;;  %v636_v38 = vadd.f32 %v5213_v35, %v635_v34  ;;  %v5270_v19 = vadd.f32 %v675_v4, %v5164_v53  ;;  %v483_v29 = vld [vmem:[#allocation7 + $0x30] sm:$0xff] }
 0x1b0   : > { %812 = vmatmul.mubr.f32.gmra.mrb[20].mxu0 %v5238_v27 }
 0x1b1   : > { %3890 = vmatpush3.bf16.msra.mxu0 %v5118_v8  ;;  %817 = vmatprep.mubr.f32.mxu0 %v4809_v30  ;;  %v3502_v39 = vpop.f32.mrb[14].mxu0  ;;  %4429 = vtanh.f32 %v636_v38  ;;  %v3853_v38 = vpack.c.bf16 %v483_v29, %v481_v28  ;;  %v493_v28 = vld [vmem:[#allocation7 + $0x80] sm:$0xff]  ;;  %v495_v29 = vld [vmem:[#allocation7 + $0x90] sm:$0xff] }
 0x1b2   : > { %v4418_v41 = vpop.eup %4417  ;;  %3892 = vmatprep.subr.bf16.mxu0 %v5126_v12  ;;  %v645_v43 = vpop.f32.mrb[15].mxu0  ;;  %4431 = vtanh.f32 %v641_v2  ;;  %v651_v32 = vadd.f32 %v3502_v39, %v5213_v35  ;;  %v485_v39 = vld [vmem:[#allocation7 + $0x40] sm:$0xff] }
 0x1b3   : > { %v4420_v44 = vpop.eup %4419  ;;  %v679_v6 = vmul.f32 0.25, %v4418_v41  ;;  %v646_v17 = vadd.f32 %v5213_v35, %v645_v43  ;;  %v486_v41 = vld [vmem:[#allocation7 + $0x48] sm:$0xff]  ;;  %v488_v43 = vld [vmem:[#allocation7 + $0x58] sm:$0xff] }
 0x1b4   : > { %818 = vmatmul.mubr.f32.gmra.mrb[22].mxu0 %v5250_v42  ;;  %v678_v46 = vmul.f32 0.25, %v4420_v44  ;;  %v4422_v1 = vpop.eup %4421  ;;  %v487_v44 = vld [vmem:[#allocation7 + $0x50] sm:$0xff] }
 0x1b5   : > { %3894 = vmatpush3.bf16.msra.mxu0 %v5126_v12  ;;  %823 = vmatprep.mubr.f32.mxu0 %v4809_v30  ;;  %v676_v14 = vmul.f32 0.25, %v4422_v1  ;;  %v5273_v23 = vadd.f32 %v679_v6, %v5180_v57  ;;  %4433 = vtanh.f32 %v646_v17  ;;  %v3855_v1 = vpack.c.bf16 %v488_v43, %v486_v41  ;;  %v490_v6 = vld [vmem:[#allocation7 + $0x68] sm:$0xff]  ;;  %v500_v43 = vld [vmem:[#allocation7 + $0xb8] sm:$0xff] }
 0x1b6   : > { %3896 = vmatprep.subr.bf16.mxu0 %v5130_v22  ;;  %v5261_v7 = vadd.f32 %v678_v46, %v5175_v56  ;;  %4435 = vtanh.f32 %v651_v32  ;;  %v3857_v4 = vpack.c.bf16 %v487_v44, %v485_v39  ;;  %v498_v41 = vld [vmem:[#allocation7 + $0xa8] sm:$0xff]  ;;  %v497_v39 = vld [vmem:[#allocation7 + $0xa0] sm:$0xff]  ;;  %v499_v44 = vld [vmem:[#allocation7 + $0xb0] sm:$0xff] }
 0x1b7   : > { %v4424_v10 = vpop.eup %4423  ;;  %v5278_v26 = vadd.f32 %v676_v14, %v5167_v54  ;;  %v491_v14 = vld [vmem:[#allocation7 + $0x70] sm:$0xff] }
 0x1b8   : > { %824 = vmatmul.mubr.f32.gmra.mrb[24].mxu0 %v5254_v45  ;;  %848 = vmatmul.mubr.f32.vlgmr.msra.gmra.mrb[0].mxu1 %v5261_v7  ;;  %v4426_v18 = vpop.eup %4425  ;;  %v680_v20 = vmul.f32 0.25, %v4424_v10  ;;  %v492_v10 = vld [vmem:[#allocation7 + $0x78] sm:$0xff] }
 0x1b9   : > { %3898 = vmatpush3.bf16.msra.mxu0 %v5130_v22  ;;  %829 = vmatprep.mubr.f32.mxu0 %v4809_v30  ;;  %v4428_v24 = vpop.eup %4427  ;;  %v677_v33 = vmul.f32 0.25, %v4426_v18  ;;  %v3859_v17 = vpack.c.bf16 %v492_v10, %v490_v6  ;;  %v504_v6 = vld [vmem:[#allocation7 + $0xd8] sm:$0xff]  ;;  %v3869_v10 = vpack.c.bf16 %v499_v44, %v497_v39  ;;  %v1264_v39 = vld [vmem:[#allocation7 + $0x268] sm:$0xff] }
 0x1ba   : > { %3900 = vmatprep.subr.bf16.mxu0 %v5134_v31  ;;  %853 = vmatprep.mubr.f32.mxu1 %v4809_v30  ;;  %v681_v34 = vmul.f32 0.25, %v4428_v24  ;;  %v5286_v36 = vadd.f32 %v680_v20, %v5183_v58  ;;  %v494_v24 = vld [vmem:[#allocation7 + $0x88] sm:$0xff]  ;;  %v1266_v44 = vld [vmem:[#allocation7 + $0x278] sm:$0xff] }
 0x1bb   : > { %3850 = vmatpush1.bf16.msra.mxu1 %v3849_v11  ;;  %v4430_v37 = vpop.eup %4429  ;;  %v5295_v46 = vadd.f32 %v677_v33, %v5172_v55  ;;  %v489_v11 = vld [vmem:[#allocation7 + $0x60] sm:$0xff] }
 0x1bc   : > { %830 = vmatmul.mubr.f32.gmra.mrb[26].mxu0 %v5270_v19  ;;  %854 = vmatmul.mubr.f32.gmra.mrb[2].mxu1 %v5273_v23  ;;  %v682_v48 = vmul.f32 0.25, %v4430_v37  ;;  %v5298_v0 = vadd.f32 %v681_v34, %v5188_v59  ;;  %v4432_v2 = vpop.eup %4431  ;;  %v3861_v20 = vpack.c.bf16 %v491_v14, %v489_v11  ;;  %v501_v11 = vld [vmem:[#allocation7 + $0xc0] sm:$0xff]  ;;  %v503_v14 = vld [vmem:[#allocation7 + $0xd0] sm:$0xff] }
 0x1bd   : > { %3902 = vmatpush3.bf16.msra.mxu0 %v5134_v31  ;;  %835 = vmatprep.mubr.f32.mxu0 %v4809_v30  ;;  %v683_v15 = vmul.f32 0.25, %v4432_v2  ;;  %v3867_v2 = vpack.c.bf16 %v500_v43, %v498_v41  ;;  %v1259_v41 = vld [vmem:[#allocation7 + $0x240] sm:$0xff] }
 0x1be   : > { %3904 = vmatprep.subr.bf16.mxu0 %v5138_v40  ;;  %859 = vmatprep.mubr.f32.mxu1 %v4809_v30  ;;  %v5306_v16 = vadd.f32 %v682_v48, %v5191_v60 }
 0x1bf   : > { %3852 = vmatprep.subr.bf16.mxu1 %v3851_v25  ;;  %v4434_v18 = vpop.eup %4433  ;;  %v496_v25 = vld [vmem:[#allocation7 + $0x98] sm:$0xff]  ;;  %v5315_v33 = vadd.f32 %v683_v15, %v5196_v61 }
 0x1c0   : > { %836 = vmatmul.mubr.f32.gmra.mrb[28].mxu0 %v5278_v26  ;;  %860 = vmatmul.mubr.f32.gmra.mrb[4].mxu1 %v5286_v36  ;;  %v684_v32 = vmul.f32 0.25, %v4434_v18  ;;  %v3863_v34 = vpack.c.bf16 %v496_v25, %v494_v24  ;;  %v4436_v37 = vpop.eup %4435  ;;  %v508_v18 = vld [vmem:[#allocation7 + $0xf8] sm:$0xff]  ;;  %v3873_v24 = vpack.c.bf16 %v503_v14, %v501_v11  ;;  %v1267_v14 = vld [vmem:[#allocation7 + $0x280] sm:$0xff] }
 0x1c1   : > { %3906 = vmatpush3.bf16.msra.mxu0 %v5138_v40  ;;  %841 = vmatprep.mubr.f32.mxu0 %v4809_v30  ;;  %v685_v48 = vmul.f32 0.25, %v4436_v37  ;;  %v1262_v37 = vld [vmem:[#allocation7 + $0x258] sm:$0xff] }
 0x1c2   : > { %3908 = vmatprep.subr.bf16.mxu0 %v5142_v47  ;;  %865 = vmatprep.mubr.f32.mxu1 %v4809_v30 }
 0x1c3   : > { %3854 = vmatpush1.bf16.msra.mxu1 %v3853_v38  ;;  %v3865_v38 = vpack.c.bf16 %v495_v29, %v493_v28  ;;  %v505_v28 = vld [vmem:[#allocation7 + $0xe0] sm:$0xff]  ;;  %v507_v29 = vld [vmem:[#allocation7 + $0xf0] sm:$0xff] }
 0x1c4   : > { %842 = vmatmul.mubr.f32.gmra.mrb[30].mxu0 %v5295_v46  ;;  %866 = vmatmul.mubr.f32.gmra.mrb[6].mxu1 %v5298_v0 }
 0x1c5   : > { %3910 = vmatpush3.bf16.msra.mxu0 %v5142_v47  ;;  %3535 = vmatprep.mubr.f32.mxu0 %v5222_v13 }
 0x1c6   : > { %871 = vmatprep.mubr.f32.mxu1 %v4809_v30  ;;  %3856 = vmatprep.subr.bf16.mxu1 %v3855_v1  ;;  %v5324_v1 = vadd.f32 %v684_v32, %v5199_v62  ;;  %v3877_v32 = vpack.c.bf16 %v507_v29, %v505_v28  ;;  %v1273_v28 = vld [vmem:[#allocation7 + $0x2b0] sm:$0xff] }
 0x1c7   : > { %3858 = vmatpush1.bf16.msra.mxu1 %v3857_v4  ;;  %3944 = vmatprep.subr.bf16.mxu0 %v5111_v3  ;;  %v502_v4 = vld [vmem:[#allocation7 + $0xc8] sm:$0xff] }
 0x1c8   : > { %3536 = vmatmul.mubr.f32.vlgmr.msra.gmra.mrb[32].mxu0 %v5232_v21  ;;  %872 = vmatmul.mubr.f32.gmra.mrb[8].mxu1 %v5306_v16  ;;  %v3871_v15 = vpack.c.bf16 %v504_v6, %v502_v4  ;;  %v1268_v6 = vld [vmem:[#allocation7 + $0x288] sm:$0xff] }
 0x1c9   : > { %3538 = vmatprep.mubr.f32.mxu0 %v5238_v27  ;;  %877 = vmatprep.mubr.f32.mxu1 %v4809_v30 }
 0x1ca   : > { %3860 = vmatprep.subr.bf16.mxu1 %v3859_v17  ;;  %3946 = vmatpush3.bf16.msra.mxu0 %v5111_v3  ;;  %v506_v17 = vld [vmem:[#allocation7 + $0xe8] sm:$0xff] }
 0x1cb   : > { %3862 = vmatpush1.bf16.msra.mxu1 %v3861_v20  ;;  %3948 = vmatprep.subr.bf16.mxu0 %v5113_v5  ;;  %v5333_v20 = vadd.f32 %v685_v48, %v5204_v63  ;;  %v3875_v25 = vpack.c.bf16 %v508_v18, %v506_v17  ;;  %v3923_v48 = vpack.c.bf16 %v1266_v44, %v1264_v39  ;;  %v1272_v17 = vld [vmem:[#allocation7 + $0x2a8] sm:$0xff]  ;;  %v1274_v18 = vld [vmem:[#allocation7 + $0x2b8] sm:$0xff] }
 0x1cc   : > { %3539 = vmatmul.mubr.f32.gmra.mrb[34].mxu0 %v5250_v42  ;;  %878 = vmatmul.mubr.f32.gmra.mrb[10].mxu1 %v5315_v33 }
 0x1cd   : > { %3541 = vmatprep.mubr.f32.mxu0 %v5254_v45  ;;  %883 = vmatprep.mubr.f32.mxu1 %v4809_v30 }
 0x1ce   : > { %3864 = vmatprep.subr.bf16.mxu1 %v3863_v34  ;;  %3950 = vmatpush3.bf16.msra.mxu0 %v5113_v5  ;;  %v1260_v34 = vld [vmem:[#allocation7 + $0x248] sm:$0xff] }
 0x1cf   : > { %3866 = vmatpush1.bf16.msra.mxu1 %v3865_v38  ;;  %3952 = vmatprep.subr.bf16.mxu0 %v5118_v8  ;;  %v3919_v38 = vpack.c.bf16 %v1262_v37, %v1260_v34 }
 0x1d0   : > { %3542 = vmatmul.mubr.f32.gmra.mrb[36].mxu0 %v5270_v19  ;;  %884 = vmatmul.mubr.f32.gmra.mrb[12].mxu1 %v5324_v1 }
 0x1d1   : > { %3544 = vmatprep.mubr.f32.mxu0 %v5278_v26  ;;  %889 = vmatprep.mubr.f32.mxu1 %v4809_v30 }
 0x1d2   : > { %3868 = vmatprep.subr.bf16.mxu1 %v3867_v2  ;;  %3954 = vmatpush3.bf16.msra.mxu0 %v5118_v8  ;;  %v1263_v2 = vld [vmem:[#allocation7 + $0x260] sm:$0xff] }
 0x1d3   : > { %3870 = vmatpush1.bf16.msra.mxu1 %v3869_v10  ;;  %3956 = vmatprep.subr.bf16.mxu0 %v5126_v12  ;;  %v1270_v10 = vld [vmem:[#allocation7 + $0x298] sm:$0xff] }
 0x1d4   : > { %3545 = vmatmul.mubr.f32.gmra.mrb[38].mxu0 %v5295_v46  ;;  %890 = vmatmul.mubr.f32.gmra.mrb[14].mxu1 %v5333_v20  ;;  %v3927_v11 = vpack.c.bf16 %v1270_v10, %v1268_v6 }
 0x1d5   : > { %3547 = vmatprep.mubr.f32.mxu0 %v5261_v7  ;;  %3872 = vmatprep.subr.bf16.mxu1 %v3871_v15 }
 0x1d6   : > { %960 = vmatprep.mubr.f32.mxu1 %v4809_v30  ;;  %3958 = vmatpush3.bf16.msra.mxu0 %v5126_v12 }
 0x1d7   : > { %3874 = vmatpush1.bf16.msra.mxu1 %v3873_v24  ;;  %3960 = vmatprep.subr.bf16.mxu0 %v5130_v22  ;;  %v3931_v24 = vpack.c.bf16 %v1274_v18, %v1272_v17 }
 0x1d8   : > { %3548 = vmatmul.mubr.f32.gmra.mrb[40].mxu0 %v5273_v23  ;;  %3876 = vmatprep.subr.bf16.mxu1 %v3875_v25  ;;  %v1271_v25 = vld [vmem:[#allocation7 + $0x2a0] sm:$0xff] }
 0x1d9   : > { %3550 = vmatprep.mubr.f32.mxu0 %v5286_v36  ;;  %v3933_v29 = vpack.c.bf16 %v1273_v28, %v1271_v25 }
 0x1da   : > { %3962 = vmatpush3.bf16.msra.mxu0 %v5130_v22 }
 0x1db   : > { %3878 = vmatpush1.bf16.msra.mxu1 %v3877_v32  ;;  %3964 = vmatprep.subr.bf16.mxu0 %v5134_v31  ;;  %v1278_v32 = vld [vmem:[#allocation7 + $0x2d8] sm:$0xff] }
 0x1dc   : > { %3551 = vmatmul.mubr.f32.gmra.mrb[42].mxu0 %v5298_v0 }
 0x1dd   : > { %3553 = vmatprep.mubr.f32.mxu0 %v5306_v16 }
 0x1de   : > { %961 = vmatmul.mubr.f32.vlgmr.msra.gmra.mrb[16].mxu1 %v5121_v9  ;;  %3966 = vmatpush3.bf16.msra.mxu0 %v5134_v31  ;;  %v1252_v9 = vld [vmem:[#allocation7 + $0x208] sm:$0xff] }
 0x1df   : > { %966 = vmatprep.mubr.f32.mxu1 %v4809_v30  ;;  %3968 = vmatprep.subr.bf16.mxu0 %v5138_v40 }
 0x1e0   : > { %3554 = vmatmul.mubr.f32.gmra.mrb[44].mxu0 %v5315_v33 }
 0x1e1   : > { %3556 = vmatprep.mubr.f32.mxu0 %v5324_v1 }
 0x1e2   : > { %967 = vmatmul.mubr.f32.gmra.mrb[18].mxu1 %v5148_v49  ;;  %3970 = vmatpush3.bf16.msra.mxu0 %v5138_v40  ;;  %v1254_v49 = vld [vmem:[#allocation7 + $0x218] sm:$0xff] }
 0x1e3   : > { %972 = vmatprep.mubr.f32.mxu1 %v4809_v30  ;;  %3972 = vmatprep.subr.bf16.mxu0 %v5142_v47 }
 0x1e4   : > { %3557 = vmatmul.mubr.f32.gmra.mrb[46].mxu0 %v5333_v20 }
 0x1e6   : > { %973 = vmatmul.mubr.f32.gmra.mrb[20].mxu1 %v5151_v50  ;;  %3974 = vmatpush3.bf16.msra.mxu0 %v5142_v47  ;;  %v3911_v50 = vpack.c.bf16 %v1254_v49, %v1252_v9  ;;  %v1275_v49 = vld [vmem:[#allocation7 + $0x2c0] sm:$0xff] }
 0x1e7   : > { %978 = vmatprep.mubr.f32.mxu1 %v4809_v30  ;;  %4008 = vmatprep.subr.bf16.mxu0 %v5111_v3 }
 0x1e8   : > { %3912 = vmatprep.subr.bf16.mxu1 %v3911_v50  ;;  %v1277_v50 = vld [vmem:[#allocation7 + $0x2d0] sm:$0xff] }
 0x1ea   : > { %979 = vmatmul.mubr.f32.gmra.mrb[22].mxu1 %v5156_v51  ;;  %v1251_v51 = vld [vmem:[#allocation7 + $0x200] sm:$0xff] }
 0x1eb   : > { %984 = vmatprep.mubr.f32.mxu1 %v4809_v30 }
 0x1ee   : > { %985 = vmatmul.mubr.f32.gmra.mrb[24].mxu1 %v5159_v52  ;;  %v1253_v52 = vld [vmem:[#allocation7 + $0x210] sm:$0xff] }
 0x1ef   : > { %990 = vmatprep.mubr.f32.mxu1 %v4809_v30 }
 0x1f2   : > { %991 = vmatmul.mubr.f32.gmra.mrb[26].mxu1 %v5164_v53  ;;  %v3913_v53 = vpack.c.bf16 %v1253_v52, %v1251_v51  ;;  %v3937_v51 = vpack.c.bf16 %v1277_v50, %v1275_v49  ;;  %v1280_v52 = vld [vmem:[#allocation7 + $0x2e8] sm:$0xff] }
 0x1f3   : > { %996 = vmatprep.mubr.f32.mxu1 %v4809_v30 }
 0x1f4   : > { %3914 = vmatpush1.bf16.msra.mxu1 %v3913_v53  ;;  %v1282_v53 = vld [vmem:[#allocation7 + $0x2f8] sm:$0xff] }
 0x1f6   : > { %997 = vmatmul.mubr.f32.gmra.mrb[28].mxu1 %v5167_v54  ;;  %v1256_v54 = vld [vmem:[#allocation7 + $0x228] sm:$0xff] }
 0x1f7   : > { %1002 = vmatprep.mubr.f32.mxu1 %v4809_v30 }
 0x1fa   : > { %1003 = vmatmul.mubr.f32.gmra.mrb[30].mxu1 %v5172_v55  ;;  %v1258_v55 = vld [vmem:[#allocation7 + $0x238] sm:$0xff] }
 0x1fb   : > { %1008 = vmatprep.mubr.f32.mxu1 %v4809_v30 }
 0x1fe   : > { %1009 = vmatmul.mubr.f32.gmra.mrb[0].mxu1 %v5175_v56  ;;  %v3915_v56 = vpack.c.bf16 %v1258_v55, %v1256_v54  ;;  %v3939_v54 = vpack.c.bf16 %v1282_v53, %v1280_v52  ;;  %v1279_v55 = vld [vmem:[#allocation7 + $0x2e0] sm:$0xff] }
 0x1ff   : > { %1014 = vmatprep.mubr.f32.mxu1 %v4809_v30 }
 0x200   : > { %3916 = vmatprep.subr.bf16.mxu1 %v3915_v56  ;;  %v1281_v56 = vld [vmem:[#allocation7 + $0x2f0] sm:$0xff] }
 0x202   : > { %1015 = vmatmul.mubr.f32.gmra.mrb[2].mxu1 %v5180_v57  ;;  %v1255_v57 = vld [vmem:[#allocation7 + $0x220] sm:$0xff] }
 0x203   : > { %1020 = vmatprep.mubr.f32.mxu1 %v4809_v30 }
 0x206   : > { %1021 = vmatmul.mubr.f32.gmra.mrb[4].mxu1 %v5183_v58  ;;  %v1257_v58 = vld [vmem:[#allocation7 + $0x230] sm:$0xff] }
 0x207   : > { %1026 = vmatprep.mubr.f32.mxu1 %v4809_v30 }
 0x20a   : > { %1027 = vmatmul.mubr.f32.gmra.mrb[6].mxu1 %v5188_v59  ;;  %v3917_v59 = vpack.c.bf16 %v1257_v58, %v1255_v57  ;;  %v3941_v57 = vpack.c.bf16 %v1281_v56, %v1279_v55  ;;  %v1671_v58 = vld [vmem:[#allocation7 + $0x308] sm:$0xff] }
 0x20b   : > { %1032 = vmatprep.mubr.f32.mxu1 %v4809_v30 }
 0x20c   : > { %3918 = vmatpush1.bf16.msra.mxu1 %v3917_v59  ;;  %v1673_v59 = vld [vmem:[#allocation7 + $0x318] sm:$0xff] }
 0x20d   : > { %3920 = vmatprep.subr.bf16.mxu1 %v3919_v38  ;;  %v3975_v34 = vpack.c.bf16 %v1673_v59, %v1671_v58  ;;  %v1670_v58 = vld [vmem:[#allocation7 + $0x300] sm:$0xff]  ;;  %v1672_v59 = vld [vmem:[#allocation7 + $0x310] sm:$0xff] }
 0x20e   : > { %1033 = vmatmul.mubr.f32.gmra.mrb[8].mxu1 %v5191_v60  ;;  %v1261_v60 = vld [vmem:[#allocation7 + $0x250] sm:$0xff] }
 0x20f   : > { %1038 = vmatprep.mubr.f32.mxu1 %v4809_v30  ;;  %v3921_v43 = vpack.c.bf16 %v1261_v60, %v1259_v41 }
 0x211   : > { %3922 = vmatpush1.bf16.msra.mxu1 %v3921_v43 }
 0x212   : > { %1039 = vmatmul.mubr.f32.gmra.mrb[10].mxu1 %v5196_v61  ;;  %v1265_v61 = vld [vmem:[#allocation7 + $0x270] sm:$0xff]  ;;  %3924 = vmatprep.subr.bf16.mxu1 %v3923_v48 }
 0x213   : > { %1044 = vmatprep.mubr.f32.mxu1 %v4809_v30  ;;  %v3925_v4 = vpack.c.bf16 %v1265_v61, %v1263_v2 }
 0x215   : > { %3926 = vmatpush1.bf16.msra.mxu1 %v3925_v4 }
 0x216   : > { %1045 = vmatmul.mubr.f32.gmra.mrb[12].mxu1 %v5199_v62  ;;  %v1269_v62 = vld [vmem:[#allocation7 + $0x290] sm:$0xff]  ;;  %3928 = vmatprep.subr.bf16.mxu1 %v3927_v11 }
 0x217   : > { %1050 = vmatprep.mubr.f32.mxu1 %v4809_v30  ;;  %v3929_v15 = vpack.c.bf16 %v1269_v62, %v1267_v14 }
 0x219   : > { %3930 = vmatpush1.bf16.msra.mxu1 %v3929_v15 }
 0x21a   : > { %1051 = vmatmul.mubr.f32.gmra.mrb[14].mxu1 %v5204_v63  ;;  %3932 = vmatprep.subr.bf16.mxu1 %v3931_v24  ;;  %v1276_v63 = vld [vmem:[#allocation7 + $0x2c8] sm:$0xff] }
 0x21b   : > { %1347 = vmatprep.mubr.f32.mxu1 %v4809_v30  ;;  %v3935_v9 = vpack.c.bf16 %v1278_v32, %v1276_v63 }
 0x21d   : > { %3934 = vmatpush1.bf16.msra.mxu1 %v3933_v29 }
 0x21e   : > { %3936 = vmatprep.subr.bf16.mxu1 %v3935_v9 }
 0x221   : > { %3938 = vmatpush1.bf16.msra.mxu1 %v3937_v51 }
 0x222   : > { %3940 = vmatprep.subr.bf16.mxu1 %v3939_v54 }
 0x225   : > { %3942 = vmatpush1.bf16.msra.mxu1 %v3941_v57 }
 0x226   : > { %3976 = vmatprep.subr.bf16.mxu1 %v3975_v34 }
 0x27b   : > { %v5390_v37 = vpop.f32.mrb[16].mxu0 }
 0x27c   : > { %v5392_v38 = vpop.f32.mrb[17].mxu0 }
 0x27f   : > { %v5394_v41 = vpop.f32.mrb[18].mxu0 }
 0x280   : > { %v5396_v60 = vpop.f32.mrb[19].mxu0 }
 0x283   : > { %v5398_v43 = vpop.f32.mrb[20].mxu0 }
 0x284   : > { %v5400_v39 = vpop.f32.mrb[21].mxu0 }
 0x287   : > { %v5402_v44 = vpop.f32.mrb[22].mxu0 }
 0x288   : > { %v5404_v48 = vpop.f32.mrb[23].mxu0 }
 0x28b   : > { %v5406_v2 = vpop.f32.mrb[24].mxu0 }
 0x28c   : > { %v5408_v61 = vpop.f32.mrb[25].mxu0 }
 0x28f   : > { %v5410_v4 = vpop.f32.mrb[26].mxu0 }
 0x290   : > { %v5412_v6 = vpop.f32.mrb[27].mxu0 }
 0x293   : > { %v5414_v10 = vpop.f32.mrb[28].mxu0 }
 0x294   : > { %v5416_v11 = vpop.f32.mrb[29].mxu0 }
 0x297   : > { %v5418_v14 = vpop.f32.mrb[30].mxu0 }
 0x298   : > { %v5420_v62 = vpop.f32.mrb[31].mxu0 }
 0x29b   : > { %v3537_v15 = vpop.f32.mrb[32].mxu0 }
 0x29c   : > { %v1129_v17 = vadd.f32 %v3537_v15, %v5213_v35  ;;  %v1123_v18 = vpop.f32.mrb[33].mxu0  ;;  %v1675_v15 = vld [vmem:[#allocation7 + $0x328] sm:$0xff] }
 0x29d   : > { %v1124_v24 = vadd.f32 %v5213_v35, %v1123_v18 }
 0x29e   : > { %4437 = vtanh.f32 %v1129_v17  ;;  %v1677_v17 = vld [vmem:[#allocation7 + $0x338] sm:$0xff] }
 0x29f   : > { %4439 = vtanh.f32 %v1124_v24  ;;  %v3540_v25 = vpop.f32.mrb[34].mxu0 }
 0x2a0   : > { %v1139_v28 = vadd.f32 %v3540_v25, %v5213_v35  ;;  %v1133_v29 = vpop.f32.mrb[35].mxu0 }
 0x2a1   : > { %v1134_v63 = vadd.f32 %v5213_v35, %v1133_v29 }
 0x2a2   : > { %4441 = vtanh.f32 %v1139_v28 }
 0x2a3   : > { %4443 = vtanh.f32 %v1134_v63  ;;  %v3543_v32 = vpop.f32.mrb[36].mxu0  ;;  %v3977_v63 = vpack.c.bf16 %v1672_v59, %v1670_v58 }
 0x2a4   : > { %v1149_v9 = vadd.f32 %v3543_v32, %v5213_v35  ;;  %v1143_v49 = vpop.f32.mrb[37].mxu0 }
 0x2a5   : > { %v1144_v50 = vadd.f32 %v5213_v35, %v1143_v49 }
 0x2a6   : > { %4445 = vtanh.f32 %v1149_v9 }
 0x2a7   : > { %4447 = vtanh.f32 %v1144_v50  ;;  %v3546_v51 = vpop.f32.mrb[38].mxu0 }
 0x2a8   : > { %v4438_v52 = vpop.eup %4437  ;;  %v1159_v53 = vadd.f32 %v3546_v51, %v5213_v35  ;;  %v1153_v54 = vpop.f32.mrb[39].mxu0  ;;  %v3979_v51 = vpack.c.bf16 %v1677_v17, %v1675_v15 }
 0x2a9   : > { %v4440_v55 = vpop.eup %4439  ;;  %v1219_v56 = vmul.f32 0.25, %v4438_v52  ;;  %v1154_v57 = vadd.f32 %v5213_v35, %v1153_v54  ;;  %v1674_v52 = vld [vmem:[#allocation7 + $0x320] sm:$0xff] }
 0x2aa   : > { %v1218_v34 = vmul.f32 0.25, %v4440_v55  ;;  %4449 = vtanh.f32 %v1159_v53  ;;  %v1676_v53 = vld [vmem:[#allocation7 + $0x330] sm:$0xff]  ;;  %v1681_v55 = vld [vmem:[#allocation7 + $0x358] sm:$0xff] }
 0x2ab   : > { %4451 = vtanh.f32 %v1154_v57  ;;  %v3549_v18 = vpop.f32.mrb[40].mxu0  ;;  %v5435_v9 = vadd.f32 %v1219_v56, %v5232_v21 }
 0x2ac   : > { %v4442_v24 = vpop.eup %4441  ;;  %v5431_v25 = vadd.f32 %v1218_v34, %v5222_v13  ;;  %v1169_v28 = vadd.f32 %v3549_v18, %v5213_v35  ;;  %v1163_v29 = vpop.f32.mrb[41].mxu0  ;;  %v1679_v13 = vld [vmem:[#allocation7 + $0x348] sm:$0xff]  ;;  %v3981_v34 = vpack.c.bf16 %v1676_v53, %v1674_v52 }
 0x2ad   : > { %v4444_v32 = vpop.eup %4443  ;;  %v1221_v49 = vmul.f32 0.25, %v4442_v24  ;;  %v1164_v50 = vadd.f32 %v5213_v35, %v1163_v29  ;;  %v1678_v29 = vld [vmem:[#allocation7 + $0x340] sm:$0xff] }
 0x2ae   : > { %v1220_v54 = vmul.f32 0.25, %v4444_v32  ;;  %4453 = vtanh.f32 %v1169_v28  ;;  %1348 = vmatmul.mubr.f32.vlgmr.msra.gmra.mrb[16].mxu1 %v5431_v25  ;;  %3591 = vmatprep.mubr.f32.mxu0 %v5431_v25  ;;  %v3983_v28 = vpack.c.bf16 %v1681_v55, %v1679_v13  ;;  %v1680_v32 = vld [vmem:[#allocation7 + $0x350] sm:$0xff] }
 0x2af   : > { %4455 = vtanh.f32 %v1164_v50  ;;  %v3552_v57 = vpop.f32.mrb[42].mxu0  ;;  %3592 = vmatmul.mubr.f32.vlgmr.msra.gmra.mrb[48].mxu0 %v5435_v9  ;;  %1353 = vmatprep.mubr.f32.mxu1 %v4809_v30  ;;  %v5449_v24 = vadd.f32 %v1221_v49, %v5250_v42  ;;  %v3985_v53 = vpack.c.bf16 %v1680_v32, %v1678_v29 }
 0x2b0   : > { %v4446_v21 = vpop.eup %4445  ;;  %v1179_v56 = vadd.f32 %v3552_v57, %v5213_v35  ;;  %v1173_v58 = vpop.f32.mrb[43].mxu0  ;;  %v5444_v59 = vadd.f32 %v1220_v54, %v5238_v27  ;;  %3978 = vmatpush1.bf16.msra.mxu1 %v3977_v63  ;;  %4010 = vmatpush3.bf16.msra.mxu0 %v5111_v3  ;;  %v1683_v3 = vld [vmem:[#allocation7 + $0x368] sm:$0xff]  ;;  %v1685_v27 = vld [vmem:[#allocation7 + $0x378] sm:$0xff] }
 0x2b1   : > { %v4448_v15 = vpop.eup %4447  ;;  %v1223_v17 = vmul.f32 0.25, %v4446_v21  ;;  %v1174_v18 = vadd.f32 %v5213_v35, %v1173_v58  ;;  %3980 = vmatprep.subr.bf16.mxu1 %v3979_v51  ;;  %4012 = vmatprep.subr.bf16.mxu0 %v5113_v5  ;;  %v3987_v21 = vpack.c.bf16 %v1685_v27, %v1683_v3 }
 0x2b2   : > { %v1222_v50 = vmul.f32 0.25, %v4448_v15  ;;  %4457 = vtanh.f32 %v1179_v56  ;;  %1354 = vmatmul.mubr.f32.gmra.mrb[18].mxu1 %v5435_v9  ;;  %3594 = vmatprep.mubr.f32.mxu0 %v5444_v59 }
 0x2b3   : > { %4459 = vtanh.f32 %v1174_v18  ;;  %v3555_v63 = vpop.f32.mrb[44].mxu0  ;;  %3595 = vmatmul.mubr.f32.gmra.mrb[50].mxu0 %v5449_v24  ;;  %1359 = vmatprep.mubr.f32.mxu1 %v4809_v30  ;;  %v5463_v57 = vadd.f32 %v1223_v17, %v5270_v19 }
 0x2b4   : > { %v4450_v42 = vpop.eup %4449  ;;  %v1189_v49 = vadd.f32 %v3555_v63, %v5213_v35  ;;  %v1183_v51 = vpop.f32.mrb[45].mxu0  ;;  %v5458_v52 = vadd.f32 %v1222_v50, %v5254_v45  ;;  %3982 = vmatpush1.bf16.msra.mxu1 %v3981_v34  ;;  %4014 = vmatpush3.bf16.msra.mxu0 %v5113_v5 }
 0x2b5   : > { %v4452_v54 = vpop.eup %4451  ;;  %v1225_v13 = vmul.f32 0.25, %v4450_v42  ;;  %v1184_v55 = vadd.f32 %v5213_v35, %v1183_v51  ;;  %3984 = vmatprep.subr.bf16.mxu1 %v3983_v28  ;;  %4016 = vmatprep.subr.bf16.mxu0 %v5118_v8 }
 0x2b6   : > { %v1224_v56 = vmul.f32 0.25, %v4452_v54  ;;  %4461 = vtanh.f32 %v1189_v49  ;;  %1360 = vmatmul.mubr.f32.gmra.mrb[20].mxu1 %v5444_v59  ;;  %3597 = vmatprep.mubr.f32.mxu0 %v5458_v52  ;;  %v1686_v54 = vld [vmem:[#allocation7 + $0x380] sm:$0xff] }
 0x2b7   : > { %4463 = vtanh.f32 %v1184_v55  ;;  %v3558_v5 = vpop.f32.mrb[46].mxu0  ;;  %3598 = vmatmul.mubr.f32.gmra.mrb[52].mxu0 %v5463_v57  ;;  %1365 = vmatprep.mubr.f32.mxu1 %v4809_v30  ;;  %v5477_v28 = vadd.f32 %v1225_v13, %v5295_v46  ;;  %v1688_v13 = vld [vmem:[#allocation7 + $0x390] sm:$0xff] }
 0x2b8   : > { %v4454_v45 = vpop.eup %4453  ;;  %v1199_v19 = vadd.f32 %v3558_v5, %v5213_v35  ;;  %v1193_v58 = vpop.f32.mrb[47].mxu0  ;;  %v5472_v34 = vadd.f32 %v1224_v56, %v5278_v26  ;;  %3986 = vmatpush1.bf16.msra.mxu1 %v3985_v53  ;;  %4018 = vmatpush3.bf16.msra.mxu0 %v5118_v8  ;;  %v3993_v55 = vpack.c.bf16 %v1688_v13, %v1686_v54  ;;  %v1693_v56 = vld [vmem:[#allocation7 + $0x3b8] sm:$0xff] }
 0x2b9   : > { %v4456_v15 = vpop.eup %4455  ;;  %v1227_v17 = vmul.f32 0.25, %v4454_v45  ;;  %v1194_v18 = vadd.f32 %v5213_v35, %v1193_v58  ;;  %3988 = vmatprep.subr.bf16.mxu1 %v3987_v21  ;;  %4020 = vmatprep.subr.bf16.mxu0 %v5126_v12  ;;  %v1691_v21 = vld [vmem:[#allocation7 + $0x3a8] sm:$0xff]  ;;  %v1690_v45 = vld [vmem:[#allocation7 + $0x3a0] sm:$0xff] }
 0x2ba   : > { %v1226_v29 = vmul.f32 0.25, %v4456_v15  ;;  %4465 = vtanh.f32 %v1199_v19  ;;  %1366 = vmatmul.mubr.f32.gmra.mrb[22].mxu1 %v5449_v24  ;;  %3600 = vmatprep.mubr.f32.mxu0 %v5472_v34  ;;  %v3995_v5 = vpack.c.bf16 %v1693_v56, %v1691_v21  ;;  %v1692_v19 = vld [vmem:[#allocation7 + $0x3b0] sm:$0xff]  ;;  %v1695_v15 = vld [vmem:[#allocation7 + $0x3c8] sm:$0xff] }
 0x2bb   : > { %4467 = vtanh.f32 %v1194_v18  ;;  %3601 = vmatmul.mubr.f32.gmra.mrb[54].mxu0 %v5477_v28  ;;  %1371 = vmatprep.mubr.f32.mxu1 %v4809_v30  ;;  %v5489_v32 = vadd.f32 %v1227_v17, %v5273_v23  ;;  %v3997_v58 = vpack.c.bf16 %v1692_v19, %v1690_v45  ;;  %v1697_v17 = vld [vmem:[#allocation7 + $0x3d8] sm:$0xff] }
 0x2bc   : > { %v4458_v8 = vpop.eup %4457  ;;  %v5485_v35 = vadd.f32 %v1226_v29, %v5261_v7  ;;  %4022 = vmatpush3.bf16.msra.mxu0 %v5126_v12  ;;  %v3999_v18 = vpack.c.bf16 %v1697_v17, %v1695_v15  ;;  %v1694_v29 = vld [vmem:[#allocation7 + $0x3c0] sm:$0xff] }
 0x2bd   : > { %v4460_v26 = vpop.eup %4459  ;;  %v1229_v46 = vmul.f32 0.25, %v4458_v8  ;;  %4024 = vmatprep.subr.bf16.mxu0 %v5130_v22  ;;  %v1696_v8 = vld [vmem:[#allocation7 + $0x3d0] sm:$0xff] }
 0x2be   : > { %v1228_v50 = vmul.f32 0.25, %v4460_v26  ;;  %1372 = vmatmul.mubr.f32.gmra.mrb[24].mxu1 %v5458_v52  ;;  %3603 = vmatprep.mubr.f32.mxu0 %v5485_v35  ;;  %v4001_v26 = vpack.c.bf16 %v1696_v8, %v1694_v29  ;;  %v2089_v8 = vld [vmem:[#allocation7 + $0x400] sm:$0xff] }
 0x2bf   : > { %3604 = vmatmul.mubr.f32.gmra.mrb[56].mxu0 %v5489_v32  ;;  %1377 = vmatprep.mubr.f32.mxu1 %v4809_v30  ;;  %v5501_v27 = vadd.f32 %v1229_v46, %v5298_v0  ;;  %v1699_v46 = vld [vmem:[#allocation7 + $0x3e8] sm:$0xff] }
 0x2c0   : > { %v4462_v7 = vpop.eup %4461  ;;  %v5497_v3 = vadd.f32 %v1228_v50, %v5286_v36  ;;  %4026 = vmatpush3.bf16.msra.mxu0 %v5130_v22  ;;  %v1701_v50 = vld [vmem:[#allocation7 + $0x3f8] sm:$0xff] }
 0x2c1   : > { %v4464_v12 = vpop.eup %4463  ;;  %v1231_v23 = vmul.f32 0.25, %v4462_v7  ;;  %4028 = vmatprep.subr.bf16.mxu0 %v5134_v31  ;;  %v4003_v7 = vpack.c.bf16 %v1701_v50, %v1699_v46  ;;  %v2094_v50 = vld [vmem:[#allocation7 + $0x428] sm:$0xff] }
 0x2c2   : > { %v1230_v63 = vmul.f32 0.25, %v4464_v12  ;;  %1378 = vmatmul.mubr.f32.gmra.mrb[26].mxu1 %v5463_v57  ;;  %3606 = vmatprep.mubr.f32.mxu0 %v5497_v3  ;;  %v1698_v12 = vld [vmem:[#allocation7 + $0x3e0] sm:$0xff] }
 0x2c3   : > { %3607 = vmatmul.mubr.f32.gmra.mrb[58].mxu0 %v5501_v27  ;;  %1383 = vmatprep.mubr.f32.mxu1 %v4809_v30  ;;  %v5513_v49 = vadd.f32 %v1231_v23, %v5315_v33  ;;  %v1700_v23 = vld [vmem:[#allocation7 + $0x3f0] sm:$0xff] }
 0x2c4   : > { %v4466_v36 = vpop.eup %4465  ;;  %v5509_v42 = vadd.f32 %v1230_v63, %v5306_v16  ;;  %4030 = vmatpush3.bf16.msra.mxu0 %v5134_v31  ;;  %v4005_v63 = vpack.c.bf16 %v1700_v23, %v1698_v12 }
 0x2c5   : > { %v4468_v22 = vpop.eup %4467  ;;  %v1233_v0 = vmul.f32 0.25, %v4466_v36  ;;  %4032 = vmatprep.subr.bf16.mxu0 %v5138_v40  ;;  %v2090_v36 = vld [vmem:[#allocation7 + $0x408] sm:$0xff] }
 0x2c6   : > { %v1232_v51 = vmul.f32 0.25, %v4468_v22  ;;  %1384 = vmatmul.mubr.f32.gmra.mrb[28].mxu1 %v5472_v34  ;;  %3609 = vmatprep.mubr.f32.mxu0 %v5509_v42  ;;  %v2092_v22 = vld [vmem:[#allocation7 + $0x418] sm:$0xff] }
 0x2c7   : > { %3610 = vmatmul.mubr.f32.gmra.mrb[60].mxu0 %v5513_v49  ;;  %1389 = vmatprep.mubr.f32.mxu1 %v4809_v30  ;;  %v5525_v31 = vadd.f32 %v1233_v0, %v5333_v20  ;;  %v1689_v20 = vld [vmem:[#allocation7 + $0x398] sm:$0xff]  ;;  %v4039_v0 = vpack.c.bf16 %v2092_v22, %v2090_v36 }
 0x2c8   : > { %v5521_v16 = vadd.f32 %v1232_v51, %v5324_v1  ;;  %4034 = vmatpush3.bf16.msra.mxu0 %v5138_v40  ;;  %v1682_v40 = vld [vmem:[#allocation7 + $0x360] sm:$0xff]  ;;  %v1687_v1 = vld [vmem:[#allocation7 + $0x388] sm:$0xff] }
 0x2c9   : > { %4036 = vmatprep.subr.bf16.mxu0 %v5142_v47  ;;  %v3991_v53 = vpack.c.bf16 %v1689_v20, %v1687_v1 }
 0x2ca   : > { %1390 = vmatmul.mubr.f32.gmra.mrb[30].mxu1 %v5477_v28  ;;  %3612 = vmatprep.mubr.f32.mxu0 %v5521_v16 }
 0x2cb   : > { %3613 = vmatmul.mubr.f32.gmra.mrb[62].mxu0 %v5525_v31  ;;  %1395 = vmatprep.mubr.f32.mxu1 %v4809_v30 }
 0x2cc   : > { %4038 = vmatpush3.bf16.msra.mxu0 %v5142_v47  ;;  %v1684_v47 = vld [vmem:[#allocation7 + $0x370] sm:$0xff] }
 0x2cd   : > { %v3989_v33 = vpack.c.bf16 %v1684_v47, %v1682_v40  ;;  %v5552_v40 = vld [vmem:[%s6104_s2] ss:$0 sm:$0xff] }
 0x2ce   : > { %1396 = vmatmul.mubr.f32.gmra.mrb[0].mxu1 %v5485_v35 }
 0x2cf   : > { %1401 = vmatprep.mubr.f32.mxu1 %v4809_v30  ;;  %3990 = vmatpush1.bf16.msra.mxu1 %v3989_v33 }
 0x2d0   : > { %3992 = vmatprep.subr.bf16.mxu1 %v3991_v53 }
 0x2d2   : > { %1402 = vmatmul.mubr.f32.gmra.mrb[2].mxu1 %v5489_v32 }
 0x2d3   : > { %1407 = vmatprep.mubr.f32.mxu1 %v4809_v30  ;;  %3994 = vmatpush1.bf16.msra.mxu1 %v3993_v55 }
 0x2d4   : > { %3996 = vmatprep.subr.bf16.mxu1 %v3995_v5 }
 0x2d6   : > { %1408 = vmatmul.mubr.f32.gmra.mrb[4].mxu1 %v5497_v3 }
 0x2d7   : > { %1413 = vmatprep.mubr.f32.mxu1 %v4809_v30  ;;  %3998 = vmatpush1.bf16.msra.mxu1 %v3997_v58 }
 0x2d8   : > { %4000 = vmatprep.subr.bf16.mxu1 %v3999_v18 }
 0x2da   : > { %1414 = vmatmul.mubr.f32.gmra.mrb[6].mxu1 %v5501_v27 }
 0x2db   : > { %1419 = vmatprep.mubr.f32.mxu1 %v4809_v30  ;;  %4002 = vmatpush1.bf16.msra.mxu1 %v4001_v26  ;;  %v2091_v26 = vld [vmem:[#allocation7 + $0x410] sm:$0xff] }
 0x2dc   : > { %4004 = vmatprep.subr.bf16.mxu1 %v4003_v7  ;;  %v2096_v7 = vld [vmem:[#allocation7 + $0x438] sm:$0xff] }
 0x2de   : > { %1420 = vmatmul.mubr.f32.gmra.mrb[8].mxu1 %v5509_v42 }
 0x2df   : > { %1425 = vmatprep.mubr.f32.mxu1 %v4809_v30  ;;  %4006 = vmatpush1.bf16.msra.mxu1 %v4005_v63 }
 0x2e0   : > { %4040 = vmatprep.subr.bf16.mxu1 %v4039_v0  ;;  %v4041_v0 = vpack.c.bf16 %v2091_v26, %v2089_v8  ;;  %v2097_v8 = vld [vmem:[#allocation7 + $0x440] sm:$0xff]  ;;  %v2099_v26 = vld [vmem:[#allocation7 + $0x450] sm:$0xff] }
 0x2e2   : > { %1426 = vmatmul.mubr.f32.gmra.mrb[10].mxu1 %v5513_v49 }
 0x2e3   : > { %1431 = vmatprep.mubr.f32.mxu1 %v4809_v30 }
 0x2e6   : > { %1432 = vmatmul.mubr.f32.gmra.mrb[12].mxu1 %v5521_v16 }
 0x2e7   : > { %1437 = vmatprep.mubr.f32.mxu1 %v4809_v30 }
 0x2ea   : > { %1438 = vmatmul.mubr.f32.gmra.mrb[14].mxu1 %v5525_v31 }
 0x2eb   : > { %1766 = vmatprep.mubr.f32.mxu1 %v4809_v30 }
 0x382   : > { %v3593_v51 = vpop.f32.mrb[48].mxu0 }
 0x383   : > { %v1548_v47 = vadd.f32 %v5552_v40, %v3593_v51  ;;  %v1542_v33 = vpop.f32.mrb[49].mxu0 }
 0x384   : > { %v1543_v1 = vadd.f32 %v5552_v40, %v1542_v33 }
 0x385   : > { %4469 = vtanh.f32 %v1548_v47 }
 0x386   : > { %4471 = vtanh.f32 %v1543_v1  ;;  %v3596_v20 = vpop.f32.mrb[50].mxu0 }
 0x387   : > { %v1558_v53 = vadd.f32 %v5552_v40, %v3596_v20  ;;  %v1552_v54 = vpop.f32.mrb[51].mxu0  ;;  %v4043_v20 = vpack.c.bf16 %v2096_v7, %v2094_v50  ;;  %v2104_v50 = vld [vmem:[#allocation7 + $0x478] sm:$0xff] }
 0x388   : > { %v1553_v13 = vadd.f32 %v5552_v40, %v1552_v54  ;;  %v2095_v54 = vld [vmem:[#allocation7 + $0x430] sm:$0xff] }
 0x389   : > { %4473 = vtanh.f32 %v1558_v53  ;;  %v2093_v53 = vld [vmem:[#allocation7 + $0x420] sm:$0xff] }
 0x38a   : > { %4475 = vtanh.f32 %v1553_v13  ;;  %v3599_v55 = vpop.f32.mrb[52].mxu0 }
 0x38b   : > { %v1568_v21 = vadd.f32 %v5552_v40, %v3599_v55  ;;  %v1562_v56 = vpop.f32.mrb[53].mxu0  ;;  %v2100_v55 = vld [vmem:[#allocation7 + $0x458] sm:$0xff] }
 0x38c   : > { %v1563_v5 = vadd.f32 %v5552_v40, %v1562_v56 }
 0x38d   : > { %4477 = vtanh.f32 %v1568_v21 }
 0x38e   : > { %4479 = vtanh.f32 %v1563_v5  ;;  %v3602_v45 = vpop.f32.mrb[54].mxu0 }
 0x38f   : > { %v4470_v19 = vpop.eup %4469  ;;  %v1578_v58 = vadd.f32 %v5552_v40, %v3602_v45  ;;  %v1572_v15 = vpop.f32.mrb[55].mxu0 }
 0x390   : > { %v4472_v17 = vpop.eup %4471  ;;  %v1638_v18 = vmul.f32 0.25, %v4470_v19  ;;  %v1573_v29 = vadd.f32 %v5552_v40, %v1572_v15  ;;  %v4045_v19 = vpack.c.bf16 %v2095_v54, %v2093_v53  ;;  %v2101_v53 = vld [vmem:[#allocation7 + $0x460] sm:$0xff]  ;;  %v2103_v54 = vld [vmem:[#allocation7 + $0x470] sm:$0xff] }
 0x391   : > { %v1637_v46 = vmul.f32 0.25, %v4472_v17  ;;  %4481 = vtanh.f32 %v1578_v58 }
 0x392   : > { %4483 = vtanh.f32 %v1573_v29  ;;  %v3605_v12 = vpop.f32.mrb[56].mxu0  ;;  %v5567_v47 = vadd.f32 %v1638_v18, %v5435_v9 }
 0x393   : > { %v4474_v23 = vpop.eup %4473  ;;  %v5563_v63 = vadd.f32 %v1637_v46, %v5431_v25  ;;  %v1588_v36 = vadd.f32 %v5552_v40, %v3605_v12  ;;  %v1582_v22 = vpop.f32.mrb[57].mxu0  ;;  %v2098_v25 = vld [vmem:[#allocation7 + $0x448] sm:$0xff] }
 0x394   : > { %v4476_v51 = vpop.eup %4475  ;;  %v1640_v33 = vmul.f32 0.25, %v4474_v23  ;;  %v1583_v1 = vadd.f32 %v5552_v40, %v1582_v22  ;;  %v4047_v29 = vpack.c.bf16 %v2100_v55, %v2098_v25  ;;  %v4049_v22 = vpack.c.bf16 %v2099_v26, %v2097_v8  ;;  %v2108_v25 = vld [vmem:[#allocation7 + $0x498] sm:$0xff]  ;;  %v2105_v8 = vld [vmem:[#allocation7 + $0x480] sm:$0xff]  ;;  %v2107_v26 = vld [vmem:[#allocation7 + $0x490] sm:$0xff] }
 0x395   : > { %v1639_v13 = vmul.f32 0.25, %v4476_v51  ;;  %4485 = vtanh.f32 %v1588_v36  ;;  %1767 = vmatmul.mubr.f32.vlgmr.msra.gmra.mrb[16].mxu1 %v5563_v63  ;;  %3647 = vmatprep.mubr.f32.mxu0 %v5563_v63 }
 0x396   : > { %4487 = vtanh.f32 %v1583_v1  ;;  %v3608_v21 = vpop.f32.mrb[58].mxu0  ;;  %3648 = vmatmul.mubr.f32.vlgmr.msra.gmra.mrb[64].mxu0 %v5567_v47  ;;  %1772 = vmatprep.mubr.f32.mxu1 %v4809_v30  ;;  %v5580_v18 = vadd.f32 %v1640_v33, %v5449_v24 }
 0x397   : > { %v4478_v9 = vpop.eup %4477  ;;  %v1598_v56 = vadd.f32 %v5552_v40, %v3608_v21  ;;  %v1592_v5 = vpop.f32.mrb[59].mxu0  ;;  %v5576_v45 = vadd.f32 %v1639_v13, %v5444_v59  ;;  %4042 = vmatpush1.bf16.msra.mxu1 %v4041_v0  ;;  %v2102_v59 = vld [vmem:[#allocation7 + $0x468] sm:$0xff] }
 0x398   : > { %v4480_v58 = vpop.eup %4479  ;;  %v1642_v15 = vmul.f32 0.25, %v4478_v9  ;;  %v1593_v17 = vadd.f32 %v5552_v40, %v1592_v5  ;;  %4044 = vmatprep.subr.bf16.mxu1 %v4043_v20  ;;  %v4051_v20 = vpack.c.bf16 %v2104_v50, %v2102_v59  ;;  %v4053_v5 = vpack.c.bf16 %v2103_v54, %v2101_v53  ;;  %v2112_v59 = vld [vmem:[#allocation7 + $0x4b8] sm:$0xff] }
 0x399   : > { %v1641_v46 = vmul.f32 0.25, %v4480_v58  ;;  %4489 = vtanh.f32 %v1598_v56  ;;  %1773 = vmatmul.mubr.f32.gmra.mrb[18].mxu1 %v5567_v47  ;;  %3650 = vmatprep.mubr.f32.mxu0 %v5576_v45 }
 0x39a   : > { %4491 = vtanh.f32 %v1593_v17  ;;  %v3611_v7 = vpop.f32.mrb[60].mxu0  ;;  %3651 = vmatmul.mubr.f32.gmra.mrb[66].mxu0 %v5580_v18  ;;  %1778 = vmatprep.mubr.f32.mxu1 %v4809_v30  ;;  %v5592_v1 = vadd.f32 %v1642_v15, %v5463_v57 }
 0x39b   : > { %v4482_v24 = vpop.eup %4481  ;;  %v1608_v12 = vadd.f32 %v5552_v40, %v3611_v7  ;;  %v1602_v23 = vpop.f32.mrb[61].mxu0  ;;  %v5588_v36 = vadd.f32 %v1641_v46, %v5458_v52  ;;  %4046 = vmatpush1.bf16.msra.mxu1 %v4045_v19  ;;  %v2106_v52 = vld [vmem:[#allocation7 + $0x488] sm:$0xff]  ;;  %v4057_v7 = vpack.c.bf16 %v2107_v26, %v2105_v8  ;;  %v2117_v26 = vld [vmem:[#allocation7 + $0x4e0] sm:$0xff] }
 0x39c   : > { %v4484_v0 = vpop.eup %4483  ;;  %v1644_v51 = vmul.f32 0.25, %v4482_v24  ;;  %v1603_v33 = vadd.f32 %v5552_v40, %v1602_v23  ;;  %4048 = vmatprep.subr.bf16.mxu1 %v4047_v29  ;;  %v4055_v29 = vpack.c.bf16 %v2108_v25, %v2106_v52 }
 0x39d   : > { %v1643_v13 = vmul.f32 0.25, %v4484_v0  ;;  %4493 = vtanh.f32 %v1608_v12  ;;  %1779 = vmatmul.mubr.f32.gmra.mrb[20].mxu1 %v5576_v45  ;;  %3653 = vmatprep.mubr.f32.mxu0 %v5588_v36  ;;  %v2109_v0 = vld [vmem:[#allocation7 + $0x4a0] sm:$0xff] }
 0x39e   : > { %4495 = vtanh.f32 %v1603_v33  ;;  %v3614_v55 = vpop.f32.mrb[62].mxu0  ;;  %3654 = vmatmul.mubr.f32.gmra.mrb[68].mxu0 %v5592_v1  ;;  %1784 = vmatprep.mubr.f32.mxu1 %v4809_v30  ;;  %v5604_v17 = vadd.f32 %v1644_v51, %v5477_v28  ;;  %v2111_v51 = vld [vmem:[#allocation7 + $0x4b0] sm:$0xff] }
 0x39f   : > { %v4486_v57 = vpop.eup %4485  ;;  %v1618_v21 = vadd.f32 %v5552_v40, %v3614_v55  ;;  %v1612_v9 = vpop.f32.mrb[63].mxu0  ;;  %v5600_v56 = vadd.f32 %v1643_v13, %v5472_v34  ;;  %4050 = vmatpush1.bf16.msra.mxu1 %v4049_v22  ;;  %v2110_v34 = vld [vmem:[#allocation7 + $0x4a8] sm:$0xff] }
 0x3a0   : > { %v4488_v19 = vpop.eup %4487  ;;  %v1646_v58 = vmul.f32 0.25, %v4486_v57  ;;  %v1613_v15 = vadd.f32 %v5552_v40, %v1612_v9  ;;  %4052 = vmatprep.subr.bf16.mxu1 %v4051_v20  ;;  %v4059_v22 = vpack.c.bf16 %v2112_v59, %v2110_v34  ;;  %v2406_v59 = vld [vmem:[#allocation8 + $0x80] sm:$0xff] }
 0x3a1   : > { %v1645_v46 = vmul.f32 0.25, %v4488_v19  ;;  %4497 = vtanh.f32 %v1618_v21  ;;  %1785 = vmatmul.mubr.f32.gmra.mrb[22].mxu1 %v5580_v18  ;;  %3656 = vmatprep.mubr.f32.mxu0 %v5600_v56  ;;  %v2115_v19 = vld [vmem:[#allocation7 + $0x4d0] sm:$0xff] }
 0x3a2   : > { %4499 = vtanh.f32 %v1613_v15  ;;  %3657 = vmatmul.mubr.f32.gmra.mrb[70].mxu0 %v5604_v17  ;;  %1790 = vmatprep.mubr.f32.mxu1 %v4809_v30  ;;  %v5614_v23 = vadd.f32 %v1646_v58, %v5489_v32  ;;  %v4061_v32 = vpack.c.bf16 %v2111_v51, %v2109_v0  ;;  %v2118_v15 = vld [vmem:[#allocation7 + $0x4e8] sm:$0xff]  ;;  %v2409_v0 = vld [vmem:[#allocation8 + $0x98] sm:$0xff] }
 0x3a3   : > { %v4490_v50 = vpop.eup %4489  ;;  %v5611_v28 = vadd.f32 %v1645_v46, %v5485_v35  ;;  %4054 = vmatpush1.bf16.msra.mxu1 %v4053_v5  ;;  %v2113_v5 = vld [vmem:[#allocation7 + $0x4c0] sm:$0xff]  ;;  %v2119_v46 = vld [vmem:[#allocation7 + $0x4f0] sm:$0xff] }
 0x3a4   : > { %v4492_v24 = vpop.eup %4491  ;;  %v1648_v12 = vmul.f32 0.25, %v4490_v50  ;;  %4056 = vmatprep.subr.bf16.mxu1 %v4055_v29  ;;  %v4065_v58 = vpack.c.bf16 %v2115_v19, %v2113_v5  ;;  %v2120_v29 = vld [vmem:[#allocation7 + $0x4f8] sm:$0xff]  ;;  %v4069_v34 = vpack.c.bf16 %v2119_v46, %v2117_v26  ;;  %v2407_v50 = vld [vmem:[#allocation8 + $0x88] sm:$0xff]  ;;  %v2396_v5 = vld [vmem:[#allocation8 + $0x30] sm:$0xff] }
 0x3a5   : > { %v1647_v33 = vmul.f32 0.25, %v4492_v24  ;;  %1791 = vmatmul.mubr.f32.gmra.mrb[24].mxu1 %v5588_v36  ;;  %3659 = vmatprep.mubr.f32.mxu0 %v5611_v28  ;;  %v4067_v8 = vpack.c.bf16 %v2120_v29, %v2118_v15  ;;  %v4071_v24 = vpack.c.bf16 %v2407_v50, %v2406_v59  ;;  %v2397_v19 = vld [vmem:[#allocation8 + $0x38] sm:$0xff]  ;;  %v2415_v15 = vld [vmem:[#allocation8 + $0xc8] sm:$0xff]  ;;  %v2398_v26 = vld [vmem:[#allocation8 + $0x40] sm:$0xff] }
 0x3a6   : > { %3660 = vmatmul.mubr.f32.gmra.mrb[72].mxu0 %v5614_v23  ;;  %1796 = vmatprep.mubr.f32.mxu1 %v4809_v30  ;;  %v5624_v13 = vadd.f32 %v1648_v12, %v5501_v27  ;;  %v2391_v12 = vld [vmem:[#allocation8 + $0x8] sm:$0xff]  ;;  %v4085_v29 = vpack.c.bf16 %v2397_v19, %v2396_v5  ;;  %v2417_v59 = vld [vmem:[#allocation8 + $0xd8] sm:$0xff] }
 0x3a7   : > { %v4494_v35 = vpop.eup %4493  ;;  %v5621_v20 = vadd.f32 %v1647_v33, %v5497_v3  ;;  %4058 = vmatpush1.bf16.msra.mxu1 %v4057_v7  ;;  %v2390_v7 = vld [vmem:[#allocation8] sm:$0xff]  ;;  %4072 = vmatprep.subr.bf16.mxu0 %v4071_v24  ;;  %v2399_v46 = vld [vmem:[#allocation8 + $0x48] sm:$0xff]  ;;  %v2400_v24 = vld [vmem:[#allocation8 + $0x50] sm:$0xff] }
 0x3a8   : > { %v4496_v53 = vpop.eup %4495  ;;  %v1650_v54 = vmul.f32 0.25, %v4494_v35  ;;  %4060 = vmatprep.subr.bf16.mxu1 %v4059_v22  ;;  %v2408_v22 = vld [vmem:[#allocation8 + $0x90] sm:$0xff]  ;;  %v4073_v51 = vpack.c.bf16 %v2391_v12, %v2390_v7  ;;  %v4089_v50 = vpack.c.bf16 %v2399_v46, %v2398_v26  ;;  %v2401_v12 = vld [vmem:[#allocation8 + $0x58] sm:$0xff] }
 0x3a9   : > { %v1649_v52 = vmul.f32 0.25, %v4496_v53  ;;  %1797 = vmatmul.mubr.f32.gmra.mrb[26].mxu1 %v5592_v1  ;;  %3662 = vmatprep.mubr.f32.mxu0 %v5621_v20  ;;  %v4075_v33 = vpack.c.bf16 %v2409_v0, %v2408_v22  ;;  %v2392_v35 = vld [vmem:[#allocation8 + $0x10] sm:$0xff]  ;;  %v2410_v53 = vld [vmem:[#allocation8 + $0xa0] sm:$0xff]  ;;  %v4093_v22 = vpack.c.bf16 %v2401_v12, %v2400_v24 }
 0x3aa   : > { %3663 = vmatmul.mubr.f32.gmra.mrb[74].mxu0 %v5624_v13  ;;  %1802 = vmatprep.mubr.f32.mxu1 %v4809_v30  ;;  %v5634_v27 = vadd.f32 %v1650_v54, %v5513_v49  ;;  %v2114_v49 = vld [vmem:[#allocation7 + $0x4c8] sm:$0xff] }
 0x3ab   : > { %v4498_v25 = vpop.eup %4497  ;;  %v5631_v3 = vadd.f32 %v1649_v52, %v5509_v42  ;;  %4062 = vmatpush1.bf16.msra.mxu1 %v4061_v32  ;;  %v2393_v32 = vld [vmem:[#allocation8 + $0x18] sm:$0xff]  ;;  %v2411_v54 = vld [vmem:[#allocation8 + $0xa8] sm:$0xff]  ;;  %4074 = vmatpush3.bf16.msra.mxu0 %v4073_v51 }
 0x3ac   : > { %v4500_v55 = vpop.eup %4499  ;;  %v1652_v57 = vmul.f32 0.25, %v4498_v25  ;;  %v4077_v52 = vpack.c.bf16 %v2393_v32, %v2392_v35  ;;  %4076 = vmatprep.subr.bf16.mxu0 %v4075_v33  ;;  %v4079_v25 = vpack.c.bf16 %v2411_v54, %v2410_v53 }
 0x3ad   : > { %v1651_v21 = vmul.f32 0.25, %v4500_v55  ;;  %1803 = vmatmul.mubr.f32.gmra.mrb[28].mxu1 %v5600_v56  ;;  %3665 = vmatprep.mubr.f32.mxu0 %v5631_v3  ;;  %v2394_v55 = vld [vmem:[#allocation8 + $0x20] sm:$0xff] }
 0x3ae   : > { %3666 = vmatmul.mubr.f32.gmra.mrb[76].mxu0 %v5634_v27  ;;  %1808 = vmatprep.mubr.f32.mxu1 %v4809_v30  ;;  %v5644_v42 = vadd.f32 %v1652_v57, %v5525_v31  ;;  %v2395_v57 = vld [vmem:[#allocation8 + $0x28] sm:$0xff] }
 0x3af   : > { %v5641_v9 = vadd.f32 %v1651_v21, %v5521_v16  ;;  %v2116_v16 = vld [vmem:[#allocation7 + $0x4d8] sm:$0xff]  ;;  %v2412_v21 = vld [vmem:[#allocation8 + $0xb0] sm:$0xff]  ;;  %4078 = vmatpush3.bf16.msra.mxu0 %v4077_v52 }
 0x3b0   : > { %v4063_v31 = vpack.c.bf16 %v2116_v16, %v2114_v49  ;;  %v2413_v49 = vld [vmem:[#allocation8 + $0xb8] sm:$0xff]  ;;  %v4081_v16 = vpack.c.bf16 %v2395_v57, %v2394_v55  ;;  %4080 = vmatprep.subr.bf16.mxu0 %v4079_v25 }
 0x3b1   : > { %1809 = vmatmul.mubr.f32.gmra.mrb[30].mxu1 %v5604_v17  ;;  %3668 = vmatprep.mubr.f32.mxu0 %v5641_v9 }
 0x3b2   : > { %3669 = vmatmul.mubr.f32.gmra.mrb[78].mxu0 %v5644_v42  ;;  %1814 = vmatprep.mubr.f32.mxu1 %v4809_v30 }
 0x3b3   : > { %4064 = vmatprep.subr.bf16.mxu1 %v4063_v31  ;;  %v4083_v31 = vpack.c.bf16 %v2413_v49, %v2412_v21  ;;  %4082 = vmatpush3.bf16.msra.mxu0 %v4081_v16 }
 0x3b4   : > { %4066 = vmatpush1.bf16.msra.mxu1 %v4065_v58  ;;  %v2414_v58 = vld [vmem:[#allocation8 + $0xc0] sm:$0xff] }
 0x3b5   : > { %1815 = vmatmul.mubr.f32.gmra.mrb[0].mxu1 %v5611_v28  ;;  %4068 = vmatprep.subr.bf16.mxu1 %v4067_v8  ;;  %v4087_v8 = vpack.c.bf16 %v2415_v15, %v2414_v58 }
 0x3b6   : > { %1820 = vmatprep.mubr.f32.mxu1 %v4809_v30  ;;  %4084 = vmatprep.subr.bf16.mxu0 %v4083_v31 }
 0x3b7   : > { %4086 = vmatpush3.bf16.msra.mxu0 %v4085_v29 }
 0x3b8   : > { %4070 = vmatpush1.bf16.msra.mxu1 %v4069_v34  ;;  %v2416_v34 = vld [vmem:[#allocation8 + $0xd0] sm:$0xff]  ;;  %4088 = vmatprep.subr.bf16.mxu0 %v4087_v8 }
 0x3b9   : > { %1821 = vmatmul.mubr.f32.gmra.mrb[2].mxu1 %v5614_v23  ;;  %v4091_v7 = vpack.c.bf16 %v2417_v59, %v2416_v34 }
 0x3ba   : > { %1826 = vmatprep.mubr.f32.mxu1 %v4809_v30 }
 0x3bb   : > { %4090 = vmatpush3.bf16.msra.mxu0 %v4089_v50 }
 0x3bc   : > { %4092 = vmatprep.subr.bf16.mxu0 %v4091_v7 }
 0x3bd   : > { %1827 = vmatmul.mubr.f32.gmra.mrb[4].mxu1 %v5621_v20 }
 0x3be   : > { %1832 = vmatprep.mubr.f32.mxu1 %v4809_v30 }
 0x3bf   : > { %4094 = vmatpush3.bf16.msra.mxu0 %v4093_v22 }
 0x3c1   : > { %1833 = vmatmul.mubr.f32.gmra.mrb[6].mxu1 %v5624_v13 }
 0x3c2   : > { %1838 = vmatprep.mubr.f32.mxu1 %v4809_v30 }
 0x3c5   : > { %1839 = vmatmul.mubr.f32.gmra.mrb[8].mxu1 %v5631_v3 }
 0x3c6   : > { %1844 = vmatprep.mubr.f32.mxu1 %v4809_v30 }
 0x3c9   : > { %1845 = vmatmul.mubr.f32.gmra.mrb[10].mxu1 %v5634_v27 }
 0x3ca   : > { %1850 = vmatprep.mubr.f32.mxu1 %v4809_v30 }
 0x3cd   : > { %1851 = vmatmul.mubr.f32.gmra.mrb[12].mxu1 %v5641_v9 }
 0x3ce   : > { %1856 = vmatprep.mubr.f32.mxu1 %v4809_v30 }
 0x3d1   : > { %1857 = vmatmul.mubr.f32.gmra.mrb[14].mxu1 %v5644_v42 }
 0x3d2   : > { %2185 = vmatprep.mubr.f32.mxu1 %v4809_v30 }
 0x469   : > { %v3649_v0 = vpop.f32.mrb[64].mxu0 }
 0x46a   : > { %v1967_v51 = vadd.f32 %v5552_v40, %v3649_v0  ;;  %v1961_v33 = vpop.f32.mrb[65].mxu0 }
 0x46b   : > { %v1962_v35 = vadd.f32 %v5552_v40, %v1961_v33 }
 0x46c   : > { %4501 = vtanh.f32 %v1967_v51 }
 0x46d   : > { %4503 = vtanh.f32 %v1962_v35  ;;  %v3652_v32 = vpop.f32.mrb[66].mxu0 }
 0x46e   : > { %v1971_v53 = vpop.f32.mrb[67].mxu0  ;;  %v1977_v52 = vadd.f32 %v5552_v40, %v3652_v32 }
 0x46f   : > { %v1972_v54 = vadd.f32 %v5552_v40, %v1971_v53 }
 0x471   : > { %4505 = vtanh.f32 %v1972_v54  ;;  %v3655_v25 = vpop.f32.mrb[68].mxu0 }
 0x472   : > { %v1981_v55 = vpop.f32.mrb[69].mxu0  ;;  %4507 = vtanh.f32 %v1977_v52  ;;  %v1987_v19 = vadd.f32 %v5552_v40, %v3655_v25 }
 0x473   : > { %v1982_v57 = vadd.f32 %v5552_v40, %v1981_v55 }
 0x475   : > { %v3658_v21 = vpop.f32.mrb[70].mxu0  ;;  %4509 = vtanh.f32 %v1982_v57 }
 0x476   : > { %v4502_v49 = vpop.eup %4501  ;;  %v1991_v16 = vpop.f32.mrb[71].mxu0  ;;  %4511 = vtanh.f32 %v1987_v19  ;;  %v1997_v12 = vadd.f32 %v5552_v40, %v3658_v21 }
 0x477   : > { %v4504_v31 = vpop.eup %4503  ;;  %v2057_v15 = vmul.f32 0.25, %v4502_v49  ;;  %v1992_v46 = vadd.f32 %v5552_v40, %v1991_v16 }
 0x478   : > { %v2056_v5 = vmul.f32 0.25, %v4504_v31 }
 0x479   : > { %v3661_v58 = vpop.f32.mrb[72].mxu0  ;;  %v2073_v7 = vadd.f32 %v2057_v15, %v5567_v47  ;;  %4513 = vtanh.f32 %v1992_v46 }
 0x47a   : > { %v2072_v29 = vadd.f32 %v2056_v5, %v5563_v63  ;;  %v2001_v8 = vpop.f32.mrb[73].mxu0  ;;  %4515 = vtanh.f32 %v1997_v12  ;;  %v2007_v25 = vadd.f32 %v5552_v40, %v3661_v58 }
 0x47b   : > { %v4506_v26 = vpop.eup %4505  ;;  %v2002_v35 = vadd.f32 %v5552_v40, %v2001_v8 }
 0x47c   : > { %2186 = vmatmul.mubr.f32.vlgmr.msra.gmra.mrb[16].mxu1 %v2072_v29  ;;  %v2058_v59 = vmul.f32 0.25, %v4506_v26  ;;  %v4508_v24 = vpop.eup %4507 }
 0x47d   : > { %v3664_v34 = vpop.f32.mrb[74].mxu0  ;;  %2191 = vmatprep.mubr.f32.mxu1 %v4809_v30  ;;  %v2059_v63 = vmul.f32 0.25, %v4508_v24  ;;  %4517 = vtanh.f32 %v2002_v35 }
 0x47e   : > { %v2011_v50 = vpop.f32.mrb[75].mxu0  ;;  %v2074_v51 = vadd.f32 %v2058_v59, %v5576_v45  ;;  %4519 = vtanh.f32 %v2007_v25  ;;  %v2017_v31 = vadd.f32 %v5552_v40, %v3664_v34  ;;  %v2403_v25 = vld [vmem:[#allocation8 + $0x68] sm:$0xff] }
 0x47f   : > { %v4510_v33 = vpop.eup %4509  ;;  %v2075_v54 = vadd.f32 %v2059_v63, %v5580_v18  ;;  %v2012_v21 = vadd.f32 %v5552_v40, %v2011_v50 }
 0x480   : > { %2192 = vmatmul.mubr.f32.gmra.mrb[18].mxu1 %v2073_v7  ;;  %v2060_v47 = vmul.f32 0.25, %v4510_v33  ;;  %v4512_v52 = vpop.eup %4511 }
 0x481   : > { %v3667_v22 = vpop.f32.mrb[76].mxu0  ;;  %2197 = vmatprep.mubr.f32.mxu1 %v4809_v30  ;;  %v2061_v45 = vmul.f32 0.25, %v4512_v52  ;;  %4521 = vtanh.f32 %v2012_v21  ;;  %v2402_v52 = vld [vmem:[#allocation8 + $0x60] sm:$0xff]  ;;  %v2404_v21 = vld [vmem:[#allocation8 + $0x70] sm:$0xff] }
 0x482   : > { %v2021_v0 = vpop.f32.mrb[77].mxu0  ;;  %v2076_v55 = vadd.f32 %v2060_v47, %v5588_v36  ;;  %4523 = vtanh.f32 %v2017_v31  ;;  %v2027_v8 = vadd.f32 %v5552_v40, %v3667_v22 }
 0x483   : > { %v4514_v57 = vpop.eup %4513  ;;  %v2077_v18 = vadd.f32 %v2061_v45, %v5592_v1  ;;  %v2022_v58 = vadd.f32 %v5552_v40, %v2021_v0  ;;  %v4097_v45 = vpack.c.bf16 %v2403_v25, %v2402_v52 }
 0x484   : > { %2198 = vmatmul.mubr.f32.gmra.mrb[20].mxu1 %v2074_v51  ;;  %v2062_v49 = vmul.f32 0.25, %v4514_v57  ;;  %v4516_v16 = vpop.eup %4515 }
 0x485   : > { %v3670_v32 = vpop.f32.mrb[78].mxu0  ;;  %2203 = vmatprep.mubr.f32.mxu1 %v4809_v30  ;;  %v2063_v5 = vmul.f32 0.25, %v4516_v16  ;;  %4525 = vtanh.f32 %v2022_v58  ;;  %v2316_v16 = vlaneseq }
 0x486   : > { %v2031_v53 = vpop.f32.mrb[79].mxu0  ;;  %v2078_v36 = vadd.f32 %v2062_v49, %v5600_v56  ;;  %4527 = vtanh.f32 %v2027_v8  ;;  %v2037_v7 = vadd.f32 %v5552_v40, %v3670_v32  ;;  %v2405_v49 = vld [vmem:[#allocation8 + $0x78] sm:$0xff] }
 0x487   : > { %v4518_v19 = vpop.eup %4517  ;;  %v2079_v1 = vadd.f32 %v2063_v5, %v5604_v17  ;;  %v2032_v34 = vadd.f32 %v5552_v40, %v2031_v53  ;;  %v2419_v53 = vld [vmem:[#allocation8 + $0xe8] sm:$0xff]  ;;  %v2317_v31 = vshrl.u32 %v2316_v16, 7 }
 0x488   : > { %2204 = vmatmul.mubr.f32.gmra.mrb[22].mxu1 %v2075_v54  ;;  %v2064_v15 = vmul.f32 0.25, %v4518_v19  ;;  %v4520_v29 = vpop.eup %4519 }
 0x489   : > { %2209 = vmatprep.mubr.f32.mxu1 %v4809_v30  ;;  %v2065_v26 = vmul.f32 0.25, %v4520_v29  ;;  %4529 = vtanh.f32 %v2032_v34  ;;  %v2318_v5 = vsub.s32 0, %v2317_v31  ;;  %v2322_v19 = vsub.s32 1, %v2317_v31 }
 0x48a   : > { %v2080_v56 = vadd.f32 %v2064_v15, %v5611_v28  ;;  %4531 = vtanh.f32 %v2037_v7 }
 0x48b   : > { %v4522_v46 = vpop.eup %4521  ;;  %v2081_v17 = vadd.f32 %v2065_v26, %v5614_v23 }
 0x48c   : > { %2210 = vmatmul.mubr.f32.gmra.mrb[24].mxu1 %v2076_v55  ;;  %v2066_v59 = vmul.f32 0.25, %v4522_v46  ;;  %v4524_v50 = vpop.eup %4523  ;;  %v2421_v55 = vld [vmem:[#allocation8 + $0xf8] sm:$0xff] }
 0x48d   : > { %2215 = vmatprep.mubr.f32.mxu1 %v4809_v30  ;;  %v2067_v24 = vmul.f32 0.25, %v4524_v50 }
 0x48e   : > { %v2082_v28 = vadd.f32 %v2066_v59, %v5621_v20  ;;  %v2592_v59 = vld [vmem:[#allocation10 + $0x10] sm:$0xff] }
 0x48f   : > { %v4526_v12 = vpop.eup %4525  ;;  %v2083_v63 = vadd.f32 %v2067_v24, %v5624_v13 }
 0x490   : > { %2216 = vmatmul.mubr.f32.gmra.mrb[26].mxu1 %v2077_v18  ;;  %v2068_v22 = vmul.f32 0.25, %v4526_v12  ;;  %v4528_v0 = vpop.eup %4527  ;;  %v2591_v18 = vld [vmem:[#allocation10 + $0x8] sm:$0xff] }
 0x491   : > { %2221 = vmatprep.mubr.f32.mxu1 %v4809_v30  ;;  %v2069_v23 = vmul.f32 0.25, %v4528_v0  ;;  %v2594_v0 = vld [vmem:[#allocation10 + $0x20] sm:$0xff] }
 0x492   : > { %v2084_v40 = vadd.f32 %v2068_v22, %v5631_v3  ;;  %v2418_v3 = vld [vmem:[#allocation8 + $0xe0] sm:$0xff] }
 0x493   : > { %v4530_v51 = vpop.eup %4529  ;;  %v2085_v33 = vadd.f32 %v2069_v23, %v5634_v27  ;;  %v4095_v54 = vpack.c.bf16 %v2419_v53, %v2418_v3  ;;  %v2420_v27 = vld [vmem:[#allocation8 + $0xf0] sm:$0xff]  ;;  %v2595_v23 = vld [vmem:[#allocation10 + $0x28] sm:$0xff] }
 0x494   : > { %2222 = vmatmul.mubr.f32.gmra.mrb[28].mxu1 %v2078_v36  ;;  %v2070_v20 = vmul.f32 0.25, %v4530_v51  ;;  %v4532_v35 = vpop.eup %4531  ;;  %v4099_v57 = vpack.c.bf16 %v2421_v55, %v2420_v27  ;;  %v2314_v36 = vld [vmem:[%s6106_s4] sm:$0x3] }
 0x495   : > { %2227 = vmatprep.mubr.f32.mxu1 %v4809_v30  ;;  %v2071_v32 = vmul.f32 0.25, %v4532_v35  ;;  %4096 = vmatprep.subr.bf16.mxu0 %v4095_v54  ;;  %v5719_v58 = vrot.slane %v2314_v36, %v2318_v5  ;;  %v5738_v35 = vpack.c.bf16 %v2595_v23, %v2594_v0 }
 0x496   : > { %v2086_v13 = vadd.f32 %v2070_v20, %v5641_v9  ;;  %4098 = vmatpush3.bf16.msra.mxu0 %v4097_v45  ;;  %v4101_v9 = vpack.c.bf16 %v2405_v49, %v2404_v21 }
 0x497   : > { %v2087_v47 = vadd.f32 %v2071_v32, %v5644_v42  ;;  %4100 = vmatprep.subr.bf16.mxu0 %v4099_v57  ;;  %v2598_v57 = vld [vmem:[#allocation10 + $0x40] sm:$0xff] }
 0x498   : > { %2228 = vmatmul.mubr.f32.gmra.mrb[30].mxu1 %v2079_v1  ;;  %v5721_v1 = vrot.slane %v2314_v36, %v2322_v19 }
 0x499   : > { %2233 = vmatprep.mubr.f32.mxu1 %v4809_v30 }
 0x49a   : > { %4102 = vmatpush3.bf16.msra.mxu0 %v4101_v9 }
 0x49c   : > { %2234 = vmatmul.mubr.f32.gmra.mrb[0].mxu1 %v2080_v56 }
 0x49d   : > { %2239 = vmatprep.mubr.f32.mxu1 %v4809_v30 }
 0x4a0   : > { %2240 = vmatmul.mubr.f32.gmra.mrb[2].mxu1 %v2081_v17  ;;  %v2593_v17 = vld [vmem:[#allocation10 + $0x18] sm:$0xff] }
 0x4a1   : > { %2245 = vmatprep.mubr.f32.mxu1 %v4809_v30 }
 0x4a4   : > { %2246 = vmatmul.mubr.f32.gmra.mrb[4].mxu1 %v2082_v28 }
 0x4a5   : > { %2251 = vmatprep.mubr.f32.mxu1 %v4809_v30 }
 0x4a8   : > { %2252 = vmatmul.mubr.f32.gmra.mrb[6].mxu1 %v2083_v63 }
 0x4a9   : > { %2257 = vmatprep.mubr.f32.mxu1 %v4809_v30 }
 0x4ac   : > { %2258 = vmatmul.mubr.f32.gmra.mrb[8].mxu1 %v2084_v40 }
 0x4ad   : > { %2263 = vmatprep.mubr.f32.mxu1 %v4809_v30 }
 0x4b0   : > { %2264 = vmatmul.mubr.f32.gmra.mrb[10].mxu1 %v2085_v33 }
 0x4b1   : > { %2269 = vmatprep.mubr.f32.mxu1 %v4809_v30 }
 0x4b4   : > { %2270 = vmatmul.mubr.f32.gmra.mrb[12].mxu1 %v2086_v13 }
 0x4b5   : > { %2275 = vmatprep.mubr.f32.mxu1 %v4809_v30  ;;  %v2590_v30 = vld [vmem:[#allocation10] sm:$0xff] }
 0x4b6   : > { %v5713_v42 = vpack.c.bf16 %v2591_v18, %v2590_v30 }
 0x4b8   : > { %2276 = vmatmul.mubr.f32.gmra.mrb[14].mxu1 %v2087_v47  ;;  %4104 = vmatprep.subr.bf16.mxu0 %v5713_v42  ;;  %v2596_v47 = vld [vmem:[#allocation10 + $0x30] sm:$0xff] }
 0x54f   : > { %v2187_v15 = vpop.f32.mrb[16].mxu1 }
 0x550   : > { %v4183_v29 = vadd.f32 %v2187_v15, %v5390_v37  ;;  %v2189_v8 = vpop.f32.mrb[17].mxu1  ;;  %v5730_v37 = vpack.c.bf16 %v2593_v17, %v2592_v59 }
 0x551   : > { %v4184_v26 = vadd.f32 %v2189_v8, %v5392_v38 }
 0x552   : > { %v2326_v56 = vadd.f32 %v4183_v29, %v5719_v58 }
 0x553   : > { %v2327_v46 = vadd.f32 %v4184_v26, %v5721_v1  ;;  %v2193_v34 = vpop.f32.mrb[18].mxu1 }
 0x554   : > { %v4185_v50 = vadd.f32 %v2193_v34, %v5394_v41  ;;  %v2195_v7 = vpop.f32.mrb[19].mxu1  ;;  %v2358_v12 = vmax.f32 %v2326_v56, 0.0 }
 0x555   : > { %v2359_v24 = vmax.f32 %v2327_v46, 0.0  ;;  %v4186_v28 = vadd.f32 %v2195_v7, %v5396_v60 }
 0x556   : > { %v2328_v22 = vadd.f32 %v4185_v50, %v5719_v58 }
 0x557   : > { %v2329_v38 = vadd.f32 %v4186_v28, %v5721_v1  ;;  %v2199_v63 = vpop.f32.mrb[20].mxu1  ;;  %2493 = vmatprep.mubr.f32.mxu0 %v2359_v24 }
 0x558   : > { %v4187_v40 = vadd.f32 %v2199_v63, %v5398_v43  ;;  %v2201_v51 = vpop.f32.mrb[21].mxu1  ;;  %2494 = vmatmul.mubr.f32.vlgmr.msra.gmra.mrb[80].mxu0 %v2358_v12  ;;  %v2360_v60 = vmax.f32 %v2328_v22, 0.0  ;;  %v2597_v43 = vld [vmem:[#allocation10 + $0x38] sm:$0xff] }
 0x559   : > { %v2361_v41 = vmax.f32 %v2329_v38, 0.0  ;;  %v4188_v20 = vadd.f32 %v2201_v51, %v5400_v39  ;;  %4106 = vmatpush3.bf16.msra.mxu0 %v5713_v42  ;;  %v5746_v45 = vpack.c.bf16 %v2597_v43, %v2596_v47 }
 0x55a   : > { %v2330_v33 = vadd.f32 %v4187_v40, %v5719_v58  ;;  %4108 = vmatprep.subr.bf16.mxu0 %v5730_v37 }
 0x55b   : > { %v2331_v32 = vadd.f32 %v4188_v20, %v5721_v1  ;;  %v2205_v13 = vpop.f32.mrb[22].mxu1  ;;  %2498 = vmatprep.mubr.f32.mxu0 %v2361_v41 }
 0x55c   : > { %v4189_v3 = vadd.f32 %v2205_v13, %v5402_v44  ;;  %v2207_v53 = vpop.f32.mrb[23].mxu1  ;;  %2499 = vmatmul.mubr.f32.gmra.mrb[82].mxu0 %v2360_v60  ;;  %v2362_v52 = vmax.f32 %v2330_v33, 0.0  ;;  %v2599_v44 = vld [vmem:[#allocation10 + $0x48] sm:$0xff] }
 0x55d   : > { %v2363_v39 = vmax.f32 %v2331_v32, 0.0  ;;  %v4190_v54 = vadd.f32 %v2207_v53, %v5404_v48  ;;  %4110 = vmatpush3.bf16.msra.mxu0 %v5730_v37  ;;  %v5754_v16 = vpack.c.bf16 %v2599_v44, %v2598_v57 }
 0x55e   : > { %v2332_v25 = vadd.f32 %v4189_v3, %v5719_v58  ;;  %4112 = vmatprep.subr.bf16.mxu0 %v5738_v35 }
 0x55f   : > { %v2333_v27 = vadd.f32 %v4190_v54, %v5721_v1  ;;  %v2211_v55 = vpop.f32.mrb[24].mxu1  ;;  %2503 = vmatprep.mubr.f32.mxu0 %v2363_v39 }
 0x560   : > { %v4191_v21 = vadd.f32 %v2211_v55, %v5406_v2  ;;  %v2213_v49 = vpop.f32.mrb[25].mxu1  ;;  %2504 = vmatmul.mubr.f32.gmra.mrb[84].mxu0 %v2362_v52  ;;  %v2364_v30 = vmax.f32 %v2332_v25, 0.0 }
 0x561   : > { %v2365_v48 = vmax.f32 %v2333_v27, 0.0  ;;  %v4192_v9 = vadd.f32 %v2213_v49, %v5408_v61  ;;  %4114 = vmatpush3.bf16.msra.mxu0 %v5738_v35 }
 0x562   : > { %v2334_v18 = vadd.f32 %v4191_v21, %v5719_v58  ;;  %4116 = vmatprep.subr.bf16.mxu0 %v5746_v45 }
 0x563   : > { %v2335_v31 = vadd.f32 %v4192_v9, %v5721_v1  ;;  %v2217_v5 = vpop.f32.mrb[26].mxu1  ;;  %2508 = vmatprep.mubr.f32.mxu0 %v2365_v48 }
 0x564   : > { %v4193_v2 = vadd.f32 %v2217_v5, %v5410_v4  ;;  %v2219_v36 = vpop.f32.mrb[27].mxu1  ;;  %2509 = vmatmul.mubr.f32.gmra.mrb[86].mxu0 %v2364_v30  ;;  %v2366_v15 = vmax.f32 %v2334_v18, 0.0 }
 0x565   : > { %v2367_v19 = vmax.f32 %v2335_v31, 0.0  ;;  %v4194_v61 = vadd.f32 %v2219_v36, %v5412_v6  ;;  %4118 = vmatpush3.bf16.msra.mxu0 %v5746_v45 }
 0x566   : > { %v2336_v29 = vadd.f32 %v4193_v2, %v5719_v58  ;;  %4120 = vmatprep.subr.bf16.mxu0 %v5754_v16 }
 0x567   : > { %v2337_v8 = vadd.f32 %v4194_v61, %v5721_v1  ;;  %v2223_v26 = vpop.f32.mrb[28].mxu1  ;;  %2513 = vmatprep.mubr.f32.mxu0 %v2367_v19 }
 0x568   : > { %v4195_v56 = vadd.f32 %v2223_v26, %v5414_v10  ;;  %v2225_v46 = vpop.f32.mrb[29].mxu1  ;;  %2514 = vmatmul.mubr.f32.gmra.mrb[88].mxu0 %v2366_v15  ;;  %v2368_v6 = vmax.f32 %v2336_v29, 0.0 }
 0x569   : > { %v2369_v4 = vmax.f32 %v2337_v8, 0.0  ;;  %v4196_v34 = vadd.f32 %v2225_v46, %v5416_v11  ;;  %4122 = vmatpush3.bf16.msra.mxu0 %v5754_v16 }
 0x56a   : > { %v2338_v59 = vadd.f32 %v4195_v56, %v5719_v58 }
 0x56b   : > { %v2339_v17 = vadd.f32 %v4196_v34, %v5721_v1  ;;  %v2229_v50 = vpop.f32.mrb[30].mxu1  ;;  %2518 = vmatprep.mubr.f32.mxu0 %v2369_v4 }
 0x56c   : > { %v4197_v7 = vadd.f32 %v2229_v50, %v5418_v14  ;;  %v2231_v24 = vpop.f32.mrb[31].mxu1  ;;  %2519 = vmatmul.mubr.f32.gmra.mrb[90].mxu0 %v2368_v6  ;;  %v2370_v12 = vmax.f32 %v2338_v59, 0.0 }
 0x56d   : > { %v2371_v28 = vmax.f32 %v2339_v17, 0.0  ;;  %v4198_v10 = vadd.f32 %v2231_v24, %v5420_v62  ;;  %v2601_v24 = vld [vmem:[#allocation10 + $0x58] sm:$0xff] }
 0x56e   : > { %v2340_v22 = vadd.f32 %v4197_v7, %v5719_v58  ;;  %v2600_v7 = vld [vmem:[#allocation10 + $0x50] sm:$0xff] }
 0x56f   : > { %v2341_v11 = vadd.f32 %v4198_v10, %v5721_v1  ;;  %v2235_v38 = vpop.f32.mrb[0].mxu1  ;;  %2523 = vmatprep.mubr.f32.mxu0 %v2371_v28  ;;  %v5788_v28 = vpack.c.bf16 %v2601_v24, %v2600_v7  ;;  %v2602_v10 = vld [vmem:[#allocation10 + $0x60] sm:$0xff] }
 0x570   : > { %v2237_v63 = vpop.f32.mrb[1].mxu1  ;;  %2524 = vmatmul.mubr.f32.gmra.mrb[92].mxu0 %v2370_v12  ;;  %v2372_v40 = vmax.f32 %v2340_v22, 0.0  ;;  %v2342_v14 = vadd.f32 %v5719_v58, %v2235_v38  ;;  %v2603_v12 = vld [vmem:[#allocation10 + $0x68] sm:$0xff]  ;;  %v2605_v22 = vld [vmem:[#allocation10 + $0x78] sm:$0xff]  ;;  %v4574_v24 = vld [vmem:[%s5097_s11 + $0x40] sm:$0xff] }
 0x571   : > { %v2373_v0 = vmax.f32 %v2341_v11, 0.0  ;;  %v2343_v23 = vadd.f32 %v5721_v1, %v2237_v63  ;;  %4124 = vmatprep.subr.bf16.mxu0 %v5788_v28  ;;  %v5804_v63 = vld [vmem:[%s6108_s6] ss:$0 sm:$0xff] }
 0x572   : > { %v2374_v60 = vmax.f32 %v2342_v14, 0.0  ;;  %4126 = vmatpush3.bf16.msra.mxu0 %v5788_v28 }
 0x573   : > { %v2375_v51 = vmax.f32 %v2343_v23, 0.0  ;;  %v2241_v41 = vpop.f32.mrb[2].mxu1  ;;  %2528 = vmatprep.mubr.f32.mxu0 %v2373_v0 }
 0x574   : > { %v2243_v20 = vpop.f32.mrb[3].mxu1  ;;  %2529 = vmatmul.mubr.f32.gmra.mrb[94].mxu0 %v2372_v40  ;;  %v2344_v33 = vadd.f32 %v5719_v58, %v2241_v41 }
 0x575   : > { %v2345_v62 = vadd.f32 %v5721_v1, %v2243_v20  ;;  %2533 = vmatprep.mubr.f32.mxu0 %v2375_v51  ;;  %v4566_v20 = vld [vmem:[%s5097_s11] sm:$0xff] }
 0x576   : > { %v2376_v3 = vmax.f32 %v2344_v33, 0.0 }
 0x577   : > { %v2377_v32 = vmax.f32 %v2345_v62, 0.0  ;;  %v2247_v13 = vpop.f32.mrb[4].mxu1 }
 0x578   : > { %v2249_v47 = vpop.f32.mrb[5].mxu1  ;;  %2534 = vmatmul.mubr.f32.gmra.mrb[96].mxu0 %v2374_v60  ;;  %v2346_v53 = vadd.f32 %v5719_v58, %v2247_v13  ;;  %v4567_v13 = vld [vmem:[%s5097_s11 + $0x8] sm:$0xff] }
 0x579   : > { %v2347_v43 = vadd.f32 %v5721_v1, %v2249_v47  ;;  %2538 = vmatprep.mubr.f32.mxu0 %v2377_v32 }
 0x57a   : > { %v2378_v27 = vmax.f32 %v2346_v53, 0.0 }
 0x57b   : > { %v2379_v39 = vmax.f32 %v2347_v43, 0.0  ;;  %v2253_v54 = vpop.f32.mrb[6].mxu1 }
 0x57c   : > { %v2255_v52 = vpop.f32.mrb[7].mxu1  ;;  %2539 = vmatmul.mubr.f32.gmra.mrb[98].mxu0 %v2376_v3  ;;  %v2348_v55 = vadd.f32 %v5719_v58, %v2253_v54 }
 0x57d   : > { %v2349_v25 = vadd.f32 %v5721_v1, %v2255_v52  ;;  %2543 = vmatprep.mubr.f32.mxu0 %v2379_v39  ;;  %v4568_v52 = vld [vmem:[%s5097_s11 + $0x10] sm:$0xff] }
 0x57e   : > { %v2380_v48 = vmax.f32 %v2348_v55, 0.0 }
 0x57f   : > { %v2381_v57 = vmax.f32 %v2349_v25, 0.0  ;;  %v2259_v44 = vpop.f32.mrb[8].mxu1 }
 0x580   : > { %v2261_v21 = vpop.f32.mrb[9].mxu1  ;;  %2544 = vmatmul.mubr.f32.gmra.mrb[100].mxu0 %v2378_v27  ;;  %v2350_v9 = vadd.f32 %v5719_v58, %v2259_v44 }
 0x581   : > { %v2351_v49 = vadd.f32 %v5721_v1, %v2261_v21  ;;  %2548 = vmatprep.mubr.f32.mxu0 %v2381_v57  ;;  %v4569_v21 = vld [vmem:[%s5097_s11 + $0x18] sm:$0xff] }
 0x582   : > { %v2382_v2 = vmax.f32 %v2350_v9, 0.0 }
 0x583   : > { %v2383_v30 = vmax.f32 %v2351_v49, 0.0  ;;  %v2265_v18 = vpop.f32.mrb[10].mxu1 }
 0x584   : > { %v2267_v31 = vpop.f32.mrb[11].mxu1  ;;  %2549 = vmatmul.mubr.f32.gmra.mrb[102].mxu0 %v2380_v48  ;;  %v2352_v36 = vadd.f32 %v5719_v58, %v2265_v18  ;;  %v4570_v18 = vld [vmem:[%s5097_s11 + $0x20] sm:$0xff] }
 0x585   : > { %v2353_v5 = vadd.f32 %v5721_v1, %v2267_v31  ;;  %2553 = vmatprep.mubr.f32.mxu0 %v2383_v30 }
 0x586   : > { %v2384_v8 = vmax.f32 %v2352_v36, 0.0 }
 0x587   : > { %v2385_v19 = vmax.f32 %v2353_v5, 0.0  ;;  %v2271_v61 = vpop.f32.mrb[12].mxu1 }
 0x588   : > { %v2273_v15 = vpop.f32.mrb[13].mxu1  ;;  %2554 = vmatmul.mubr.f32.gmra.mrb[104].mxu0 %v2382_v2  ;;  %v2354_v26 = vadd.f32 %v5719_v58, %v2271_v61 }
 0x589   : > { %v2355_v29 = vadd.f32 %v5721_v1, %v2273_v15  ;;  %2558 = vmatprep.mubr.f32.mxu0 %v2385_v19  ;;  %v4571_v19 = vld [vmem:[%s5097_s11 + $0x28] sm:$0xff] }
 0x58a   : > { %v2386_v6 = vmax.f32 %v2354_v26, 0.0  ;;  %v4572_v26 = vld [vmem:[%s5097_s11 + $0x30] sm:$0xff] }
 0x58b   : > { %v2387_v56 = vmax.f32 %v2355_v29, 0.0  ;;  %v2277_v46 = vpop.f32.mrb[14].mxu1 }
 0x58c   : > { %v2279_v4 = vpop.f32.mrb[15].mxu1  ;;  %2559 = vmatmul.mubr.f32.gmra.mrb[106].mxu0 %v2384_v8  ;;  %v2356_v59 = vadd.f32 %v5719_v58, %v2277_v46  ;;  %v2604_v58 = vld [vmem:[#allocation10 + $0x70] sm:$0xff] }
 0x58d   : > { %v2357_v34 = vadd.f32 %v5721_v1, %v2279_v4  ;;  %2563 = vmatprep.mubr.f32.mxu0 %v2387_v56  ;;  %v5792_v1 = vpack.c.bf16 %v2603_v12, %v2602_v10  ;;  %v5796_v11 = vpack.c.bf16 %v2605_v22, %v2604_v58 }
 0x58e   : > { %v2388_v50 = vmax.f32 %v2356_v59, 0.0 }
 0x58f   : > { %v2389_v17 = vmax.f32 %v2357_v34, 0.0  ;;  %4128 = vmatprep.subr.bf16.mxu0 %v5792_v1 }
 0x590   : > { %2564 = vmatmul.mubr.f32.gmra.mrb[108].mxu0 %v2386_v6  ;;  %v4573_v6 = vld [vmem:[%s5097_s11 + $0x38] sm:$0xff] }
 0x591   : > { %2568 = vmatprep.mubr.f32.mxu0 %v2389_v17  ;;  %4130 = vmatpush3.bf16.msra.mxu0 %v5792_v1 }
 0x592   : > { %4132 = vmatprep.subr.bf16.mxu0 %v5796_v11 }
 0x594   : > { %2569 = vmatmul.mubr.f32.gmra.mrb[110].mxu0 %v2388_v50 }
 0x595   : > { %4134 = vmatpush3.bf16.msra.mxu0 %v5796_v11 }
 0x596   : > { %4136 = vmatprep.subr.bf16.mxu0 %v5713_v42 }
 0x62b   : > { %v3335_v38 = vpop.f32.mrb[80].mxu0 }
 0x62c   : > { %v3336_v0 = vpop.f32.mrb[81].mxu0 }
 0x62d   : > { %v3337_v23 = vadd.f32 %v3336_v0, %v3335_v38  ;;  %v4575_v38 = vld [vmem:[%s5097_s11 + $0x48] sm:$0xff] }
 0x62f   : > { %v2496_v40 = vadd.f32 %v3337_v23, %v5804_v63  ;;  %v3338_v14 = vpop.f32.mrb[82].mxu0 }
 0x630   : > { %v3339_v51 = vpop.f32.mrb[83].mxu0 }
 0x631   : > { %v3340_v41 = vadd.f32 %v3339_v51, %v3338_v14  ;;  %v5808_v62 = vadd.f32 %v4566_v20, %v2496_v40  ;;  %v4576_v51 = vld [vmem:[%s5097_s11 + $0x50] sm:$0xff] }
 0x633   : > { %v2501_v60 = vadd.f32 %v3340_v41, %v5804_v63  ;;  %v3341_v33 = vpop.f32.mrb[84].mxu0  ;;  %3703 = vmatprep.mubr.f32.mxu0 %v5808_v62 }
 0x634   : > { %v3342_v32 = vpop.f32.mrb[85].mxu0 }
 0x635   : > { %v5813_v47 = vadd.f32 %v4567_v13, %v2501_v60  ;;  %v3343_v43 = vadd.f32 %v3342_v32, %v3341_v33  ;;  %v4577_v32 = vld [vmem:[%s5097_s11 + $0x58] sm:$0xff] }
 0x637   : > { %v2506_v3 = vadd.f32 %v3343_v43, %v5804_v63  ;;  %v3344_v53 = vpop.f32.mrb[86].mxu0  ;;  %3704 = vmatmul.mubr.f32.vlgmr.msra.gmra.mrb[112].mxu0 %v5813_v47 }
 0x638   : > { %v3345_v39 = vpop.f32.mrb[87].mxu0  ;;  %4138 = vmatpush3.bf16.msra.mxu0 %v5713_v42 }
 0x639   : > { %v3346_v54 = vadd.f32 %v3345_v39, %v3344_v53  ;;  %v5819_v25 = vadd.f32 %v4568_v52, %v2506_v3  ;;  %4140 = vmatprep.subr.bf16.mxu0 %v5730_v37 }
 0x63b   : > { %v2511_v27 = vadd.f32 %v3346_v54, %v5804_v63  ;;  %v3347_v55 = vpop.f32.mrb[88].mxu0  ;;  %3706 = vmatprep.mubr.f32.mxu0 %v5819_v25  ;;  %v4578_v54 = vld [vmem:[%s5097_s11 + $0x60] sm:$0xff] }
 0x63c   : > { %v3348_v57 = vpop.f32.mrb[89].mxu0  ;;  %4142 = vmatpush3.bf16.msra.mxu0 %v5730_v37 }
 0x63d   : > { %v3349_v44 = vadd.f32 %v3348_v57, %v3347_v55  ;;  %v5826_v49 = vadd.f32 %v4569_v21, %v2511_v27  ;;  %4144 = vmatprep.subr.bf16.mxu0 %v5738_v35  ;;  %v4579_v21 = vld [vmem:[%s5097_s11 + $0x68] sm:$0xff] }
 0x63f   : > { %v2516_v42 = vadd.f32 %v3349_v44, %v5804_v63  ;;  %v3350_v48 = vpop.f32.mrb[90].mxu0  ;;  %3707 = vmatmul.mubr.f32.gmra.mrb[114].mxu0 %v5826_v49 }
 0x640   : > { %v3351_v9 = vpop.f32.mrb[91].mxu0  ;;  %4146 = vmatpush3.bf16.msra.mxu0 %v5738_v35 }
 0x641   : > { %v3352_v30 = vadd.f32 %v3351_v9, %v3350_v48  ;;  %v5833_v31 = vadd.f32 %v4570_v18, %v2516_v42  ;;  %4148 = vmatprep.subr.bf16.mxu0 %v5746_v45 }
 0x643   : > { %v2521_v37 = vadd.f32 %v3352_v30, %v5804_v63  ;;  %v3353_v5 = vpop.f32.mrb[92].mxu0  ;;  %3709 = vmatprep.mubr.f32.mxu0 %v5833_v31 }
 0x644   : > { %v3354_v2 = vpop.f32.mrb[93].mxu0  ;;  %4150 = vmatpush3.bf16.msra.mxu0 %v5746_v45 }
 0x645   : > { %v3355_v36 = vadd.f32 %v3354_v2, %v3353_v5  ;;  %v5840_v61 = vadd.f32 %v4571_v19, %v2521_v37  ;;  %4152 = vmatprep.subr.bf16.mxu0 %v5754_v16  ;;  %v4580_v37 = vld [vmem:[%s5097_s11 + $0x70] sm:$0xff] }
 0x647   : > { %v2526_v35 = vadd.f32 %v3355_v36, %v5804_v63  ;;  %v3356_v15 = vpop.f32.mrb[94].mxu0  ;;  %3710 = vmatmul.mubr.f32.gmra.mrb[116].mxu0 %v5840_v61  ;;  %v4581_v36 = vld [vmem:[%s5097_s11 + $0x78] sm:$0xff]  ;;  %s6143_s11 = sld [smem:[#allocation18_spill]] }
 0x648   : > { %v3357_v29 = vpop.f32.mrb[95].mxu0  ;;  %4154 = vmatpush3.bf16.msra.mxu0 %v5754_v16 }
 0x649   : > { %v3358_v8 = vadd.f32 %v3357_v29, %v3356_v15  ;;  %v5847_v56 = vadd.f32 %v4572_v26, %v2526_v35  ;;  %4156 = vmatprep.subr.bf16.mxu0 %v5788_v28 }
 0x64b   : > { %v2531_v45 = vadd.f32 %v3358_v8, %v5804_v63  ;;  %v3359_v46 = vpop.f32.mrb[96].mxu0  ;;  %3712 = vmatprep.mubr.f32.mxu0 %v5847_v56 }
 0x64c   : > { %v3360_v4 = vpop.f32.mrb[97].mxu0  ;;  %4158 = vmatpush3.bf16.msra.mxu0 %v5788_v28 }
 0x64d   : > { %v3361_v34 = vadd.f32 %v3360_v4, %v3359_v46  ;;  %v5854_v59 = vadd.f32 %v4573_v6, %v2531_v45  ;;  %4160 = vmatprep.subr.bf16.mxu0 %v5792_v1 }
 0x64f   : > { %v2536_v16 = vadd.f32 %v3361_v34, %v5804_v63  ;;  %v3362_v17 = vpop.f32.mrb[98].mxu0  ;;  %3713 = vmatmul.mubr.f32.gmra.mrb[118].mxu0 %v5854_v59 }
 0x650   : > { %v3363_v50 = vpop.f32.mrb[99].mxu0  ;;  %4162 = vmatpush3.bf16.msra.mxu0 %v5792_v1 }
 0x651   : > { %v3364_v7 = vadd.f32 %v3363_v50, %v3362_v17  ;;  %v5861_v10 = vadd.f32 %v4574_v24, %v2536_v16  ;;  %4164 = vmatprep.subr.bf16.mxu0 %v5796_v11 }
 0x653   : > { %v2541_v28 = vadd.f32 %v3364_v7, %v5804_v63  ;;  %v3365_v12 = vpop.f32.mrb[100].mxu0  ;;  %3715 = vmatprep.mubr.f32.mxu0 %v5861_v10 }
 0x654   : > { %v3366_v58 = vpop.f32.mrb[101].mxu0  ;;  %4166 = vmatpush3.bf16.msra.mxu0 %v5796_v11 }
 0x655   : > { %v3367_v22 = vadd.f32 %v3366_v58, %v3365_v12  ;;  %v5868_v0 = vadd.f32 %v4575_v38, %v2541_v28 }
 0x657   : > { %v2546_v1 = vadd.f32 %v3367_v22, %v5804_v63  ;;  %v3368_v23 = vpop.f32.mrb[102].mxu0  ;;  %3716 = vmatmul.mubr.f32.gmra.mrb[120].mxu0 %v5868_v0 }
 0x658   : > { %v3369_v40 = vpop.f32.mrb[103].mxu0 }
 0x659   : > { %v3370_v14 = vadd.f32 %v3369_v40, %v3368_v23  ;;  %v5873_v41 = vadd.f32 %v4576_v51, %v2546_v1 }
 0x65b   : > { %v2551_v20 = vadd.f32 %v3370_v14, %v5804_v63  ;;  %v3371_v60 = vpop.f32.mrb[104].mxu0  ;;  %3718 = vmatprep.mubr.f32.mxu0 %v5873_v41 }
 0x65c   : > { %v3372_v11 = vpop.f32.mrb[105].mxu0 }
 0x65d   : > { %v3373_v33 = vadd.f32 %v3372_v11, %v3371_v60  ;;  %v5878_v13 = vadd.f32 %v4577_v32, %v2551_v20 }
 0x65f   : > { %v2556_v43 = vadd.f32 %v3373_v33, %v5804_v63  ;;  %v3374_v3 = vpop.f32.mrb[106].mxu0  ;;  %3719 = vmatmul.mubr.f32.gmra.mrb[122].mxu0 %v5878_v13 }
 0x660   : > { %v3375_v53 = vpop.f32.mrb[107].mxu0 }
 0x661   : > { %v3376_v39 = vadd.f32 %v3375_v53, %v3374_v3  ;;  %v5883_v52 = vadd.f32 %v4578_v54, %v2556_v43 }
 0x663   : > { %v2561_v27 = vadd.f32 %v3376_v39, %v5804_v63  ;;  %v3377_v55 = vpop.f32.mrb[108].mxu0  ;;  %3721 = vmatprep.mubr.f32.mxu0 %v5883_v52 }
 0x664   : > { %v3378_v57 = vpop.f32.mrb[109].mxu0 }
 0x665   : > { %v3379_v44 = vadd.f32 %v3378_v57, %v3377_v55  ;;  %v2587_v42 = vadd.f32 %v4579_v21, %v2561_v27 }
 0x667   : > { %v2566_v48 = vadd.f32 %v3379_v44, %v5804_v63  ;;  %v3380_v9 = vpop.f32.mrb[110].mxu0  ;;  %3722 = vmatmul.mubr.f32.gmra.mrb[124].mxu0 %v2587_v42 }
 0x668   : > { %v3381_v30 = vpop.f32.mrb[111].mxu0 }
 0x669   : > { %v3382_v18 = vadd.f32 %v3381_v30, %v3380_v9  ;;  %v5890_v5 = vadd.f32 %v4580_v37, %v2566_v48  ;;  %v5976_v30 = vld [vmem:[%s6109_s7] ss:$0 sm:$0xff] }
 0x66b   : > { %v2571_v2 = vadd.f32 %v3382_v18, %v5804_v63  ;;  %3724 = vmatprep.mubr.f32.mxu0 %v5890_v5 }
 0x66d   : > { %v2589_v19 = vadd.f32 %v4581_v36, %v2571_v2 }
 0x66f   : > { %3725 = vmatmul.mubr.f32.gmra.mrb[126].mxu0 %v2589_v19 }
 0x70a   : > { %v3705_v35 = vpop.f32.mrb[112].mxu0 }
 0x70b   : > { %v5896_v15 = vsub.f32 %v5813_v47, %v3705_v35  ;;  %v2672_v29 = vpop.f32.mrb[113].mxu0 }
 0x70c   : > { %v5899_v8 = vsub.f32 %v5808_v62, %v2672_v29 }
 0x70d   : > { %v2768_v45 = vmul.f32 %v5896_v15, %v5896_v15 }
 0x70e   : > { %v2767_v26 = vmul.f32 %v5899_v8, %v5899_v8 }
 0x710   : > { %3759 = vmatprep.mubr.f32.mxu0 %v2767_v26 }
 0x711   : > { %3760 = vmatmul.mubr.f32.vlgmr.msra.gmra.mrb[128].mxu0 %v2768_v45 }
 0x712   : > { %v3708_v63 = vpop.f32.mrb[114].mxu0 }
 0x713   : > { %v5906_v46 = vsub.f32 %v5826_v49, %v3708_v63  ;;  %v2682_v4 = vpop.f32.mrb[115].mxu0 }
 0x714   : > { %v5909_v47 = vsub.f32 %v5819_v25, %v2682_v4 }
 0x715   : > { %v2770_v34 = vmul.f32 %v5906_v46, %v5906_v46 }
 0x716   : > { %v2769_v62 = vmul.f32 %v5909_v47, %v5909_v47 }
 0x718   : > { %3762 = vmatprep.mubr.f32.mxu0 %v2769_v62 }
 0x719   : > { %3763 = vmatmul.mubr.f32.gmra.mrb[130].mxu0 %v2770_v34 }
 0x71a   : > { %v3711_v6 = vpop.f32.mrb[116].mxu0 }
 0x71b   : > { %v5916_v16 = vsub.f32 %v5840_v61, %v3711_v6  ;;  %v2692_v17 = vpop.f32.mrb[117].mxu0 }
 0x71c   : > { %v5919_v49 = vsub.f32 %v5833_v31, %v2692_v17 }
 0x71d   : > { %v2772_v50 = vmul.f32 %v5916_v16, %v5916_v16 }
 0x71e   : > { %v2771_v25 = vmul.f32 %v5919_v49, %v5919_v49 }
 0x720   : > { %3765 = vmatprep.mubr.f32.mxu0 %v2771_v25 }
 0x721   : > { %3766 = vmatmul.mubr.f32.gmra.mrb[132].mxu0 %v2772_v50 }
 0x722   : > { %v3714_v7 = vpop.f32.mrb[118].mxu0 }
 0x723   : > { %v5926_v24 = vsub.f32 %v5854_v59, %v3714_v7  ;;  %v2702_v28 = vpop.f32.mrb[119].mxu0 }
 0x724   : > { %v5929_v61 = vsub.f32 %v5847_v56, %v2702_v28 }
 0x725   : > { %v2774_v12 = vmul.f32 %v5926_v24, %v5926_v24 }
 0x726   : > { %v2773_v31 = vmul.f32 %v5929_v61, %v5929_v61 }
 0x728   : > { %3768 = vmatprep.mubr.f32.mxu0 %v2773_v31 }
 0x729   : > { %3769 = vmatmul.mubr.f32.gmra.mrb[134].mxu0 %v2774_v12 }
 0x72a   : > { %v3717_v58 = vpop.f32.mrb[120].mxu0 }
 0x72b   : > { %v5936_v22 = vsub.f32 %v5868_v0, %v3717_v58  ;;  %v2712_v38 = vpop.f32.mrb[121].mxu0 }
 0x72c   : > { %v5939_v59 = vsub.f32 %v5861_v10, %v2712_v38 }
 0x72d   : > { %v2776_v1 = vmul.f32 %v5936_v22, %v5936_v22 }
 0x72e   : > { %v2775_v56 = vmul.f32 %v5939_v59, %v5939_v59 }
 0x730   : > { %3771 = vmatprep.mubr.f32.mxu0 %v2775_v56 }
 0x731   : > { %3772 = vmatmul.mubr.f32.gmra.mrb[136].mxu0 %v2776_v1 }
 0x732   : > { %v3720_v23 = vpop.f32.mrb[122].mxu0 }
 0x733   : > { %v5946_v40 = vsub.f32 %v5878_v13, %v3720_v23  ;;  %v2722_v14 = vpop.f32.mrb[123].mxu0 }
 0x734   : > { %v5949_v0 = vsub.f32 %v5873_v41, %v2722_v14 }
 0x735   : > { %v2778_v51 = vmul.f32 %v5946_v40, %v5946_v40 }
 0x736   : > { %v2777_v10 = vmul.f32 %v5949_v0, %v5949_v0 }
 0x738   : > { %3774 = vmatprep.mubr.f32.mxu0 %v2777_v10 }
 0x739   : > { %3775 = vmatmul.mubr.f32.gmra.mrb[138].mxu0 %v2778_v51 }
 0x73a   : > { %v3723_v20 = vpop.f32.mrb[124].mxu0 }
 0x73b   : > { %v5955_v60 = vsub.f32 %v2587_v42, %v3723_v20  ;;  %v2732_v11 = vpop.f32.mrb[125].mxu0 }
 0x73c   : > { %v5958_v33 = vsub.f32 %v5883_v52, %v2732_v11 }
 0x73d   : > { %v2780_v41 = vmul.f32 %v5955_v60, %v5955_v60 }
 0x73e   : > { %v2779_v32 = vmul.f32 %v5958_v33, %v5958_v33 }
 0x740   : > { %3777 = vmatprep.mubr.f32.mxu0 %v2779_v32 }
 0x741   : > { %3778 = vmatmul.mubr.f32.gmra.mrb[140].mxu0 %v2780_v41 }
 0x742   : > { %v3726_v13 = vpop.f32.mrb[126].mxu0 }
 0x743   : > { %v5964_v43 = vsub.f32 %v2589_v19, %v3726_v13  ;;  %v2742_v3 = vpop.f32.mrb[127].mxu0 }
 0x744   : > { %v5967_v53 = vsub.f32 %v5890_v5, %v2742_v3  ;;  %v5982_v5 = vld [vmem:[%s6143_s11] ss:$0 sm:$0xff] }
 0x745   : > { %v2782_v54 = vmul.f32 %v5964_v43, %v5964_v43 }
 0x746   : > { %v2781_v39 = vmul.f32 %v5967_v53, %v5967_v53 }
 0x748   : > { %3780 = vmatprep.mubr.f32.mxu0 %v2781_v39 }
 0x749   : > { %3781 = vmatmul.mubr.f32.gmra.mrb[142].mxu0 %v2782_v54 }
 0x7e4   : > { %v3761_v52 = vpop.f32.mrb[128].mxu0 }
 0x7e5   : > { %v2855_v27 = vadd.f32 1e-05, %v3761_v52  ;;  %v2849_v55 = vpop.f32.mrb[129].mxu0 }
 0x7e6   : > { %v2850_v57 = vadd.f32 1e-05, %v2849_v55 }
 0x7e7   : > { %4533 = vrsqrt.f32 %v2855_v27 }
 0x7e8   : > { %4535 = vrsqrt.f32 %v2850_v57 }
 0x7ec   : > { %v3764_v44 = vpop.f32.mrb[130].mxu0 }
 0x7ed   : > { %v2865_v21 = vadd.f32 1e-05, %v3764_v44  ;;  %v2859_v42 = vpop.f32.mrb[131].mxu0 }
 0x7ee   : > { %v2860_v48 = vadd.f32 1e-05, %v2859_v42 }
 0x7ef   : > { %4537 = vrsqrt.f32 %v2865_v21 }
 0x7f0   : > { %4539 = vrsqrt.f32 %v2860_v48 }
 0x7f1   : > { %v4534_v9 = vpop.eup %4533 }
 0x7f2   : > { %v4536_v18 = vpop.eup %4535  ;;  %v2945_v37 = vmul.f32 %v4534_v9, %v5896_v15 }
 0x7f3   : > { %v2944_v2 = vmul.f32 %v4536_v18, %v5899_v8 }
 0x7f4   : > { %v2968_v36 = vmul.f32 %v5976_v30, %v2945_v37  ;;  %v3767_v19 = vpop.f32.mrb[132].mxu0 }
 0x7f5   : > { %v2967_v35 = vmul.f32 %v5976_v30, %v2944_v2  ;;  %v2875_v29 = vadd.f32 1e-05, %v3767_v19  ;;  %v2869_v26 = vpop.f32.mrb[133].mxu0 }
 0x7f6   : > { %v2991_v45 = vadd.f32 %v5982_v5, %v2968_v36  ;;  %v2870_v63 = vadd.f32 1e-05, %v2869_v26 }
 0x7f7   : > { %v2990_v4 = vadd.f32 %v5982_v5, %v2967_v35  ;;  %4541 = vrsqrt.f32 %v2875_v29 }
 0x7f8   : > { %3007 = vst [vmem:[%s5991_s19 + $0x8] sm:$0xff] %v2991_v45  ;;  %4543 = vrsqrt.f32 %v2870_v63 }
 0x7f9   : > { %v4538_v15 = vpop.eup %4537  ;;  %3006 = vst [vmem:[%s5991_s19] sm:$0xff] %v2990_v4 }
 0x7fa   : > { %v4540_v8 = vpop.eup %4539  ;;  %v2947_v62 = vmul.f32 %v4538_v15, %v5906_v46 }
 0x7fb   : > { %v2946_v34 = vmul.f32 %v4540_v8, %v5909_v47 }
 0x7fc   : > { %v2970_v6 = vmul.f32 %v5976_v30, %v2947_v62  ;;  %v3770_v17 = vpop.f32.mrb[134].mxu0 }
 0x7fd   : > { %v2969_v25 = vmul.f32 %v5976_v30, %v2946_v34  ;;  %v2885_v50 = vadd.f32 1e-05, %v3770_v17  ;;  %v2879_v7 = vpop.f32.mrb[135].mxu0 }
 0x7fe   : > { %v2993_v28 = vadd.f32 %v5982_v5, %v2970_v6  ;;  %v2880_v31 = vadd.f32 1e-05, %v2879_v7 }
 0x7ff   : > { %v2992_v12 = vadd.f32 %v5982_v5, %v2969_v25  ;;  %4545 = vrsqrt.f32 %v2885_v50 }
 0x800   : > { %3009 = vst [vmem:[%s5991_s19 + $0x18] sm:$0xff] %v2993_v28  ;;  %4547 = vrsqrt.f32 %v2880_v31 }
 0x801   : > { %v4542_v58 = vpop.eup %4541  ;;  %3008 = vst [vmem:[%s5991_s19 + $0x10] sm:$0xff] %v2992_v12 }
 0x802   : > { %v4544_v46 = vpop.eup %4543  ;;  %v2949_v47 = vmul.f32 %v4542_v58, %v5916_v16 }
 0x803   : > { %v2948_v38 = vmul.f32 %v4544_v46, %v5919_v49 }
 0x804   : > { %v2972_v56 = vmul.f32 %v5976_v30, %v2949_v47  ;;  %v3773_v1 = vpop.f32.mrb[136].mxu0 }
 0x805   : > { %v2971_v23 = vmul.f32 %v5976_v30, %v2948_v38  ;;  %v2895_v14 = vadd.f32 1e-05, %v3773_v1  ;;  %v2889_v10 = vpop.f32.mrb[137].mxu0 }
 0x806   : > { %v2995_v51 = vadd.f32 %v5982_v5, %v2972_v56  ;;  %v2890_v20 = vadd.f32 1e-05, %v2889_v10 }
 0x807   : > { %v2994_v11 = vadd.f32 %v5982_v5, %v2971_v23  ;;  %4549 = vrsqrt.f32 %v2895_v14 }
 0x808   : > { %3011 = vst [vmem:[%s5991_s19 + $0x28] sm:$0xff] %v2995_v51  ;;  %4551 = vrsqrt.f32 %v2890_v20 }
 0x809   : > { %v4546_v32 = vpop.eup %4545  ;;  %3010 = vst [vmem:[%s5991_s19 + $0x20] sm:$0xff] %v2994_v11 }
 0x80a   : > { %v4548_v16 = vpop.eup %4547  ;;  %v2951_v49 = vmul.f32 %v4546_v32, %v5926_v24 }
 0x80b   : > { %v2950_v41 = vmul.f32 %v4548_v16, %v5929_v61 }
 0x80c   : > { %v2974_v13 = vmul.f32 %v5976_v30, %v2951_v49  ;;  %v3776_v3 = vpop.f32.mrb[138].mxu0 }
 0x80d   : > { %v2973_v39 = vmul.f32 %v5976_v30, %v2950_v41  ;;  %v2905_v54 = vadd.f32 1e-05, %v3776_v3  ;;  %v2899_v52 = vpop.f32.mrb[139].mxu0 }
 0x80e   : > { %v2997_v27 = vadd.f32 %v5982_v5, %v2974_v13  ;;  %v2900_v55 = vadd.f32 1e-05, %v2899_v52 }
 0x80f   : > { %v2996_v57 = vadd.f32 %v5982_v5, %v2973_v39  ;;  %4553 = vrsqrt.f32 %v2905_v54 }
 0x810   : > { %3013 = vst [vmem:[%s5991_s19 + $0x38] sm:$0xff] %v2997_v27  ;;  %4555 = vrsqrt.f32 %v2900_v55 }
 0x811   : > { %v4550_v44 = vpop.eup %4549  ;;  %3012 = vst [vmem:[%s5991_s19 + $0x30] sm:$0xff] %v2996_v57 }
 0x812   : > { %v4552_v24 = vpop.eup %4551  ;;  %v2953_v61 = vmul.f32 %v4550_v44, %v5936_v22 }
 0x813   : > { %v2952_v21 = vmul.f32 %v4552_v24, %v5939_v59 }
 0x814   : > { %v2976_v42 = vmul.f32 %v5976_v30, %v2953_v61  ;;  %v3779_v48 = vpop.f32.mrb[140].mxu0 }
 0x815   : > { %v2975_v9 = vmul.f32 %v5976_v30, %v2952_v21  ;;  %v2915_v18 = vadd.f32 1e-05, %v3779_v48  ;;  %v2909_v37 = vpop.f32.mrb[141].mxu0 }
 0x816   : > { %v2999_v2 = vadd.f32 %v5982_v5, %v2976_v42  ;;  %v2910_v36 = vadd.f32 1e-05, %v2909_v37 }
 0x817   : > { %v2998_v19 = vadd.f32 %v5982_v5, %v2975_v9  ;;  %4557 = vrsqrt.f32 %v2915_v18 }
 0x818   : > { %3015 = vst [vmem:[%s5991_s19 + $0x48] sm:$0xff] %v2999_v2  ;;  %4559 = vrsqrt.f32 %v2910_v36 }
 0x819   : > { %v4554_v35 = vpop.eup %4553  ;;  %3014 = vst [vmem:[%s5991_s19 + $0x40] sm:$0xff] %v2998_v19 }
 0x81a   : > { %v4556_v22 = vpop.eup %4555  ;;  %v2955_v59 = vmul.f32 %v4554_v35, %v5946_v40 }
 0x81b   : > { %v2954_v29 = vmul.f32 %v4556_v22, %v5949_v0 }
 0x81c   : > { %v2978_v26 = vmul.f32 %v5976_v30, %v2955_v59  ;;  %v3782_v45 = vpop.f32.mrb[142].mxu0 }
 0x81d   : > { %v2977_v63 = vmul.f32 %v5976_v30, %v2954_v29  ;;  %v2925_v4 = vadd.f32 1e-05, %v3782_v45  ;;  %v2919_v15 = vpop.f32.mrb[143].mxu0 }
 0x81e   : > { %v3001_v8 = vadd.f32 %v5982_v5, %v2978_v26  ;;  %v2920_v62 = vadd.f32 1e-05, %v2919_v15 }
 0x81f   : > { %v3000_v34 = vadd.f32 %v5982_v5, %v2977_v63  ;;  %4561 = vrsqrt.f32 %v2925_v4 }
 0x820   : > { %3017 = vst [vmem:[%s5991_s19 + $0x58] sm:$0xff] %v3001_v8  ;;  %4563 = vrsqrt.f32 %v2920_v62 }
 0x821   : > { %v4558_v40 = vpop.eup %4557  ;;  %3016 = vst [vmem:[%s5991_s19 + $0x50] sm:$0xff] %v3000_v34 }
 0x822   : > { %v4560_v0 = vpop.eup %4559  ;;  %v2957_v6 = vmul.f32 %v4558_v40, %v5955_v60 }
 0x823   : > { %v2956_v17 = vmul.f32 %v4560_v0, %v5958_v33 }
 0x824   : > { %v2980_v25 = vmul.f32 %v5976_v30, %v2957_v6 }
 0x825   : > { %v2979_v50 = vmul.f32 %v5976_v30, %v2956_v17 }
 0x826   : > { %v3003_v7 = vadd.f32 %v5982_v5, %v2980_v25 }
 0x827   : > { %v3002_v28 = vadd.f32 %v5982_v5, %v2979_v50 }
 0x828   : > { %3019 = vst [vmem:[%s5991_s19 + $0x68] sm:$0xff] %v3003_v7 }
 0x829   : > { %v4562_v31 = vpop.eup %4561  ;;  %3018 = vst [vmem:[%s5991_s19 + $0x60] sm:$0xff] %v3002_v28 }
 0x82a   : > { %v4564_v12 = vpop.eup %4563  ;;  %v2959_v60 = vmul.f32 %v4562_v31, %v5964_v43 }
 0x82b   : > { %v2958_v33 = vmul.f32 %v4564_v12, %v5967_v53 }
 0x82c   : > { %v2982_v58 = vmul.f32 %v5976_v30, %v2959_v60 }
 0x82d   : > { %v2981_v46 = vmul.f32 %v5976_v30, %v2958_v33 }
 0x82e   : > { %v3005_v47 = vadd.f32 %v5982_v5, %v2982_v58 }
 0x82f   : > { %v3004_v43 = vadd.f32 %v5982_v5, %v2981_v46 }
 0x830   : > { %3021 = vst [vmem:[%s5991_s19 + $0x78] sm:$0xff] %v3005_v47 }
 0x831   : > { %3020 = vst [vmem:[%s5991_s19 + $0x70] sm:$0xff] %v3004_v43 }
 0x832   : > { %4737 = shalt.err (!%p4734_p13)
}
 0x833   : > { %s4738_s29 = scalar_lea.hbm %s6053_s30, 2048  ;;  %s4742_s19 = scalar_lea.hbm %s6144_s23, 4096 }
 0x834   : > { %p4739_p9 = scmp.ne.s32.totalorder %s6053_s30, %s4738_s29  ;;  %p4743_p4 = scmp.lt.u32.totalorder %s6053_s30, %s6144_s23 }
 0x835   : > { %p4744_p8 = scmp.lt.u32.totalorder %s4742_s19, %s4738_s29  ;;  %p4746_p3 = scmp.lt.u32.totalorder %s4738_s29, %s6053_s30 }
 0x836   : > { %p4740_p0 = pnand %p4739_p9, %p5036_p10 }
 0x837   : > { %p4745_p6 = por %p4744_p8, %p4743_p4 }
 0x838   : > { %p4741_p11 = pneg %p4740_p0 }
 0x839   : > { %p4747_p5 = por %p4746_p3, %p4745_p6 }
 0x83b   : > { %p4748_p7 = pnand %p4747_p5, %p4741_p11 }
 0x83d   : > { %4751 = shalt.err (!%p4748_p7)
}
 0x83e   : > { %s4811_s8 = smov 128   ;;  %s4812_s24 = smov 8  }
 0x83f   : > { %4329 = dma.vmem_to_hbm [thread:$0]  (%p5036_p10), %s6055_s21, 2048, %s6053_s30, %s3023_s17, %s4811_s8, %s4811_s8, %s4812_s24  }
 0x840 PF: > { %s6145_s18 = sld [smem:[#allocation16_spill]]  ;;  %s6146_s25 = sld [smem:[#allocation17_spill]] }
 0x841   : > { %p6148_p1 = scmp.ge.s32.totalorder %s4798_s16, 2 }
 0x846   : > { %s3051_s12 = sand.u32 1, %s6145_s18   ;;  %p6147_p12 = scmp.ne.s32.totalorder %s6146_s25, 0 }
 0x847   : > { %s3052_s29 = scalar_lea.sflag [#allocation4], %s3051_s12 }
 0x848   : > { %p4349_p2 = pnand %p6148_p1, %p6147_p12 }
 0x84a   : > { %4781 = dma.done.wait (!%p4349_p2), %s3052_s29, 2048  }
 0x84b   : > { %4783 = vsyncadd (!%p4349_p2), %s3052_s29, 4294965248  ;;  %p25_p13 = scmp.ge.s32.totalorder %s5026_s22, 4   ;;  %s6149_s13 = smov %s4790_s14 }
 0x84c   : > { %s6150_s14 = smov %s4794_s15  ;;  %s6151_s15 = smov %s5042_s20 }
 0x84d   : > { %s6152_s16 = smov %s5026_s22  ;;  %27 = sbr.rel (!%p25_p13) target bundleno = 10 (0xa), region = 125 }
 0x854   :  { %3057 = vsyncpa [#allocation3], 1 }
 0x855   :  { %3059 = vsyncpa [#allocation3 + $0x1], 1 }
 0x856   :  { %3060 = vsyncpa [#allocation6], 1 }
 0x857   :  { %3061 = vsyncpa [#allocation9], 1 }
 0x858   :  { %3062 = vsyncpa [#allocation4], 1 }
 0x859   :  { %3064 = vsyncpa [#allocation4 + $0x1], 1 }

</bundles_post_ra>
